<compile_context>
chip_gen: v7x
topology: tpu7x:2x2x1
jax: 0.10.0
libtpu: 0.0.40
codegen_flags: <defaults>
</compile_context>

<pallas_src>
import functools
from typing import NamedTuple

import jax
import jax.numpy as jnp
from jax.experimental import pallas as pl
from jax.experimental.pallas import tpu as pltpu


class DQNConfig(NamedTuple):
    c: int
    h: int
    w: int
    k1: int
    s1: int
    f1: int
    k2: int
    s2: int
    f2: int
    k3: int
    s3: int
    f3: int
    fc: int
    num_actions: int


def _conv_out(size, k, s):
    return (size - k) // s + 1


def _round_up(x, m):
    return ((x + m - 1) // m) * m


def _derived(cfg):
    oh1 = _conv_out(cfg.h, cfg.k1, cfg.s1)
    ow1 = _conv_out(cfg.w, cfg.k1, cfg.s1)
    oh2 = _conv_out(oh1, cfg.k2, cfg.s2)
    ow2 = _conv_out(ow1, cfg.k2, cfg.s2)
    oh3 = _conv_out(oh2, cfg.k3, cfg.s3)
    ow3 = _conv_out(ow2, cfg.k3, cfg.s3)
    return oh1, ow1, oh2, ow2, oh3, ow3


def _bias_offsets(cfg):
    """Static, 128-aligned lane offsets of each shift/bias inside the f32 slab."""
    na_pad = _round_up(cfg.num_actions, 128)
    offs, o = {}, 0
    for name, size in (("sh1", cfg.f1), ("sh2", cfg.f2), ("sh3", cfg.f3),
                       ("bfc", cfg.fc), ("bout", na_pad)):
        offs[name] = o
        o += _round_up(size, 128)
    return offs, o, na_pad


# ----------------------------------------------------------------------------
# Fused Pallas kernel: the whole forward, 5 K-packed MXU matmuls, VMEM resident.
# ----------------------------------------------------------------------------
def _dqn_kernel(x_ref, w1_ref, w23_ref, wfc_ref, wout_ref, b_ref, o_ref,
                p1_ref, p2_ref, p3_ref, *, cfg):
    f32 = jnp.float32
    bf16 = jnp.bfloat16

    oh1, ow1, oh2, ow2, oh3, ow3 = _derived(cfg)
    offs, _, _ = _bias_offsets(cfg)

    n = x_ref.shape[1]                       # batch
    kb = cfg.k1 // cfg.s1                    # conv1 kernel size on the s2d grid
    cin1 = cfg.s1 * cfg.s1 * cfg.c           # channels after space-to-depth
    ph, pw = oh1 // 2, ow1 // 2              # conv1 output phase-tile size
    psz = n * ph * pw                        # rows per conv1 output phase
    m2 = n * oh2 * ow2
    k2sz = cfg.k2 * cfg.k2 * cfg.f1
    k3sz = cfg.k3 * cfg.k3 * cfg.f2

    # ---- conv1 + BN + ReLU: im2col into P1 scratch, ONE matmul (K = 4*cin1).
    # P1 rows are ordered (phase_pi, phase_pj, n, i, j); columns are (bi,bj,cin1),
    # so conv1's output comes out phase-major, which makes conv2's stride-2
    # accesses plain unit-stride slices.
    for pi in range(2):
        for pj in range(2):
            r0 = (pi * 2 + pj) * psz
            for bi in range(kb):
                for bj in range(kb):
                    u, su = (pi + bi) % 2, (pi + bi) // 2
                    v, sv = (pj + bj) % 2, (pj + bj) // 2
                    xs = x_ref[u * 2 + v, :, su:su + ph, sv:sv + pw, :]
                    c0 = (bi * kb + bj) * cin1
                    p1_ref[r0:r0 + psz, c0:c0 + cin1] = xs.reshape(psz, cin1)

    sh1 = b_ref[:, offs["sh1"]:offs["sh1"] + cfg.f1]
    a1 = jnp.dot(p1_ref[...], w1_ref[...], preferred_element_type=f32)
    a1 = jnp.maximum(a1 + sh1, 0.0).astype(bf16)          # (4*psz, f1), phase-major

    phases = [[a1[(pi * 2 + pj) * psz:(pi * 2 + pj + 1) * psz, :]
               .reshape(n, ph, pw, cfg.f1)
               for pj in range(2)] for pi in range(2)]

    # ---- conv2 + BN + ReLU: im2col into P2 scratch, ONE matmul (K = k2*k2*f1).
    for ki in range(cfg.k2):
        for kj in range(cfg.k2):
            u, su = ki % 2, ki // 2
            v, sv = kj % 2, kj // 2
            piece = phases[u][v][:, su:su + oh2, sv:sv + ow2, :]
            c0 = (ki * cfg.k2 + kj) * cfg.f1
            p2_ref[:, c0:c0 + cfg.f1] = piece.reshape(m2, cfg.f1)

    sh2 = b_ref[:, offs["sh2"]:offs["sh2"] + cfg.f2]
    a2 = jnp.dot(p2_ref[...], w23_ref[0:k2sz, 0:cfg.f2],
                 preferred_element_type=f32)
    a2 = jnp.maximum(a2 + sh2, 0.0).astype(bf16)          # (n*oh2*ow2, f2)
    a2 = a2.reshape(n, oh2 * ow2, cfg.f2)

    # ---- conv3 + BN + ReLU, K-packed per output position and fused with the
    #      fc contraction (for the default config oh3*ow3 == 1 -> one matmul).
    sh3 = b_ref[:, offs["sh3"]:offs["sh3"] + cfg.f3]
    bfc = b_ref[:, offs["bfc"]:offs["bfc"] + cfg.fc]
    hacc = None
    for y3 in range(oh3):
        for x3 in range(ow3):
            for ki in range(cfg.k3):
                for kj in range(cfg.k3):
                    p = (y3 * cfg.s3 + ki) * ow2 + (x3 * cfg.s3 + kj)
                    q = ki * cfg.k3 + kj
                    p3_ref[:, q * cfg.f2:(q + 1) * cfg.f2] = a2[:, p, :]
            r3 = jnp.dot(p3_ref[...], w23_ref[k2sz:k2sz + k3sz, 0:cfg.f3],
                         preferred_element_type=f32)
            r3 = jnp.maximum(r3 + sh3, 0.0).astype(bf16)              # (n, f3)
            t = jnp.dot(r3, wfc_ref[y3 * ow3 + x3], preferred_element_type=f32)
            hacc = t if hacc is None else hacc + t

    hidden = jnp.maximum(hacc + bfc, 0.0).astype(bf16)                # (n, fc)

    # ---- output layer: lane-dense (padded) store, the only HBM writeback.
    bout = b_ref[:, offs["bout"]:offs["bout"] + o_ref.shape[1]]
    o_ref[...] = jnp.dot(hidden, wout_ref[...], preferred_element_type=f32) + bout


# ----------------------------------------------------------------------------
# One-time parameter packing: BN fold, K-packed weight re-layout, bf16 cast,
# single f32 bias/shift slab, lane-dense padded output weights.
# ----------------------------------------------------------------------------
def pack_params(params, cfg, eps=1e-5):
    bf16 = jnp.bfloat16
    f32 = jnp.float32

    oh1, ow1, oh2, ow2, oh3, ow3 = _derived(cfg)
    offs, bias_len, na_pad = _bias_offsets(cfg)
    kb = cfg.k1 // cfg.s1

    def fold(w, b, g, be, rm, rv):
        scale = g / jnp.sqrt(rv + eps)
        shift = be - rm * scale + b * scale
        return w * scale[:, None, None, None], shift.astype(f32)

    # conv1: (f1, c, k1, k1) -> (kb*kb*s1*s1*c, f1), K order = (bi, bj, ri, rj, ch)
    # matching the in-kernel im2col of the space-to-depth input.
    w1f, sh1 = fold(params["w1"], params["b1"], params["g1"], params["be1"],
                    params["rm1"], params["rv1"])
    t = jnp.transpose(w1f, (2, 3, 1, 0))                       # (k1, k1, c, f1)
    t = t.reshape(kb, cfg.s1, kb, cfg.s1, cfg.c, cfg.f1)
    t = jnp.transpose(t, (0, 2, 1, 3, 4, 5))                   # (bi, bj, ri, rj, c, f1)
    w1p = t.reshape(kb * kb * cfg.s1 * cfg.s1 * cfg.c, cfg.f1)

    # conv2 / conv3: (fo, fi, k, k) -> (k*k*fi, fo); concatenated into one slab.
    w2f, sh2 = fold(params["w2"], params["b2"], params["g2"], params["be2"],
                    params["rm2"], params["rv2"])
    w2p = jnp.transpose(w2f, (2, 3, 1, 0)).reshape(cfg.k2 * cfg.k2 * cfg.f1, cfg.f2)
    w3f, sh3 = fold(params["w3"], params["b3"], params["g3"], params["be3"],
                    params["rm3"], params["rv3"])
    w3p = jnp.transpose(w3f, (2, 3, 1, 0)).reshape(cfg.k3 * cfg.k3 * cfg.f2, cfg.f3)
    wmax = max(cfg.f2, cfg.f3)
    w23p = jnp.concatenate(
        [jnp.pad(w2p, ((0, 0), (0, wmax - cfg.f2))),
         jnp.pad(w3p, ((0, 0), (0, wmax - cfg.f3)))], axis=0)

    # fc: permute columns from PyTorch NCHW flatten order to per-(y,x) blocks.
    wfc = params["fc_w"].reshape(cfg.fc, cfg.f3, oh3, ow3)
    wfcp = jnp.transpose(wfc, (2, 3, 1, 0)).reshape(oh3 * ow3, cfg.f3, cfg.fc)

    # out: (num_actions, fc) -> (fc, na_pad), zero-padded to a lane-dense width.
    woutp = jnp.pad(params["out_w"].T, ((0, 0), (0, na_pad - cfg.num_actions)))

    # single f32 shift/bias slab, each segment at a 128-aligned lane offset.
    bias = jnp.zeros((1, bias_len), f32)
    bias = bias.at[0, offs["sh1"]:offs["sh1"] + cfg.f1].set(sh1)
    bias = bias.at[0, offs["sh2"]:offs["sh2"] + cfg.f2].set(sh2)
    bias = bias.at[0, offs["sh3"]:offs["sh3"] + cfg.f3].set(sh3)
    bias = bias.at[0, offs["bfc"]:offs["bfc"] + cfg.fc].set(
        params["fc_b"].astype(f32))
    bias = bias.at[0, offs["bout"]:offs["bout"] + cfg.num_actions].set(
        params["out_b"].astype(f32))

    return dict(w1p=w1p.astype(bf16), w23p=w23p.astype(bf16),
                wfcp=wfcp.astype(bf16), woutp=woutp.astype(bf16), bias=bias)


# ----------------------------------------------------------------------------
# Forward: one small XLA layout prep (space-to-depth + parity stack of the
# tiny input into a single operand), then one fused gridless pallas_call.
# ----------------------------------------------------------------------------
@functools.partial(jax.jit, static_argnums=(2,))
def dqn_forward(x_nchw, packed, cfg):
    n = x_nchw.shape[0]
    oh1, ow1, oh2, ow2, oh3, ow3 = _derived(cfg)
    _, _, na_pad = _bias_offsets(cfg)

    # Supported configuration (covers the module defaults).
    # TODO(synk): general strides/kernels (s2 != 2, k1 % s1 != 0, odd conv1
    # output, H/W not multiples of s1) need a generic in-kernel gather path.
    assert cfg.k1 % cfg.s1 == 0 and cfg.h % cfg.s1 == 0 and cfg.w % cfg.s1 == 0
    assert cfg.s2 == 2 and oh1 % 2 == 0 and ow1 % 2 == 0

    s1 = cfg.s1
    cin1 = s1 * s1 * cfg.c
    gh, gw = cfg.h // s1, cfg.w // s1
    gph, gpw = (gh + 1) // 2, (gw + 1) // 2

    x = jnp.transpose(x_nchw, (0, 2, 3, 1)).astype(jnp.bfloat16)        # NHWC
    # space-to-depth by the conv1 stride: conv1 becomes a (k1//s1)^2 stride-1 conv.
    x = x.reshape(n, gh, s1, gw, s1, cfg.c)
    x = jnp.transpose(x, (0, 1, 3, 2, 4, 5)).reshape(n, gh, gw, cin1)
    # pad to even grid + stack the 4 (row,col) parities into ONE operand so every
    # in-kernel access is a static, unit-stride slice.
    x = jnp.pad(x, ((0, 0), (0, 2 * gph - gh), (0, 2 * gpw - gw), (0, 0)))
    x = x.reshape(n, gph, 2, gpw, 2, cin1)
    x = jnp.transpose(x, (2, 4, 0, 1, 3, 5)).reshape(4, n, gph, gpw, cin1)

    args = (x, packed["w1p"], packed["w23p"], packed["wfcp"],
            packed["woutp"], packed["bias"])

    flops = 2 * (
        n * oh1 * ow1 * cfg.k1 * cfg.k1 * cfg.c * cfg.f1
        + n * oh2 * ow2 * cfg.k2 * cfg.k2 * cfg.f1 * cfg.f2
        + n * oh3 * ow3 * cfg.k3 * cfg.k3 * cfg.f2 * cfg.f3
        + n * oh3 * ow3 * cfg.f3 * cfg.fc
        + n * cfg.fc * na_pad)
    bytes_accessed = (sum(a.size * a.dtype.itemsize for a in args)
                      + n * na_pad * 4)

    kernel = functools.partial(_dqn_kernel, cfg=cfg)
    out = pl.pallas_call(
        kernel,
        out_shape=jax.ShapeDtypeStruct((n, na_pad), jnp.float32),
        in_specs=[pl.BlockSpec(memory_space=pltpu.MemorySpace.VMEM)] * len(args),
        out_specs=pl.BlockSpec(memory_space=pltpu.MemorySpace.VMEM),
        scratch_shapes=[
            pltpu.VMEM((4 * n * (oh1 // 2) * (ow1 // 2),
                        (cfg.k1 // cfg.s1) ** 2 * cin1), jnp.bfloat16),   # conv1 im2col
            pltpu.VMEM((n * oh2 * ow2, cfg.k2 * cfg.k2 * cfg.f1), jnp.bfloat16),  # conv2
            pltpu.VMEM((n, cfg.k3 * cfg.k3 * cfg.f2), jnp.bfloat16),      # conv3
        ],
        cost_estimate=pl.CostEstimate(flops=flops, transcendentals=0,
                                      bytes_accessed=bytes_accessed),
    )(*args)
    return out[:, :cfg.num_actions]


# ----------------------------------------------------------------------------
# Plain-JAX reference (eval-mode BN), parameter init
# ----------------------------------------------------------------------------
def reference_forward(x, p, eps=1e-5):
    def block(x, w, b, g, be, rm, rv, stride):
        y = jax.lax.conv_general_dilated(
            x, w, window_strides=(stride, stride), padding="VALID",
            dimension_numbers=("NCHW", "OIHW", "NCHW"))
        y = y + b[None, :, None, None]
        scale = (g / jnp.sqrt(rv + eps))[None, :, None, None]
        y = (y - rm[None, :, None, None]) * scale + be[None, :, None, None]
        return jnp.maximum(y, 0.0)

    x = block(x, p["w1"], p["b1"], p["g1"], p["be1"], p["rm1"], p["rv1"], 4)
    x = block(x, p["w2"], p["b2"], p["g2"], p["be2"], p["rm2"], p["rv2"], 2)
    x = block(x, p["w3"], p["b3"], p["g3"], p["be3"], p["rm3"], p["rv3"], 1)
    x = x.reshape(x.shape[0], -1)
    x = jnp.maximum(x @ p["fc_w"].T + p["fc_b"], 0.0)
    return x @ p["out_w"].T + p["out_b"]


def init_params(key, num_actions, state_shape, fc=512,
                k1=8, s1=4, f1=32, k2=4, s2=2, f2=64, k3=3, s3=1, f3=64):
    c, h, w = state_shape
    convw = _conv_out(_conv_out(_conv_out(w, k1, s1), k2, s2), k3, s3)
    convh = _conv_out(_conv_out(_conv_out(h, k1, s1), k2, s2), k3, s3)
    lin_in = convw * convh * f3

    keys = jax.random.split(key, 12)

    def bn(kk, f):
        g = 1.0 + 0.01 * jax.random.normal(kk, (f,), jnp.float32)
        be = 0.01 * jax.random.normal(jax.random.fold_in(kk, 1), (f,), jnp.float32)
        rm = 0.01 * jax.random.normal(jax.random.fold_in(kk, 2), (f,), jnp.float32)
        rv = 1.0 + 0.01 * jnp.abs(
            jax.random.normal(jax.random.fold_in(kk, 3), (f,), jnp.float32))
        return g, be, rm, rv

    g1, be1, rm1, rv1 = bn(keys[3], f1)
    g2, be2, rm2, rv2 = bn(keys[4], f2)
    g3, be3, rm3, rv3 = bn(keys[5], f3)

    return dict(
        w1=0.05 * jax.random.normal(keys[0], (f1, c, k1, k1), jnp.float32),
        b1=0.01 * jax.random.normal(keys[6], (f1,), jnp.float32),
        w2=0.05 * jax.random.normal(keys[1], (f2, f1, k2, k2), jnp.float32),
        b2=0.01 * jax.random.normal(keys[7], (f2,), jnp.float32),
        w3=0.05 * jax.random.normal(keys[2], (f3, f2, k3, k3), jnp.float32),
        b3=0.01 * jax.random.normal(keys[8], (f3,), jnp.float32),
        g1=g1, be1=be1, rm1=rm1, rv1=rv1,
        g2=g2, be2=be2, rm2=rm2, rv2=rv2,
        g3=g3, be3=be3, rm3=rm3, rv3=rv3,
        fc_w=0.05 * jax.random.normal(keys[9], (fc, lin_in), jnp.float32),
        fc_b=0.01 * jax.random.normal(keys[10], (fc,), jnp.float32),
        out_w=0.05 * jax.random.normal(keys[11], (num_actions, fc), jnp.float32),
        out_b=jnp.zeros((num_actions,), jnp.float32),
    )


if __name__ == "__main__":
    num_actions = 6
    # Smallest spatial size compatible with the 8/4, 4/2, 3/1 kernel/stride chain.
    state_shape = (4, 36, 36)
    batch = 2

    cfg = DQNConfig(c=state_shape[0], h=state_shape[1], w=state_shape[2],
                    k1=8, s1=4, f1=32, k2=4, s2=2, f2=64, k3=3, s3=1, f3=64,
                    fc=512, num_actions=num_actions)

    key = jax.random.PRNGKey(0)
    pkey, xkey = jax.random.split(key)
    params = init_params(pkey, num_actions, state_shape, fc=cfg.fc)
    packed = pack_params(params, cfg)

    x = jax.random.normal(xkey, (batch,) + state_shape, jnp.float32)   # NCHW

    out = jax.block_until_ready(dqn_forward(x, packed, cfg))
    ref = jax.block_until_ready(reference_forward(x, params))

    assert out.shape == (batch, num_actions), out.shape
    assert bool(jnp.all(jnp.isfinite(out)))
    err = float(jnp.max(jnp.abs(out - ref)))
    assert err < 0.1, f"max abs diff vs f32 reference: {err}"
    print("KERNEL_OK")
</pallas_src>

<mosaic_0001>
module attributes {stable_mosaic.version = 11 : i64} {
  func.func @_dqn_kernel(%arg0: memref<4x2x5x5x64xbf16, #tpu.memory_space<vmem>>, %arg1: memref<256x32xbf16, #tpu.memory_space<vmem>>, %arg2: memref<1088x64xbf16, #tpu.memory_space<vmem>>, %arg3: memref<1x64x512xbf16, #tpu.memory_space<vmem>>, %arg4: memref<512x128xbf16, #tpu.memory_space<vmem>>, %arg5: memref<1x1024xf32, #tpu.memory_space<vmem>>, %arg6: memref<2x128xf32, #tpu.memory_space<vmem>>, %arg7: memref<128x256xbf16, #tpu.memory_space<vmem>>, %arg8: memref<18x512xbf16, #tpu.memory_space<vmem>>, %arg9: memref<2x576xbf16, #tpu.memory_space<vmem>>) attributes {dimension_semantics = [], scalar_prefetch = 0 : i64, scratch_operands = 3 : i64, tpu.core_type = #tpu.core_type<tc>} {
    %c0 = arith.constant 0 : index
    %c0_0 = arith.constant 0 : index
    %c0_1 = arith.constant 0 : index
    %c0_2 = arith.constant 0 : index
    %c0_3 = arith.constant 0 : index
    %0 = vector.load %arg0[%c0, %c0_0, %c0_1, %c0_2, %c0_3] : memref<4x2x5x5x64xbf16, #tpu.memory_space<vmem>>, vector<1x2x4x4x64xbf16>
    %1 = vector.shape_cast %0 : vector<1x2x4x4x64xbf16> to vector<2x4x4x64xbf16>
    %2 = vector.shape_cast %1 : vector<2x4x4x64xbf16> to vector<32x64xbf16>
    %c0_4 = arith.constant 0 : index
    %c0_5 = arith.constant 0 : index
    %3 = vector.load %arg7[%c0_4, %c0_5] : memref<128x256xbf16, #tpu.memory_space<vmem>>, vector<32x64xbf16>
    tpu.vector_store %arg7[%c0_4, %c0_5], %2 {strides = array<i32>} : memref<128x256xbf16, #tpu.memory_space<vmem>>, vector<32x64xbf16>,
    %c1 = arith.constant 1 : index
    %c0_6 = arith.constant 0 : index
    %c0_7 = arith.constant 0 : index
    %c0_8 = arith.constant 0 : index
    %c0_9 = arith.constant 0 : index
    %4 = vector.load %arg0[%c1, %c0_6, %c0_7, %c0_8, %c0_9] : memref<4x2x5x5x64xbf16, #tpu.memory_space<vmem>>, vector<1x2x4x4x64xbf16>
    %5 = vector.shape_cast %4 : vector<1x2x4x4x64xbf16> to vector<2x4x4x64xbf16>
    %6 = vector.shape_cast %5 : vector<2x4x4x64xbf16> to vector<32x64xbf16>
    %c0_10 = arith.constant 0 : index
    %c64 = arith.constant 64 : index
    %7 = vector.load %arg7[%c0_10, %c64] : memref<128x256xbf16, #tpu.memory_space<vmem>>, vector<32x64xbf16>
    tpu.vector_store %arg7[%c0_10, %c64], %6 {strides = array<i32>} : memref<128x256xbf16, #tpu.memory_space<vmem>>, vector<32x64xbf16>,
    %c2 = arith.constant 2 : index
    %c0_11 = arith.constant 0 : index
    %c0_12 = arith.constant 0 : index
    %c0_13 = arith.constant 0 : index
    %c0_14 = arith.constant 0 : index
    %8 = vector.load %arg0[%c2, %c0_11, %c0_12, %c0_13, %c0_14] : memref<4x2x5x5x64xbf16, #tpu.memory_space<vmem>>, vector<1x2x4x4x64xbf16>
    %9 = vector.shape_cast %8 : vector<1x2x4x4x64xbf16> to vector<2x4x4x64xbf16>
    %10 = vector.shape_cast %9 : vector<2x4x4x64xbf16> to vector<32x64xbf16>
    %c0_15 = arith.constant 0 : index
    %c128 = arith.constant 128 : index
    %11 = vector.load %arg7[%c0_15, %c128] : memref<128x256xbf16, #tpu.memory_space<vmem>>, vector<32x64xbf16>
    tpu.vector_store %arg7[%c0_15, %c128], %10 {strides = array<i32>} : memref<128x256xbf16, #tpu.memory_space<vmem>>, vector<32x64xbf16>,
    %c3 = arith.constant 3 : index
    %c0_16 = arith.constant 0 : index
    %c0_17 = arith.constant 0 : index
    %c0_18 = arith.constant 0 : index
    %c0_19 = arith.constant 0 : index
    %12 = vector.load %arg0[%c3, %c0_16, %c0_17, %c0_18, %c0_19] : memref<4x2x5x5x64xbf16, #tpu.memory_space<vmem>>, vector<1x2x4x4x64xbf16>
    %13 = vector.shape_cast %12 : vector<1x2x4x4x64xbf16> to vector<2x4x4x64xbf16>
    %14 = vector.shape_cast %13 : vector<2x4x4x64xbf16> to vector<32x64xbf16>
    %c0_20 = arith.constant 0 : index
    %c192 = arith.constant 192 : index
    %15 = vector.load %arg7[%c0_20, %c192] : memref<128x256xbf16, #tpu.memory_space<vmem>>, vector<32x64xbf16>
    tpu.vector_store %arg7[%c0_20, %c192], %14 {strides = array<i32>} : memref<128x256xbf16, #tpu.memory_space<vmem>>, vector<32x64xbf16>,
    %c1_21 = arith.constant 1 : index
    %c0_22 = arith.constant 0 : index
    %c0_23 = arith.constant 0 : index
    %c0_24 = arith.constant 0 : index
    %c0_25 = arith.constant 0 : index
    %16 = vector.load %arg0[%c1_21, %c0_22, %c0_23, %c0_24, %c0_25] : memref<4x2x5x5x64xbf16, #tpu.memory_space<vmem>>, vector<1x2x4x4x64xbf16>
    %17 = vector.shape_cast %16 : vector<1x2x4x4x64xbf16> to vector<2x4x4x64xbf16>
    %18 = vector.shape_cast %17 : vector<2x4x4x64xbf16> to vector<32x64xbf16>
    %c32 = arith.constant 32 : index
    %c0_26 = arith.constant 0 : index
    %19 = vector.load %arg7[%c32, %c0_26] : memref<128x256xbf16, #tpu.memory_space<vmem>>, vector<32x64xbf16>
    tpu.vector_store %arg7[%c32, %c0_26], %18 {strides = array<i32>} : memref<128x256xbf16, #tpu.memory_space<vmem>>, vector<32x64xbf16>,
    %c0_27 = arith.constant 0 : index
    %c0_28 = arith.constant 0 : index
    %c0_29 = arith.constant 0 : index
    %c1_30 = arith.constant 1 : index
    %c0_31 = arith.constant 0 : index
    %20 = vector.load %arg0[%c0_27, %c0_28, %c0_29, %c1_30, %c0_31] : memref<4x2x5x5x64xbf16, #tpu.memory_space<vmem>>, vector<1x2x4x4x64xbf16>
    %21 = vector.shape_cast %20 : vector<1x2x4x4x64xbf16> to vector<2x4x4x64xbf16>
    %22 = vector.shape_cast %21 : vector<2x4x4x64xbf16> to vector<32x64xbf16>
    %c32_32 = arith.constant 32 : index
    %c64_33 = arith.constant 64 : index
    %23 = vector.load %arg7[%c32_32, %c64_33] : memref<128x256xbf16, #tpu.memory_space<vmem>>, vector<32x64xbf16>
    tpu.vector_store %arg7[%c32_32, %c64_33], %22 {strides = array<i32>} : memref<128x256xbf16, #tpu.memory_space<vmem>>, vector<32x64xbf16>,
    %c3_34 = arith.constant 3 : index
    %c0_35 = arith.constant 0 : index
    %c0_36 = arith.constant 0 : index
    %c0_37 = arith.constant 0 : index
    %c0_38 = arith.constant 0 : index
    %24 = vector.load %arg0[%c3_34, %c0_35, %c0_36, %c0_37, %c0_38] : memref<4x2x5x5x64xbf16, #tpu.memory_space<vmem>>, vector<1x2x4x4x64xbf16>
    %25 = vector.shape_cast %24 : vector<1x2x4x4x64xbf16> to vector<2x4x4x64xbf16>
    %26 = vector.shape_cast %25 : vector<2x4x4x64xbf16> to vector<32x64xbf16>
    %c32_39 = arith.constant 32 : index
    %c128_40 = arith.constant 128 : index
    %27 = vector.load %arg7[%c32_39, %c128_40] : memref<128x256xbf16, #tpu.memory_space<vmem>>, vector<32x64xbf16>
    tpu.vector_store %arg7[%c32_39, %c128_40], %26 {strides = array<i32>} : memref<128x256xbf16, #tpu.memory_space<vmem>>, vector<32x64xbf16>,
    %c2_41 = arith.constant 2 : index
    %c0_42 = arith.constant 0 : index
    %c0_43 = arith.constant 0 : index
    %c1_44 = arith.constant 1 : index
    %c0_45 = arith.constant 0 : index
    %28 = vector.load %arg0[%c2_41, %c0_42, %c0_43, %c1_44, %c0_45] : memref<4x2x5x5x64xbf16, #tpu.memory_space<vmem>>, vector<1x2x4x4x64xbf16>
    %29 = vector.shape_cast %28 : vector<1x2x4x4x64xbf16> to vector<2x4x4x64xbf16>
    %30 = vector.shape_cast %29 : vector<2x4x4x64xbf16> to vector<32x64xbf16>
    %c32_46 = arith.constant 32 : index
    %c192_47 = arith.constant 192 : index
    %31 = vector.load %arg7[%c32_46, %c192_47] : memref<128x256xbf16, #tpu.memory_space<vmem>>, vector<32x64xbf16>
    tpu.vector_store %arg7[%c32_46, %c192_47], %30 {strides = array<i32>} : memref<128x256xbf16, #tpu.memory_space<vmem>>, vector<32x64xbf16>,
    %c2_48 = arith.constant 2 : index
    %c0_49 = arith.constant 0 : index
    %c0_50 = arith.constant 0 : index
    %c0_51 = arith.constant 0 : index
    %c0_52 = arith.constant 0 : index
    %32 = vector.load %arg0[%c2_48, %c0_49, %c0_50, %c0_51, %c0_52] : memref<4x2x5x5x64xbf16, #tpu.memory_space<vmem>>, vector<1x2x4x4x64xbf16>
    %33 = vector.shape_cast %32 : vector<1x2x4x4x64xbf16> to vector<2x4x4x64xbf16>
    %34 = vector.shape_cast %33 : vector<2x4x4x64xbf16> to vector<32x64xbf16>
    %c64_53 = arith.constant 64 : index
    %c0_54 = arith.constant 0 : index
    %35 = vector.load %arg7[%c64_53, %c0_54] : memref<128x256xbf16, #tpu.memory_space<vmem>>, vector<32x64xbf16>
    tpu.vector_store %arg7[%c64_53, %c0_54], %34 {strides = array<i32>} : memref<128x256xbf16, #tpu.memory_space<vmem>>, vector<32x64xbf16>,
    %c3_55 = arith.constant 3 : index
    %c0_56 = arith.constant 0 : index
    %c0_57 = arith.constant 0 : index
    %c0_58 = arith.constant 0 : index
    %c0_59 = arith.constant 0 : index
    %36 = vector.load %arg0[%c3_55, %c0_56, %c0_57, %c0_58, %c0_59] : memref<4x2x5x5x64xbf16, #tpu.memory_space<vmem>>, vector<1x2x4x4x64xbf16>
    %37 = vector.shape_cast %36 : vector<1x2x4x4x64xbf16> to vector<2x4x4x64xbf16>
    %38 = vector.shape_cast %37 : vector<2x4x4x64xbf16> to vector<32x64xbf16>
    %c64_60 = arith.constant 64 : index
    %c64_61 = arith.constant 64 : index
    %39 = vector.load %arg7[%c64_60, %c64_61] : memref<128x256xbf16, #tpu.memory_space<vmem>>, vector<32x64xbf16>
    tpu.vector_store %arg7[%c64_60, %c64_61], %38 {strides = array<i32>} : memref<128x256xbf16, #tpu.memory_space<vmem>>, vector<32x64xbf16>,
    %c0_62 = arith.constant 0 : index
    %c0_63 = arith.constant 0 : index
    %c1_64 = arith.constant 1 : index
    %c0_65 = arith.constant 0 : index
    %c0_66 = arith.constant 0 : index
    %40 = vector.load %arg0[%c0_62, %c0_63, %c1_64, %c0_65, %c0_66] : memref<4x2x5x5x64xbf16, #tpu.memory_space<vmem>>, vector<1x2x4x4x64xbf16>
    %41 = vector.shape_cast %40 : vector<1x2x4x4x64xbf16> to vector<2x4x4x64xbf16>
    %42 = vector.shape_cast %41 : vector<2x4x4x64xbf16> to vector<32x64xbf16>
    %c64_67 = arith.constant 64 : index
    %c128_68 = arith.constant 128 : index
    %43 = vector.load %arg7[%c64_67, %c128_68] : memref<128x256xbf16, #tpu.memory_space<vmem>>, vector<32x64xbf16>
    tpu.vector_store %arg7[%c64_67, %c128_68], %42 {strides = array<i32>} : memref<128x256xbf16, #tpu.memory_space<vmem>>, vector<32x64xbf16>,
    %c1_69 = arith.constant 1 : index
    %c0_70 = arith.constant 0 : index
    %c1_71 = arith.constant 1 : index
    %c0_72 = arith.constant 0 : index
    %c0_73 = arith.constant 0 : index
    %44 = vector.load %arg0[%c1_69, %c0_70, %c1_71, %c0_72, %c0_73] : memref<4x2x5x5x64xbf16, #tpu.memory_space<vmem>>, vector<1x2x4x4x64xbf16>
    %45 = vector.shape_cast %44 : vector<1x2x4x4x64xbf16> to vector<2x4x4x64xbf16>
    %46 = vector.shape_cast %45 : vector<2x4x4x64xbf16> to vector<32x64xbf16>
    %c64_74 = arith.constant 64 : index
    %c192_75 = arith.constant 192 : index
    %47 = vector.load %arg7[%c64_74, %c192_75] : memref<128x256xbf16, #tpu.memory_space<vmem>>, vector<32x64xbf16>
    tpu.vector_store %arg7[%c64_74, %c192_75], %46 {strides = array<i32>} : memref<128x256xbf16, #tpu.memory_space<vmem>>, vector<32x64xbf16>,
    %c3_76 = arith.constant 3 : index
    %c0_77 = arith.constant 0 : index
    %c0_78 = arith.constant 0 : index
    %c0_79 = arith.constant 0 : index
    %c0_80 = arith.constant 0 : index
    %48 = vector.load %arg0[%c3_76, %c0_77, %c0_78, %c0_79, %c0_80] : memref<4x2x5x5x64xbf16, #tpu.memory_space<vmem>>, vector<1x2x4x4x64xbf16>
    %49 = vector.shape_cast %48 : vector<1x2x4x4x64xbf16> to vector<2x4x4x64xbf16>
    %50 = vector.shape_cast %49 : vector<2x4x4x64xbf16> to vector<32x64xbf16>
    %c96 = arith.constant 96 : index
    %c0_81 = arith.constant 0 : index
    %51 = vector.load %arg7[%c96, %c0_81] : memref<128x256xbf16, #tpu.memory_space<vmem>>, vector<32x64xbf16>
    tpu.vector_store %arg7[%c96, %c0_81], %50 {strides = array<i32>} : memref<128x256xbf16, #tpu.memory_space<vmem>>, vector<32x64xbf16>,
    %c2_82 = arith.constant 2 : index
    %c0_83 = arith.constant 0 : index
    %c0_84 = arith.constant 0 : index
    %c1_85 = arith.constant 1 : index
    %c0_86 = arith.constant 0 : index
    %52 = vector.load %arg0[%c2_82, %c0_83, %c0_84, %c1_85, %c0_86] : memref<4x2x5x5x64xbf16, #tpu.memory_space<vmem>>, vector<1x2x4x4x64xbf16>
    %53 = vector.shape_cast %52 : vector<1x2x4x4x64xbf16> to vector<2x4x4x64xbf16>
    %54 = vector.shape_cast %53 : vector<2x4x4x64xbf16> to vector<32x64xbf16>
    %c96_87 = arith.constant 96 : index
    %c64_88 = arith.constant 64 : index
    %55 = vector.load %arg7[%c96_87, %c64_88] : memref<128x256xbf16, #tpu.memory_space<vmem>>, vector<32x64xbf16>
    tpu.vector_store %arg7[%c96_87, %c64_88], %54 {strides = array<i32>} : memref<128x256xbf16, #tpu.memory_space<vmem>>, vector<32x64xbf16>,
    %c1_89 = arith.constant 1 : index
    %c0_90 = arith.constant 0 : index
    %c1_91 = arith.constant 1 : index
    %c0_92 = arith.constant 0 : index
    %c0_93 = arith.constant 0 : index
    %56 = vector.load %arg0[%c1_89, %c0_90, %c1_91, %c0_92, %c0_93] : memref<4x2x5x5x64xbf16, #tpu.memory_space<vmem>>, vector<1x2x4x4x64xbf16>
    %57 = vector.shape_cast %56 : vector<1x2x4x4x64xbf16> to vector<2x4x4x64xbf16>
    %58 = vector.shape_cast %57 : vector<2x4x4x64xbf16> to vector<32x64xbf16>
    %c96_94 = arith.constant 96 : index
    %c128_95 = arith.constant 128 : index
    %59 = vector.load %arg7[%c96_94, %c128_95] : memref<128x256xbf16, #tpu.memory_space<vmem>>, vector<32x64xbf16>
    tpu.vector_store %arg7[%c96_94, %c128_95], %58 {strides = array<i32>} : memref<128x256xbf16, #tpu.memory_space<vmem>>, vector<32x64xbf16>,
    %c0_96 = arith.constant 0 : index
    %c0_97 = arith.constant 0 : index
    %c1_98 = arith.constant 1 : index
    %c1_99 = arith.constant 1 : index
    %c0_100 = arith.constant 0 : index
    %60 = vector.load %arg0[%c0_96, %c0_97, %c1_98, %c1_99, %c0_100] : memref<4x2x5x5x64xbf16, #tpu.memory_space<vmem>>, vector<1x2x4x4x64xbf16>
    %61 = vector.shape_cast %60 : vector<1x2x4x4x64xbf16> to vector<2x4x4x64xbf16>
    %62 = vector.shape_cast %61 : vector<2x4x4x64xbf16> to vector<32x64xbf16>
    %c96_101 = arith.constant 96 : index
    %c192_102 = arith.constant 192 : index
    %63 = vector.load %arg7[%c96_101, %c192_102] : memref<128x256xbf16, #tpu.memory_space<vmem>>, vector<32x64xbf16>
    tpu.vector_store %arg7[%c96_101, %c192_102], %62 {strides = array<i32>} : memref<128x256xbf16, #tpu.memory_space<vmem>>, vector<32x64xbf16>,
    %c0_103 = arith.constant 0 : index
    %c0_104 = arith.constant 0 : index
    %64 = vector.load %arg5[%c0_103, %c0_104] : memref<1x1024xf32, #tpu.memory_space<vmem>>, vector<1x32xf32>
    %c0_105 = arith.constant 0 : index
    %c0_106 = arith.constant 0 : index
    %65 = vector.load %arg7[%c0_105, %c0_106] : memref<128x256xbf16, #tpu.memory_space<vmem>>, vector<128x256xbf16>
    %c0_107 = arith.constant 0 : index
    %c0_108 = arith.constant 0 : index
    %66 = vector.load %arg1[%c0_107, %c0_108] : memref<256x32xbf16, #tpu.memory_space<vmem>>, vector<256x32xbf16>
    %cst = arith.constant dense<0.000000e+00> : vector<128x32xf32>
    %67 = tpu.matmul %65, %66, %cst {dimension_numbers = #tpu.dot_dimension_numbers<[1], [0], [0], [1], [0, 0, 1, 1], [], []>} : vector<128x256xbf16>, vector<256x32xbf16>, vector<128x32xf32> -> vector<128x32xf32>
    %68 = vector.broadcast %64 : vector<1x32xf32> to vector<128x32xf32>
    %69 = arith.addf %67, %68 : vector<128x32xf32>
    %cst_109 = arith.constant 0.000000e+00 : f32
    %70 = vector.broadcast %cst_109 : f32 to vector<128x32xf32>
    %71 = arith.maximumf %69, %70 : vector<128x32xf32>
    %72 = arith.truncf %71 : vector<128x32xf32> to vector<128x32xbf16>
    %73 = vector.extract_strided_slice %72 {offsets = [0, 0], sizes = [32, 32], strides = [1, 1]} : vector<128x32xbf16> to vector<32x32xbf16>
    %74 = vector.shape_cast %73 : vector<32x32xbf16> to vector<2x4x4x32xbf16>
    %75 = vector.extract_strided_slice %72 {offsets = [32, 0], sizes = [32, 32], strides = [1, 1]} : vector<128x32xbf16> to vector<32x32xbf16>
    %76 = vector.shape_cast %75 : vector<32x32xbf16> to vector<2x4x4x32xbf16>
    %77 = vector.extract_strided_slice %72 {offsets = [64, 0], sizes = [32, 32], strides = [1, 1]} : vector<128x32xbf16> to vector<32x32xbf16>
    %78 = vector.shape_cast %77 : vector<32x32xbf16> to vector<2x4x4x32xbf16>
    %79 = vector.extract_strided_slice %72 {offsets = [96, 0], sizes = [32, 32], strides = [1, 1]} : vector<128x32xbf16> to vector<32x32xbf16>
    %80 = vector.shape_cast %79 : vector<32x32xbf16> to vector<2x4x4x32xbf16>
    %81 = vector.extract_strided_slice %74 {offsets = [0, 0, 0, 0], sizes = [2, 3, 3, 32], strides = [1, 1, 1, 1]} : vector<2x4x4x32xbf16> to vector<2x3x3x32xbf16>
    %82 = vector.shape_cast %81 : vector<2x3x3x32xbf16> to vector<18x32xbf16>
    %c0_110 = arith.constant 0 : index
    %c0_111 = arith.constant 0 : index
    %83 = vector.load %arg8[%c0_110, %c0_111] : memref<18x512xbf16, #tpu.memory_space<vmem>>, vector<18x32xbf16>
    tpu.vector_store %arg8[%c0_110, %c0_111], %82 {strides = array<i32>} : memref<18x512xbf16, #tpu.memory_space<vmem>>, vector<18x32xbf16>,
    %84 = vector.extract_strided_slice %76 {offsets = [0, 0, 0, 0], sizes = [2, 3, 3, 32], strides = [1, 1, 1, 1]} : vector<2x4x4x32xbf16> to vector<2x3x3x32xbf16>
    %85 = vector.shape_cast %84 : vector<2x3x3x32xbf16> to vector<18x32xbf16>
    %c0_112 = arith.constant 0 : index
    %c32_113 = arith.constant 32 : index
    %86 = vector.load %arg8[%c0_112, %c32_113] : memref<18x512xbf16, #tpu.memory_space<vmem>>, vector<18x32xbf16>
    tpu.vector_store %arg8[%c0_112, %c32_113], %85 {strides = array<i32>} : memref<18x512xbf16, #tpu.memory_space<vmem>>, vector<18x32xbf16>,
    %87 = vector.extract_strided_slice %74 {offsets = [0, 0, 1, 0], sizes = [2, 3, 3, 32], strides = [1, 1, 1, 1]} : vector<2x4x4x32xbf16> to vector<2x3x3x32xbf16>
    %88 = vector.shape_cast %87 : vector<2x3x3x32xbf16> to vector<18x32xbf16>
    %c0_114 = arith.constant 0 : index
    %c64_115 = arith.constant 64 : index
    %89 = vector.load %arg8[%c0_114, %c64_115] : memref<18x512xbf16, #tpu.memory_space<vmem>>, vector<18x32xbf16>
    tpu.vector_store %arg8[%c0_114, %c64_115], %88 {strides = array<i32>} : memref<18x512xbf16, #tpu.memory_space<vmem>>, vector<18x32xbf16>,
    %90 = vector.extract_strided_slice %76 {offsets = [0, 0, 1, 0], sizes = [2, 3, 3, 32], strides = [1, 1, 1, 1]} : vector<2x4x4x32xbf16> to vector<2x3x3x32xbf16>
    %91 = vector.shape_cast %90 : vector<2x3x3x32xbf16> to vector<18x32xbf16>
    %c0_116 = arith.constant 0 : index
    %c96_117 = arith.constant 96 : index
    %92 = vector.load %arg8[%c0_116, %c96_117] : memref<18x512xbf16, #tpu.memory_space<vmem>>, vector<18x32xbf16>
    tpu.vector_store %arg8[%c0_116, %c96_117], %91 {strides = array<i32>} : memref<18x512xbf16, #tpu.memory_space<vmem>>, vector<18x32xbf16>,
    %93 = vector.extract_strided_slice %78 {offsets = [0, 0, 0, 0], sizes = [2, 3, 3, 32], strides = [1, 1, 1, 1]} : vector<2x4x4x32xbf16> to vector<2x3x3x32xbf16>
    %94 = vector.shape_cast %93 : vector<2x3x3x32xbf16> to vector<18x32xbf16>
    %c0_118 = arith.constant 0 : index
    %c128_119 = arith.constant 128 : index
    %95 = vector.load %arg8[%c0_118, %c128_119] : memref<18x512xbf16, #tpu.memory_space<vmem>>, vector<18x32xbf16>
    tpu.vector_store %arg8[%c0_118, %c128_119], %94 {strides = array<i32>} : memref<18x512xbf16, #tpu.memory_space<vmem>>, vector<18x32xbf16>,
    %96 = vector.extract_strided_slice %80 {offsets = [0, 0, 0, 0], sizes = [2, 3, 3, 32], strides = [1, 1, 1, 1]} : vector<2x4x4x32xbf16> to vector<2x3x3x32xbf16>
    %97 = vector.shape_cast %96 : vector<2x3x3x32xbf16> to vector<18x32xbf16>
    %c0_120 = arith.constant 0 : index
    %c160 = arith.constant 160 : index
    %98 = vector.load %arg8[%c0_120, %c160] : memref<18x512xbf16, #tpu.memory_space<vmem>>, vector<18x32xbf16>
    tpu.vector_store %arg8[%c0_120, %c160], %97 {strides = array<i32>} : memref<18x512xbf16, #tpu.memory_space<vmem>>, vector<18x32xbf16>,
    %99 = vector.extract_strided_slice %78 {offsets = [0, 0, 1, 0], sizes = [2, 3, 3, 32], strides = [1, 1, 1, 1]} : vector<2x4x4x32xbf16> to vector<2x3x3x32xbf16>
    %100 = vector.shape_cast %99 : vector<2x3x3x32xbf16> to vector<18x32xbf16>
    %c0_121 = arith.constant 0 : index
    %c192_122 = arith.constant 192 : index
    %101 = vector.load %arg8[%c0_121, %c192_122] : memref<18x512xbf16, #tpu.memory_space<vmem>>, vector<18x32xbf16>
    tpu.vector_store %arg8[%c0_121, %c192_122], %100 {strides = array<i32>} : memref<18x512xbf16, #tpu.memory_space<vmem>>, vector<18x32xbf16>,
    %102 = vector.extract_strided_slice %80 {offsets = [0, 0, 1, 0], sizes = [2, 3, 3, 32], strides = [1, 1, 1, 1]} : vector<2x4x4x32xbf16> to vector<2x3x3x32xbf16>
    %103 = vector.shape_cast %102 : vector<2x3x3x32xbf16> to vector<18x32xbf16>
    %c0_123 = arith.constant 0 : index
    %c224 = arith.constant 224 : index
    %104 = vector.load %arg8[%c0_123, %c224] : memref<18x512xbf16, #tpu.memory_space<vmem>>, vector<18x32xbf16>
    tpu.vector_store %arg8[%c0_123, %c224], %103 {strides = array<i32>} : memref<18x512xbf16, #tpu.memory_space<vmem>>, vector<18x32xbf16>,
    %105 = vector.extract_strided_slice %74 {offsets = [0, 1, 0, 0], sizes = [2, 3, 3, 32], strides = [1, 1, 1, 1]} : vector<2x4x4x32xbf16> to vector<2x3x3x32xbf16>
    %106 = vector.shape_cast %105 : vector<2x3x3x32xbf16> to vector<18x32xbf16>
    %c0_124 = arith.constant 0 : index
    %c256 = arith.constant 256 : index
    %107 = vector.load %arg8[%c0_124, %c256] : memref<18x512xbf16, #tpu.memory_space<vmem>>, vector<18x32xbf16>
    tpu.vector_store %arg8[%c0_124, %c256], %106 {strides = array<i32>} : memref<18x512xbf16, #tpu.memory_space<vmem>>, vector<18x32xbf16>,
    %108 = vector.extract_strided_slice %76 {offsets = [0, 1, 0, 0], sizes = [2, 3, 3, 32], strides = [1, 1, 1, 1]} : vector<2x4x4x32xbf16> to vector<2x3x3x32xbf16>
    %109 = vector.shape_cast %108 : vector<2x3x3x32xbf16> to vector<18x32xbf16>
    %c0_125 = arith.constant 0 : index
    %c288 = arith.constant 288 : index
    %110 = vector.load %arg8[%c0_125, %c288] : memref<18x512xbf16, #tpu.memory_space<vmem>>, vector<18x32xbf16>
    tpu.vector_store %arg8[%c0_125, %c288], %109 {strides = array<i32>} : memref<18x512xbf16, #tpu.memory_space<vmem>>, vector<18x32xbf16>,
    %111 = vector.extract_strided_slice %74 {offsets = [0, 1, 1, 0], sizes = [2, 3, 3, 32], strides = [1, 1, 1, 1]} : vector<2x4x4x32xbf16> to vector<2x3x3x32xbf16>
    %112 = vector.shape_cast %111 : vector<2x3x3x32xbf16> to vector<18x32xbf16>
    %c0_126 = arith.constant 0 : index
    %c320 = arith.constant 320 : index
    %113 = vector.load %arg8[%c0_126, %c320] : memref<18x512xbf16, #tpu.memory_space<vmem>>, vector<18x32xbf16>
    tpu.vector_store %arg8[%c0_126, %c320], %112 {strides = array<i32>} : memref<18x512xbf16, #tpu.memory_space<vmem>>, vector<18x32xbf16>,
    %114 = vector.extract_strided_slice %76 {offsets = [0, 1, 1, 0], sizes = [2, 3, 3, 32], strides = [1, 1, 1, 1]} : vector<2x4x4x32xbf16> to vector<2x3x3x32xbf16>
    %115 = vector.shape_cast %114 : vector<2x3x3x32xbf16> to vector<18x32xbf16>
    %c0_127 = arith.constant 0 : index
    %c352 = arith.constant 352 : index
    %116 = vector.load %arg8[%c0_127, %c352] : memref<18x512xbf16, #tpu.memory_space<vmem>>, vector<18x32xbf16>
    tpu.vector_store %arg8[%c0_127, %c352], %115 {strides = array<i32>} : memref<18x512xbf16, #tpu.memory_space<vmem>>, vector<18x32xbf16>,
    %117 = vector.extract_strided_slice %78 {offsets = [0, 1, 0, 0], sizes = [2, 3, 3, 32], strides = [1, 1, 1, 1]} : vector<2x4x4x32xbf16> to vector<2x3x3x32xbf16>
    %118 = vector.shape_cast %117 : vector<2x3x3x32xbf16> to vector<18x32xbf16>
    %c0_128 = arith.constant 0 : index
    %c384 = arith.constant 384 : index
    %119 = vector.load %arg8[%c0_128, %c384] : memref<18x512xbf16, #tpu.memory_space<vmem>>, vector<18x32xbf16>
    tpu.vector_store %arg8[%c0_128, %c384], %118 {strides = array<i32>} : memref<18x512xbf16, #tpu.memory_space<vmem>>, vector<18x32xbf16>,
    %120 = vector.extract_strided_slice %80 {offsets = [0, 1, 0, 0], sizes = [2, 3, 3, 32], strides = [1, 1, 1, 1]} : vector<2x4x4x32xbf16> to vector<2x3x3x32xbf16>
    %121 = vector.shape_cast %120 : vector<2x3x3x32xbf16> to vector<18x32xbf16>
    %c0_129 = arith.constant 0 : index
    %c416 = arith.constant 416 : index
    %122 = vector.load %arg8[%c0_129, %c416] : memref<18x512xbf16, #tpu.memory_space<vmem>>, vector<18x32xbf16>
    tpu.vector_store %arg8[%c0_129, %c416], %121 {strides = array<i32>} : memref<18x512xbf16, #tpu.memory_space<vmem>>, vector<18x32xbf16>,
    %123 = vector.extract_strided_slice %78 {offsets = [0, 1, 1, 0], sizes = [2, 3, 3, 32], strides = [1, 1, 1, 1]} : vector<2x4x4x32xbf16> to vector<2x3x3x32xbf16>
    %124 = vector.shape_cast %123 : vector<2x3x3x32xbf16> to vector<18x32xbf16>
    %c0_130 = arith.constant 0 : index
    %c448 = arith.constant 448 : index
    %125 = vector.load %arg8[%c0_130, %c448] : memref<18x512xbf16, #tpu.memory_space<vmem>>, vector<18x32xbf16>
    tpu.vector_store %arg8[%c0_130, %c448], %124 {strides = array<i32>} : memref<18x512xbf16, #tpu.memory_space<vmem>>, vector<18x32xbf16>,
    %126 = vector.extract_strided_slice %80 {offsets = [0, 1, 1, 0], sizes = [2, 3, 3, 32], strides = [1, 1, 1, 1]} : vector<2x4x4x32xbf16> to vector<2x3x3x32xbf16>
    %127 = vector.shape_cast %126 : vector<2x3x3x32xbf16> to vector<18x32xbf16>
    %c0_131 = arith.constant 0 : index
    %c480 = arith.constant 480 : index
    %128 = vector.load %arg8[%c0_131, %c480] : memref<18x512xbf16, #tpu.memory_space<vmem>>, vector<18x32xbf16>
    tpu.vector_store %arg8[%c0_131, %c480], %127 {strides = array<i32>} : memref<18x512xbf16, #tpu.memory_space<vmem>>, vector<18x32xbf16>,
    %c0_132 = arith.constant 0 : index
    %c128_133 = arith.constant 128 : index
    %129 = vector.load %arg5[%c0_132, %c128_133] : memref<1x1024xf32, #tpu.memory_space<vmem>>, vector<1x64xf32>
    %c0_134 = arith.constant 0 : index
    %c0_135 = arith.constant 0 : index
    %130 = vector.load %arg8[%c0_134, %c0_135] : memref<18x512xbf16, #tpu.memory_space<vmem>>, vector<18x512xbf16>
    %c0_136 = arith.constant 0 : index
    %c0_137 = arith.constant 0 : index
    %131 = vector.load %arg2[%c0_136, %c0_137] : memref<1088x64xbf16, #tpu.memory_space<vmem>>, vector<512x64xbf16>
    %cst_138 = arith.constant dense<0.000000e+00> : vector<18x64xf32>
    %132 = tpu.matmul %130, %131, %cst_138 {dimension_numbers = #tpu.dot_dimension_numbers<[1], [0], [0], [1], [0, 0, 1, 1], [], []>} : vector<18x512xbf16>, vector<512x64xbf16>, vector<18x64xf32> -> vector<18x64xf32>
    %133 = vector.broadcast %129 : vector<1x64xf32> to vector<18x64xf32>
    %134 = arith.addf %132, %133 : vector<18x64xf32>
    %cst_139 = arith.constant 0.000000e+00 : f32
    %135 = vector.broadcast %cst_139 : f32 to vector<18x64xf32>
    %136 = arith.maximumf %134, %135 : vector<18x64xf32>
    %137 = arith.truncf %136 : vector<18x64xf32> to vector<18x64xbf16>
    %138 = vector.shape_cast %137 : vector<18x64xbf16> to vector<2x9x64xbf16>
    %c0_140 = arith.constant 0 : index
    %c256_141 = arith.constant 256 : index
    %139 = vector.load %arg5[%c0_140, %c256_141] : memref<1x1024xf32, #tpu.memory_space<vmem>>, vector<1x64xf32>
    %c0_142 = arith.constant 0 : index
    %c384_143 = arith.constant 384 : index
    %140 = vector.load %arg5[%c0_142, %c384_143] : memref<1x1024xf32, #tpu.memory_space<vmem>>, vector<1x512xf32>
    %141 = vector.extract_strided_slice %138 {offsets = [0, 0, 0], sizes = [2, 1, 64], strides = [1, 1, 1]} : vector<2x9x64xbf16> to vector<2x1x64xbf16>
    %142 = vector.shape_cast %141 : vector<2x1x64xbf16> to vector<2x64xbf16>
    %c0_144 = arith.constant 0 : index
    %c0_145 = arith.constant 0 : index
    %143 = vector.load %arg9[%c0_144, %c0_145] : memref<2x576xbf16, #tpu.memory_space<vmem>>, vector<2x64xbf16>
    tpu.vector_store %arg9[%c0_144, %c0_145], %142 {strides = array<i32>} : memref<2x576xbf16, #tpu.memory_space<vmem>>, vector<2x64xbf16>,
    %144 = vector.extract_strided_slice %138 {offsets = [0, 1, 0], sizes = [2, 1, 64], strides = [1, 1, 1]} : vector<2x9x64xbf16> to vector<2x1x64xbf16>
    %145 = vector.shape_cast %144 : vector<2x1x64xbf16> to vector<2x64xbf16>
    %c0_146 = arith.constant 0 : index
    %c64_147 = arith.constant 64 : index
    %146 = vector.load %arg9[%c0_146, %c64_147] : memref<2x576xbf16, #tpu.memory_space<vmem>>, vector<2x64xbf16>
    tpu.vector_store %arg9[%c0_146, %c64_147], %145 {strides = array<i32>} : memref<2x576xbf16, #tpu.memory_space<vmem>>, vector<2x64xbf16>,
    %147 = vector.extract_strided_slice %138 {offsets = [0, 2, 0], sizes = [2, 1, 64], strides = [1, 1, 1]} : vector<2x9x64xbf16> to vector<2x1x64xbf16>
    %148 = vector.shape_cast %147 : vector<2x1x64xbf16> to vector<2x64xbf16>
    %c0_148 = arith.constant 0 : index
    %c128_149 = arith.constant 128 : index
    %149 = vector.load %arg9[%c0_148, %c128_149] : memref<2x576xbf16, #tpu.memory_space<vmem>>, vector<2x64xbf16>
    tpu.vector_store %arg9[%c0_148, %c128_149], %148 {strides = array<i32>} : memref<2x576xbf16, #tpu.memory_space<vmem>>, vector<2x64xbf16>,
    %150 = vector.extract_strided_slice %138 {offsets = [0, 3, 0], sizes = [2, 1, 64], strides = [1, 1, 1]} : vector<2x9x64xbf16> to vector<2x1x64xbf16>
    %151 = vector.shape_cast %150 : vector<2x1x64xbf16> to vector<2x64xbf16>
    %c0_150 = arith.constant 0 : index
    %c192_151 = arith.constant 192 : index
    %152 = vector.load %arg9[%c0_150, %c192_151] : memref<2x576xbf16, #tpu.memory_space<vmem>>, vector<2x64xbf16>
    tpu.vector_store %arg9[%c0_150, %c192_151], %151 {strides = array<i32>} : memref<2x576xbf16, #tpu.memory_space<vmem>>, vector<2x64xbf16>,
    %153 = vector.extract_strided_slice %138 {offsets = [0, 4, 0], sizes = [2, 1, 64], strides = [1, 1, 1]} : vector<2x9x64xbf16> to vector<2x1x64xbf16>
    %154 = vector.shape_cast %153 : vector<2x1x64xbf16> to vector<2x64xbf16>
    %c0_152 = arith.constant 0 : index
    %c256_153 = arith.constant 256 : index
    %155 = vector.load %arg9[%c0_152, %c256_153] : memref<2x576xbf16, #tpu.memory_space<vmem>>, vector<2x64xbf16>
    tpu.vector_store %arg9[%c0_152, %c256_153], %154 {strides = array<i32>} : memref<2x576xbf16, #tpu.memory_space<vmem>>, vector<2x64xbf16>,
    %156 = vector.extract_strided_slice %138 {offsets = [0, 5, 0], sizes = [2, 1, 64], strides = [1, 1, 1]} : vector<2x9x64xbf16> to vector<2x1x64xbf16>
    %157 = vector.shape_cast %156 : vector<2x1x64xbf16> to vector<2x64xbf16>
    %c0_154 = arith.constant 0 : index
    %c320_155 = arith.constant 320 : index
    %158 = vector.load %arg9[%c0_154, %c320_155] : memref<2x576xbf16, #tpu.memory_space<vmem>>, vector<2x64xbf16>
    tpu.vector_store %arg9[%c0_154, %c320_155], %157 {strides = array<i32>} : memref<2x576xbf16, #tpu.memory_space<vmem>>, vector<2x64xbf16>,
    %159 = vector.extract_strided_slice %138 {offsets = [0, 6, 0], sizes = [2, 1, 64], strides = [1, 1, 1]} : vector<2x9x64xbf16> to vector<2x1x64xbf16>
    %160 = vector.shape_cast %159 : vector<2x1x64xbf16> to vector<2x64xbf16>
    %c0_156 = arith.constant 0 : index
    %c384_157 = arith.constant 384 : index
    %161 = vector.load %arg9[%c0_156, %c384_157] : memref<2x576xbf16, #tpu.memory_space<vmem>>, vector<2x64xbf16>
    tpu.vector_store %arg9[%c0_156, %c384_157], %160 {strides = array<i32>} : memref<2x576xbf16, #tpu.memory_space<vmem>>, vector<2x64xbf16>,
    %162 = vector.extract_strided_slice %138 {offsets = [0, 7, 0], sizes = [2, 1, 64], strides = [1, 1, 1]} : vector<2x9x64xbf16> to vector<2x1x64xbf16>
    %163 = vector.shape_cast %162 : vector<2x1x64xbf16> to vector<2x64xbf16>
    %c0_158 = arith.constant 0 : index
    %c448_159 = arith.constant 448 : index
    %164 = vector.load %arg9[%c0_158, %c448_159] : memref<2x576xbf16, #tpu.memory_space<vmem>>, vector<2x64xbf16>
    tpu.vector_store %arg9[%c0_158, %c448_159], %163 {strides = array<i32>} : memref<2x576xbf16, #tpu.memory_space<vmem>>, vector<2x64xbf16>,
    %165 = vector.extract_strided_slice %138 {offsets = [0, 8, 0], sizes = [2, 1, 64], strides = [1, 1, 1]} : vector<2x9x64xbf16> to vector<2x1x64xbf16>
    %166 = vector.shape_cast %165 : vector<2x1x64xbf16> to vector<2x64xbf16>
    %c0_160 = arith.constant 0 : index
    %c512 = arith.constant 512 : index
    %167 = vector.load %arg9[%c0_160, %c512] : memref<2x576xbf16, #tpu.memory_space<vmem>>, vector<2x64xbf16>
    tpu.vector_store %arg9[%c0_160, %c512], %166 {strides = array<i32>} : memref<2x576xbf16, #tpu.memory_space<vmem>>, vector<2x64xbf16>,
    %c0_161 = arith.constant 0 : index
    %c0_162 = arith.constant 0 : index
    %168 = vector.load %arg9[%c0_161, %c0_162] : memref<2x576xbf16, #tpu.memory_space<vmem>>, vector<2x576xbf16>
    %c512_163 = arith.constant 512 : index
    %c0_164 = arith.constant 0 : index
    %169 = vector.load %arg2[%c512_163, %c0_164] : memref<1088x64xbf16, #tpu.memory_space<vmem>>, vector<576x64xbf16>
    %cst_165 = arith.constant dense<0.000000e+00> : vector<2x64xf32>
    %170 = tpu.matmul %168, %169, %cst_165 {dimension_numbers = #tpu.dot_dimension_numbers<[1], [0], [0], [1], [0, 0, 1, 1], [], []>} : vector<2x576xbf16>, vector<576x64xbf16>, vector<2x64xf32> -> vector<2x64xf32>
    %171 = vector.broadcast %139 : vector<1x64xf32> to vector<2x64xf32>
    %172 = arith.addf %170, %171 : vector<2x64xf32>
    %cst_166 = arith.constant 0.000000e+00 : f32
    %173 = vector.broadcast %cst_166 : f32 to vector<2x64xf32>
    %174 = arith.maximumf %172, %173 : vector<2x64xf32>
    %175 = arith.truncf %174 : vector<2x64xf32> to vector<2x64xbf16>
    %c0_167 = arith.constant 0 : index
    %c0_168 = arith.constant 0 : index
    %c0_169 = arith.constant 0 : index
    %176 = vector.load %arg3[%c0_167, %c0_168, %c0_169] : memref<1x64x512xbf16, #tpu.memory_space<vmem>>, vector<1x64x512xbf16>
    %177 = vector.shape_cast %176 : vector<1x64x512xbf16> to vector<64x512xbf16>
    %cst_170 = arith.constant dense<0.000000e+00> : vector<2x512xf32>
    %178 = tpu.matmul %175, %177, %cst_170 {dimension_numbers = #tpu.dot_dimension_numbers<[1], [0], [0], [1], [0, 0, 1, 1], [], []>} : vector<2x64xbf16>, vector<64x512xbf16>, vector<2x512xf32> -> vector<2x512xf32>
    %179 = vector.broadcast %140 : vector<1x512xf32> to vector<2x512xf32>
    %180 = arith.addf %178, %179 : vector<2x512xf32>
    %cst_171 = arith.constant 0.000000e+00 : f32
    %181 = vector.broadcast %cst_171 : f32 to vector<2x512xf32>
    %182 = arith.maximumf %180, %181 : vector<2x512xf32>
    %183 = arith.truncf %182 : vector<2x512xf32> to vector<2x512xbf16>
    %c0_172 = arith.constant 0 : index
    %c896 = arith.constant 896 : index
    %184 = vector.load %arg5[%c0_172, %c896] : memref<1x1024xf32, #tpu.memory_space<vmem>>, vector<1x128xf32>
    %c0_173 = arith.constant 0 : index
    %c0_174 = arith.constant 0 : index
    %185 = vector.load %arg4[%c0_173, %c0_174] : memref<512x128xbf16, #tpu.memory_space<vmem>>, vector<512x128xbf16>
    %cst_175 = arith.constant dense<0.000000e+00> : vector<2x128xf32>
    %186 = tpu.matmul %183, %185, %cst_175 {dimension_numbers = #tpu.dot_dimension_numbers<[1], [0], [0], [1], [0, 0, 1, 1], [], []>} : vector<2x512xbf16>, vector<512x128xbf16>, vector<2x128xf32> -> vector<2x128xf32>
    %187 = vector.broadcast %184 : vector<1x128xf32> to vector<2x128xf32>
    %188 = arith.addf %186, %187 : vector<2x128xf32>
    %c0_176 = arith.constant 0 : index
    %c0_177 = arith.constant 0 : index
    %189 = vector.load %arg6[%c0_176, %c0_177] : memref<2x128xf32, #tpu.memory_space<vmem>>, vector<2x128xf32>
    tpu.vector_store %arg6[%c0_176, %c0_177], %188 {strides = array<i32>} : memref<2x128xf32, #tpu.memory_space<vmem>>, vector<2x128xf32>,
    return
  }
}

</mosaic_0001>

<bundles_post_ra>
// kernel: dqn_forward.1
= control target key start
LH: loop header
LB: loop body
LE: loop exit
PB: predicated region body
PF: predicated region fallthrough
CT: control target
= control target key end

     0   :  { %v46_v0 = vlaneseq  ;;  %v6163_v2 = vmov 1983009808   ;;  %vm388_vm0 = vsmask.f32 1280  ;;  %vm389_vm1 = vsmask.f32 3336  ;;  %s7720_s0 = inlined_call_operand.vmem [shape: bf16[4,2,5,5,64], index: 0, kind: input, shape index: {}]   ;;  %s7721_s1 = inlined_call_operand.vmem [shape: bf16[256,32], index: 1, kind: input, shape index: {}]   ;;  %s7722_s2 = inlined_call_operand.vmem [shape: bf16[1088,64], index: 2, kind: input, shape index: {}]   ;;  %s7723_s3 = inlined_call_operand.vmem [shape: bf16[1,64,512], index: 3, kind: input, shape index: {}]   ;;  %s7724_s4 = inlined_call_operand.vmem [shape: bf16[512,128], index: 4, kind: input, shape index: {}]   ;;  %s7725_s5 = inlined_call_operand.vmem [shape: f32[1,1024], index: 5, kind: input, shape index: {}]   ;;  %s7726_s6 = inlined_call_operand.hbm [shape: f32[2,128], index: 6, kind: output, shape index: {}]  }
   0x1   :  { %v5909_v1 = vld [vmem:[%s7721_s1 + $0x40] sm:$0xff]   ;;  %v44_v3 = vunpack.c.l.s4 %v6163_v2  ;;  %v6091_v5 = vld.sshfl [vmem:[%s7720_s0 + $0x78] sm:$0xf pattern:$0x76325410]  ;;  %s6164_s17 = smov 64   ;;  %vm390_vm4 = vmor %vm388_vm0, %vm389_vm1 }
   0x2   :  { %v6211_v4 = vshrl.u32 %v46_v0, 7  ;;  %5658 = vmatprep.subr.bf16.mxu0 %v5909_v1  ;;  %v5910_v6 = vld [vmem:[%s7721_s1] sm:$0xff]   ;;  %v6093_v9 = vld.sshfl [vmem:[%s7720_s0 + $0x28] sm:$0xf pattern:$0x76325410] }
   0x3   :  { %v45_v7 = vunpack.c.0.s8 %v44_v3  ;;  %v6092_v8 = vld.sshfl [vmem:[%s7720_s0 + $0x80] sm:$0xf pattern:$0x76325410]  ;;  %5659 = vmatpush3.bf16.msra.mxu0 %v5910_v6  ;;  %vm391_vm2 = vsmask.f32 5392 }
   0x4   :  { %7750 = vst [vmem:[#allocation8_spill] sm:$0xff] %v6211_v4  ;;  %v6094_v11 = vld.sshfl [vmem:[%s7720_s0 + $0x30] sm:$0xf pattern:$0x76325410]  ;;  %v228_v15 = vcombine.low %v6091_v5, %v6092_v8  ;;  %vm6255_vm5 = vmor %vm390_vm4, %vm391_vm2  ;;  %v5911_v38 = vld [vmem:[%s7721_s1 + $0x48] sm:$0xff]  }
   0x5   :  { %v6226_v10 = vsub.s32 %v45_v7, %v6211_v4  ;;  %v6095_v12 = vld.sshfl [vmem:[%s7720_s0 + $0x8c] sm:$0xf pattern:$0x76325410]  ;;  %vm393_vm3 = vsmask.f32 7448  ;;  %v113_v17 = vcombine.low %v6093_v9, %v6094_v11  ;;  %5660 = vmatprep.subr.bf16.mxu0 %v5911_v38 }
   0x6   :  { %v6096_v13 = vld.sshfl [vmem:[%s7720_s0 + $0x94] sm:$0xf pattern:$0x76325410]  ;;  %246 = vrot.lane.b32.xlu0 %v228_v15, %s6164_s17  ;;  %v5912_v43 = vld [vmem:[%s7721_s1 + $0x8] sm:$0xff]   ;;  %vm6273_vm6 = vmor %vm6255_vm5, %vm393_vm3  ;;  %vm77_vm7 = vcmask 523264  }
   0x7   :  { %v6097_v14 = vld.sshfl [vmem:[%s7720_s0 + $0x3c] sm:$0xf pattern:$0x76325410]  ;;  %v245_v18 = vcombine.low %v6095_v12, %v6096_v13  ;;  %v5913_v50 = vld [vmem:[%s7721_s1 + $0x50] sm:$0xff]   ;;  %5661 = vmatpush3.bf16.msra.mxu0 %v5912_v43  ;;  %vm137_vm8 = vcmask 1048064  }
   0x8   :  { %v6098_v16 = vld.sshfl [vmem:[%s7720_s0 + $0x44] sm:$0xf pattern:$0x76325410]  ;;  %5662 = vmatprep.subr.bf16.mxu0 %v5913_v50  ;;  %v5914_v63 = vld [vmem:[%s7721_s1 + $0x10] sm:$0xff]   ;;  %v5916_v38 = vld [vmem:[%s7721_s1 + $0x18] sm:$0xff]  }
   0x9   :  { %v5349_v19 = vld.sshfl [vmem:[%s7720_s0 + $0x50] sm:$0x13 pattern:$0x76325410]  ;;  %248 = vrot.lane.b32.xlu1 %v245_v18, %s6164_s17  ;;  %v130_v24 = vcombine.low %v6097_v14, %v6098_v16  ;;  %v5917_v43 = vld [vmem:[%s7721_s1 + $0x60] sm:$0xff]  }
   0xa   :  { %v5350_v20 = vld.sshfl [vmem:[%s7720_s0 + $0x54] sm:$0x13 pattern:$0x76325410]  ;;  %v626_v21 = vcombine.high %v5349_v19, %v5349_v19  ;;  %v684_v22 = vshrl.u32 %v5349_v19, 16  ;;  %v687_v23 = vshll.u32 %v5349_v19, 16  ;;  %131 = vrot.lane.b32.xlu0 %v113_v17, %s6164_s17 }
   0xb   :  { %v5351_v25 = vld.sshfl [vmem:[%s7720_s0 + $0x58] sm:$0x13 pattern:$0x76325410]  ;;  %v634_v26 = vcombine.high %v5350_v20, %v5350_v20  ;;  %v698_v27 = vshrl.u32 %v5350_v20, 16  ;;  %v701_v28 = vshll.u32 %v5350_v20, 16  ;;  %5663 = vmatpush3.bf16.msra.mxu0 %v5914_v63 }
   0xc   :  { %v5352_v30 = vld.sshfl [vmem:[%s7720_s0 + $0x5c] sm:$0x13 pattern:$0x76325410]  ;;  %v642_v31 = vcombine.high %v5351_v25, %v5351_v25  ;;  %v686_v32 = vrot.slane %v684_v22, 6  ;;  %v689_v33 = vrot.slane %v687_v23, 7 }
   0xd   :  { %v650_v34 = vcombine.high %v5352_v30, %v5352_v30  ;;  %v693_v35 = vshll.u32 %v626_v21, 16  ;;  %v700_v36 = vrot.slane %v698_v27, 6  ;;  %v703_v37 = vrot.slane %v701_v28, 7  ;;  %133 = vrot.lane.b32.xlu1 %v130_v24, %s6164_s17  ;;  %v5915_v21 = vld [vmem:[%s7721_s1 + $0x58] sm:$0xff]  }
   0xe   :  { %v690_v39 = vor.u32 %v689_v33, %v686_v32  ;;  %v707_v40 = vshll.u32 %v634_v26, 16  ;;  %v712_v41 = vshrl.u32 %v5351_v25, 16  ;;  %v715_v42 = vshll.u32 %v5351_v25, 16  ;;  %5664 = vmatprep.subr.bf16.mxu0 %v5915_v21 }
   0xf   :  { %v695_v45 = vrot.slane %v693_v35, 7  ;;  %v704_v46 = vor.u32 %v703_v37, %v700_v36  ;;  %v721_v47 = vshll.u32 %v642_v31, 16  ;;  %v726_v48 = vshrl.u32 %v5352_v30, 16  ;;  %5665 = vmatpush3.bf16.msra.mxu0 %v5916_v38 }
  0x10   :  { %v6280_v49 = vld.sshfl [vmem:[%s7720_s0 + $0x2c] sm:$0xf pattern:$0x76325410]  ;;  %v691_v51 = vrot.slane %v690_v39, 2  ;;  %v709_v52 = vrot.slane %v707_v40, 7  ;;  %5666 = vmatprep.subr.bf16.mxu0 %v5917_v43 }
  0x11   :  { %v714_v53 = vrot.slane %v712_v41, 6  ;;  %v717_v54 = vrot.slane %v715_v42, 7  ;;  %v705_v55 = vrot.slane %v704_v46, 2  ;;  %v723_v56 = vrot.slane %v721_v47, 7  ;;  %v5929_v43 = vld [vmem:[%s7721_s1 + $0x78] sm:$0xff]  }
  0x12   :  { %v728_v57 = vrot.slane %v726_v48, 6  ;;  %v729_v58 = vshll.u32 %v5352_v30, 16  ;;  %v696_v59 = vsel %vm6273_vm6, %v691_v51, %v695_v45  ;;  %v735_v61 = vshll.u32 %v650_v34, 16 }
  0x13   :  { %v718_v60 = vor.u32 %v717_v54, %v714_v53  ;;  %v5325_v62 = vld.sshfl [vmem:[%s7720_s0] sm:$0x13 pattern:$0x76325410]  ;;  %v710_v0 = vsel %vm6273_vm6, %v705_v55, %v709_v52 }
  0x14   :  { %v731_v1 = vrot.slane %v729_v58, 7  ;;  %v5326_v2 = vld.sshfl [vmem:[%s7720_s0 + $0x4] sm:$0x13 pattern:$0x76325410]  ;;  %v331_v3 = vcombine.high %v5325_v62, %v5325_v62  ;;  %v396_v5 = vshrl.u32 %v5325_v62, 16  ;;  %v795_v8 = vcombine.low %v696_v59, %v710_v0 }
  0x15   :  { %v719_v6 = vrot.slane %v718_v60, 2  ;;  %v737_v7 = vrot.slane %v735_v61, 7  ;;  %v5327_v9 = vld.sshfl [vmem:[%s7720_s0 + $0x8] sm:$0x13 pattern:$0x76325410]  ;;  %v339_v11 = vcombine.high %v5326_v2, %v5326_v2 }
  0x16   :  { %v732_v12 = vor.u32 %v731_v1, %v728_v57  ;;  %v5328_v13 = vld.sshfl [vmem:[%s7720_s0 + $0xc] sm:$0x13 pattern:$0x76325410]  ;;  %v347_v14 = vcombine.high %v5327_v9, %v5327_v9  ;;  %v398_v15 = vrot.slane %v396_v5, 6  ;;  %v399_v16 = vshll.u32 %v5325_v62, 16 }
  0x17   :  { %v724_v17 = vsel %vm6273_vm6, %v719_v6, %v723_v56  ;;  %v803_v18 = vrot.slane %v795_v8, %v6226_v10  ;;  %v355_v19 = vcombine.high %v5328_v13, %v5328_v13  ;;  %v405_v20 = vshll.u32 %v331_v3, 16  ;;  %v5353_v50 = vld.sshfl [vmem:[%s7720_s0 + $0x64] sm:$0x13 pattern:$0x76325410]  ;;  %v5921_v62 = vld [vmem:[%s7721_s1 + $0x68] sm:$0xff]  }
  0x18   :  { %v733_v22 = vrot.slane %v732_v12, 2  ;;  %v401_v23 = vrot.slane %v399_v16, 7  ;;  %v410_v24 = vshrl.u32 %v5326_v2, 16  ;;  %v413_v25 = vshll.u32 %v5326_v2, 16  ;;  %v5918_v57 = vld [vmem:[%s7721_s1 + $0x20] sm:$0xff]  }
  0x19   :  { %v407_v26 = vrot.slane %v405_v20, 7  ;;  %v419_v27 = vshll.u32 %v339_v11, 16  ;;  %v424_v28 = vshrl.u32 %v5327_v9, 16  ;;  %v427_v29 = vshll.u32 %v5327_v9, 16  ;;  %5667 = vmatpush3.bf16.msra.mxu0 %v5918_v57 }
  0x1a   :  { %v738_v30 = vsel %vm6273_vm6, %v733_v22, %v737_v7  ;;  %v402_v31 = vor.u32 %v401_v23, %v398_v15  ;;  %v412_v32 = vrot.slane %v410_v24, 6  ;;  %v415_v33 = vrot.slane %v413_v25, 7  ;;  %v5354_v51 = vld.sshfl [vmem:[%s7720_s0 + $0x68] sm:$0x13 pattern:$0x76325410]  ;;  %5668 = vmatprep.subr.bf16.mxu0 %v5921_v62 }
  0x1b   :  { %v796_v34 = vcombine.low %v724_v17, %v738_v30  ;;  %v421_v35 = vrot.slane %v419_v27, 7  ;;  %v426_v36 = vrot.slane %v424_v28, 6  ;;  %v429_v37 = vrot.slane %v427_v29, 7  ;;  %v5925_v27 = vld [vmem:[%s7721_s1 + $0x70] sm:$0xff]  }
  0x1c   :  { %v403_v39 = vrot.slane %v402_v31, 2  ;;  %v416_v40 = vor.u32 %v415_v33, %v412_v32  ;;  %v433_v41 = vshll.u32 %v347_v14, 16  ;;  %v438_v42 = vshrl.u32 %v5328_v13, 16 }
  0x1d   :  { %v810_v45 = vrot.slane %v796_v34, %v6226_v10  ;;  %v430_v46 = vor.u32 %v429_v37, %v426_v36  ;;  %v441_v47 = vshll.u32 %v5328_v13, 16  ;;  %v447_v48 = vshll.u32 %v355_v19, 16  ;;  %v5355_v52 = vld.sshfl [vmem:[%s7720_s0 + $0x6c] sm:$0x13 pattern:$0x76325410] }
  0x1e   :  { %v408_v53 = vsel %vm6273_vm6, %v403_v39, %v407_v26  ;;  %v417_v54 = vrot.slane %v416_v40, 2  ;;  %v435_v55 = vrot.slane %v433_v41, 7  ;;  %v440_v56 = vrot.slane %v438_v42, 6  ;;  %v5926_v37 = vld [vmem:[%s7721_s1 + $0x30] sm:$0xff]  }
  0x1f   :  { %v6333_v58 = vcombine.low %v803_v18, %v810_v45  ;;  %v431_v59 = vrot.slane %v430_v46, 2  ;;  %v443_v60 = vrot.slane %v441_v47, 7  ;;  %v449_v61 = vrot.slane %v447_v48, 7  ;;  %v5922_v18 = vld [vmem:[%s7721_s1 + $0x28] sm:$0xff]  }
  0x20   :  { %v6340_v63 = vsel %vm6273_vm6, %v417_v54, %v421_v35  ;;  %v5356_v0 = vld.sshfl [vmem:[%s7720_s0 + $0x70] sm:$0x13 pattern:$0x76325410]  ;;  %v658_v1 = vcombine.high %v5353_v50, %v5353_v50  ;;  %v666_v2 = vcombine.high %v5354_v51, %v5354_v51  ;;  %v674_v3 = vcombine.high %v5355_v52, %v5355_v52  ;;  %5669 = vmatpush3.bf16.msra.mxu0 %v5922_v18 }
  0x21   :  { %829 = vrot.lane.b32.xlu0 %v6333_v58, %s6164_s17  ;;  %v6349_v5 = vsel %vm6273_vm6, %v431_v59, %v435_v55  ;;  %v444_v6 = vor.u32 %v443_v60, %v440_v56  ;;  %v507_v7 = vcombine.low %v408_v53, %v6340_v63  ;;  %v682_v8 = vcombine.high %v5356_v0, %v5356_v0  ;;  %v5329_v36 = vld.sshfl [vmem:[%s7720_s0 + $0x14] sm:$0x13 pattern:$0x76325410] }
  0x22   :  { %v740_v9 = vshrl.u32 %v5353_v50, 16  ;;  %v743_v11 = vshll.u32 %v5353_v50, 16  ;;  %v749_v12 = vshll.u32 %v658_v1, 16  ;;  %v754_v13 = vshrl.u32 %v5354_v51, 16  ;;  %5670 = vmatprep.subr.bf16.mxu0 %v5925_v27 }
  0x23   :  { %v445_v14 = vrot.slane %v444_v6, 2  ;;  %v515_v15 = vrot.slane %v507_v7, %v6226_v10  ;;  %v757_v16 = vshll.u32 %v5354_v51, 16  ;;  %v763_v17 = vshll.u32 %v666_v2, 16 }
  0x24   :  { %v742_v19 = vrot.slane %v740_v9, 6  ;;  %v745_v20 = vrot.slane %v743_v11, 7  ;;  %v751_v21 = vrot.slane %v749_v12, 7  ;;  %v756_v22 = vrot.slane %v754_v13, 6  ;;  %5671 = vmatpush3.bf16.msra.mxu0 %v5926_v37 }
  0x25   :  { %v6358_v23 = vsel %vm6273_vm6, %v445_v14, %v449_v61  ;;  %v759_v24 = vrot.slane %v757_v16, 7  ;;  %v765_v25 = vrot.slane %v763_v17, 7  ;;  %v768_v26 = vshrl.u32 %v5355_v52, 16  ;;  %5672 = vmatprep.subr.bf16.mxu0 %v5929_v43  ;;  %v5930_v61 = vld [vmem:[%s7721_s1 + $0x38] sm:$0xff]  }
  0x26   :  { %v508_v28 = vcombine.low %v6349_v5, %v6358_v23  ;;  %v746_v29 = vor.u32 %v745_v20, %v742_v19  ;;  %v771_v30 = vshll.u32 %v5355_v52, 16  ;;  %v777_v31 = vshll.u32 %v674_v3, 16  ;;  %v5330_v42 = vld.sshfl [vmem:[%s7720_s0 + $0x18] sm:$0x13 pattern:$0x76325410] }
  0x27   :  { %v760_v32 = vor.u32 %v759_v24, %v756_v22  ;;  %v770_v33 = vrot.slane %v768_v26, 6  ;;  %v782_v34 = vshrl.u32 %v5356_v0, 16  ;;  %v785_v35 = vshll.u32 %v5356_v0, 16 }
  0x28   :  { %v522_v38 = vrot.slane %v508_v28, %v6226_v10  ;;  %v747_v39 = vrot.slane %v746_v29, 2  ;;  %v773_v40 = vrot.slane %v771_v30, 7  ;;  %v779_v41 = vrot.slane %v777_v31, 7  ;;  %5673 = vmatpush3.bf16.msra.mxu0 %v5930_v61 }
  0x29   :  { %v761_v45 = vrot.slane %v760_v32, 2  ;;  %v784_v46 = vrot.slane %v782_v34, 6  ;;  %v787_v47 = vrot.slane %v785_v35, 7  ;;  %v791_v48 = vshll.u32 %v682_v8, 16 }
  0x2a   :  { %v523_v50 = vcombine.low %v515_v15, %v522_v38  ;;  %v752_v51 = vsel %vm6273_vm6, %v747_v39, %v751_v21  ;;  %v774_v52 = vor.u32 %v773_v40, %v770_v33  ;;  %v5331_v53 = vld.sshfl [vmem:[%s7720_s0 + $0x1c] sm:$0x13 pattern:$0x76325410]  ;;  %v363_v54 = vcombine.high %v5329_v36, %v5329_v36 }
  0x2b   :  { %v766_v55 = vsel %vm6273_vm6, %v761_v45, %v765_v25  ;;  %v788_v56 = vor.u32 %v787_v47, %v784_v46  ;;  %v793_v57 = vrot.slane %v791_v48, 7  ;;  %v5332_v59 = vld.sshfl [vmem:[%s7720_s0 + $0x20] sm:$0x13 pattern:$0x76325410]  ;;  %v371_v60 = vcombine.high %v5330_v42, %v5330_v42 }
  0x2c   :  { %541 = vrot.lane.b32.xlu1 %v523_v50, %s6164_s17  ;;  %v775_v62 = vrot.slane %v774_v52, 2  ;;  %v812_v0 = vcombine.low %v752_v51, %v766_v55  ;;  %v379_v1 = vcombine.high %v5331_v53, %v5331_v53  ;;  %v387_v2 = vcombine.high %v5332_v59, %v5332_v59  ;;  %v6100_v18 = vld.sshfl [vmem:[%s7720_s0 + $0x34] sm:$0xf pattern:$0x76325410] }
  0x2d   :  { %v789_v3 = vrot.slane %v788_v56, 2  ;;  %v452_v6 = vshrl.u32 %v5329_v36, 16  ;;  %v455_v7 = vshll.u32 %v5329_v36, 16  ;;  %v461_v8 = vshll.u32 %v363_v54, 16 }
  0x2e   :  { %v780_v9 = vsel %vm6273_vm6, %v775_v62, %v779_v41  ;;  %v820_v11 = vrot.slane %v812_v0, %v6226_v10  ;;  %v466_v12 = vshrl.u32 %v5330_v42, 16  ;;  %v469_v13 = vshll.u32 %v5330_v42, 16  ;;  %v6101_v32 = vld.sshfl [vmem:[%s7720_s0 + $0x40] sm:$0xf pattern:$0x76325410] }
  0x2f   :  { %v794_v14 = vsel %vm6273_vm6, %v789_v3, %v793_v57  ;;  %v454_v15 = vrot.slane %v452_v6, 6  ;;  %v457_v16 = vrot.slane %v455_v7, 7  ;;  %v463_v17 = vrot.slane %v461_v8, 7 }
  0x30   :  { %v813_v19 = vcombine.low %v780_v9, %v794_v14  ;;  %v468_v20 = vrot.slane %v466_v12, 6  ;;  %v471_v21 = vrot.slane %v469_v13, 7  ;;  %v475_v22 = vshll.u32 %v371_v60, 16 }
  0x31   :  { %v458_v24 = vor.u32 %v457_v16, %v454_v15  ;;  %v480_v25 = vshrl.u32 %v5331_v53, 16  ;;  %v483_v26 = vshll.u32 %v5331_v53, 16  ;;  %v489_v27 = vshll.u32 %v379_v1, 16 }
  0x32   :  { %v827_v28 = vrot.slane %v813_v19, %v6226_v10  ;;  %v472_v29 = vor.u32 %v471_v21, %v468_v20  ;;  %v477_v30 = vrot.slane %v475_v22, 7  ;;  %v494_v31 = vshrl.u32 %v5332_v59, 16  ;;  %v6102_v33 = vld.sshfl [vmem:[%s7720_s0 + $0x48] sm:$0xf pattern:$0x76325410] }
  0x33   :  { %v459_v34 = vrot.slane %v458_v24, 2  ;;  %v482_v35 = vrot.slane %v480_v25, 6  ;;  %v485_v36 = vrot.slane %v483_v26, 7  ;;  %v491_v37 = vrot.slane %v489_v27, 7 }
  0x34   :  { %v6407_v38 = vcombine.low %v820_v11, %v827_v28  ;;  %v473_v39 = vrot.slane %v472_v29, 2  ;;  %v496_v40 = vrot.slane %v494_v31, 6  ;;  %v497_v41 = vshll.u32 %v5332_v59, 16 }
  0x35   :  { %v486_v42 = vor.u32 %v485_v36, %v482_v35  ;;  %v503_v43 = vshll.u32 %v387_v2, 16  ;;  %v5432_v45 = vld.sshfl [vmem:[%s7720_s0 + $0x10] sm:$0x13 pattern:$0x76325410]  ;;  %v464_v46 = vsel %vm6273_vm6, %v459_v34, %v463_v17  ;;  %v1037_v52 = vcombine.low %v6280_v49, %v6100_v18 }
  0x36   :  { %831 = vrot.lane.b32.xlu0 %v6407_v38, %s6164_s17  ;;  %v478_v47 = vsel %vm6273_vm6, %v473_v39, %v477_v30  ;;  %v499_v48 = vrot.slane %v497_v41, 7  ;;  %v5436_v53 = vld.sshfl [vmem:[%s7720_s0 + $0x24] sm:$0x13 pattern:$0x76325410]  ;;  %v1054_v49 = vcombine.low %v6101_v32, %v6102_v33  ;;  %v1452_v61 = vcombine.high %v5432_v45, %v5432_v45 }
  0x37   :  { %v487_v50 = vrot.slane %v486_v42, 2  ;;  %v505_v51 = vrot.slane %v503_v43, 7  ;;  %v6103_v55 = vld.sshfl [vmem:[%s7720_s0 + $0x78] sm:$0xf pattern:$0x76325410]  ;;  %v524_v59 = vcombine.low %v464_v46, %v478_v47  ;;  %v1484_v1 = vcombine.high %v5436_v53, %v5436_v53 }
  0x38   :  { %v500_v54 = vor.u32 %v499_v48, %v496_v40  ;;  %v6104_v56 = vld.sshfl [vmem:[%s7720_s0 + $0x80] sm:$0xf pattern:$0x76325410]  ;;  %v1528_v62 = vshrl.u32 %v5432_v45, 16  ;;  %v1531_v0 = vshll.u32 %v5432_v45, 16  ;;  %v1597_v24 = vcombine.low %v6340_v63, %v6349_v5 }
  0x39   :  { %v492_v57 = vsel %vm6273_vm6, %v487_v50, %v491_v37  ;;  %v6107_v3 = vld.sshfl [vmem:[%s7720_s0 + $0x8c] sm:$0xf pattern:$0x76325410]  ;;  %v1537_v7 = vshll.u32 %v1452_v61, 16  ;;  %v1584_v8 = vshrl.u32 %v5436_v53, 16  ;;  %v532_v11 = vrot.slane %v524_v59, %v6226_v10 }
  0x3a   :  { %v501_v60 = vrot.slane %v500_v54, 2  ;;  %1055 = vrot.lane.b32.xlu0 %v1037_v52, %s6164_s17  ;;  %v1530_v6 = vrot.slane %v1528_v62, 6  ;;  %v6108_v12 = vld.sshfl [vmem:[%s7720_s0 + $0x94] sm:$0xf pattern:$0x76325410]  ;;  %v923_v29 = vcombine.low %v6103_v55, %v6104_v56  ;;  %v1614_v30 = vcombine.low %v478_v47, %v492_v57 }
  0x3b   :  { %v1533_v13 = vrot.slane %v1531_v0, 7  ;;  %v1587_v14 = vshll.u32 %v5436_v53, 16  ;;  %v6105_v15 = vld.sshfl [vmem:[%s7720_s0 + $0x50] sm:$0xf pattern:$0x76325410]  ;;  %v1605_v35 = vrot.slane %v1597_v24, %v6226_v10  ;;  %v940_v44 = vcombine.low %v6107_v3, %v6108_v12 }
  0x3c   :  { %v506_v2 = vsel %vm6273_vm6, %v501_v60, %v505_v51  ;;  %v6106_v16 = vld.sshfl [vmem:[%s7720_s0 + $0x58] sm:$0xf pattern:$0x76325410]  ;;  %v1586_v17 = vrot.slane %v1584_v8, 6  ;;  %v1593_v18 = vshll.u32 %v1484_v1, 16  ;;  %v1622_v40 = vrot.slane %v1614_v30, %v6226_v10 }
  0x3d   :  { %v525_v9 = vcombine.low %v492_v57, %v506_v2  ;;  %v1534_v20 = vor.u32 %v1533_v13, %v1530_v6  ;;  %v1539_v21 = vrot.slane %v1537_v7, 7  ;;  %v1589_v22 = vrot.slane %v1587_v14, 7  ;;  %v6109_v31 = vld.sshfl [vmem:[%s7720_s0] sm:$0xf pattern:$0x76325410] }
  0x3e   :  { %1057 = vrot.lane.b32.xlu0 %v1054_v49, %s6164_s17  ;;  %v1595_v25 = vrot.slane %v1593_v18, 7  ;;  %v6110_v32 = vld.sshfl [vmem:[%s7720_s0 + $0x8] sm:$0xf pattern:$0x76325410]  ;;  %v173_v33 = vcombine.low %v6105_v15, %v6106_v16 }
  0x3f   :  { %v539_v19 = vrot.slane %v525_v9, %v6226_v10  ;;  %v1535_v27 = vrot.slane %v1534_v20, 2  ;;  %v1590_v28 = vor.u32 %v1589_v22, %v1586_v17  ;;  %v57_v41 = vcombine.low %v6109_v31, %v6110_v32  ;;  %v6111_v42 = vld.sshfl [vmem:[%s7720_s0 + $0x64] sm:$0xf pattern:$0x76325410] }
  0x40   :  { %193 = vst.msk [vmem:[#allocation2 + $0x8] sm:$0xff] %vm77_vm7, %v173_v33  ;;  %v6113_v46 = vld.sshfl [vmem:[%s7720_s0 + $0x14] sm:$0xf pattern:$0x76325410] }
  0x41   :  { %v540_v26 = vcombine.low %v532_v11, %v539_v19  ;;  %v1540_v63 = vsel %vm6273_vm6, %v1535_v27, %v1539_v21  ;;  %v1591_v5 = vrot.slane %v1590_v28, 2  ;;  %78 = vst.msk [vmem:[#allocation2] sm:$0xff] %vm77_vm7, %v57_v41  ;;  %v6114_v47 = vld.sshfl [vmem:[%s7720_s0 + $0x1c] sm:$0xf pattern:$0x76325410] }
  0x42   :  { %v1598_v34 = vcombine.low %v6358_v23, %v1540_v63  ;;  %v6112_v23 = vld.sshfl [vmem:[%s7720_s0 + $0x6c] sm:$0xf pattern:$0x76325410]  ;;  %v74_v53 = vcombine.low %v6113_v46, %v6114_v47 }
  0x43   :  { %543 = vrot.lane.b32.xlu1 %v540_v26, %s6164_s17  ;;  %v1596_v36 = vsel %vm6273_vm6, %v1591_v5, %v1595_v25  ;;  %v190_v50 = vcombine.low %v6111_v42, %v6112_v23  ;;  %v6115_v51 = vld.sshfl [vmem:[%s7720_s0 + $0x78] sm:$0xf pattern:$0x76325410] }
  0x44   :  { %v1612_v37 = vrot.slane %v1598_v34, %v6226_v10  ;;  %v1615_v39 = vcombine.low %v506_v2, %v1596_v36  ;;  %v6116_v52 = vld.sshfl [vmem:[%s7720_s0 + $0x80] sm:$0xf pattern:$0x76325410]  ;;  %79 = vst.msk [vmem:[#allocation2 + $0x10] sm:$0xff] %vm77_vm7, %v74_v53 }
  0x45   :  { %194 = vst.msk [vmem:[#allocation2 + $0x18] sm:$0xff] %vm77_vm7, %v190_v50  ;;  %v6117_v54 = vld.sshfl [vmem:[%s7720_s0 + $0x28] sm:$0xf pattern:$0x76325410]  ;;  %v581_v56 = vcombine.low %v6115_v51, %v6116_v52 }
  0x46   :  { %v1613_v43 = vcombine.low %v1605_v35, %v1612_v37  ;;  %v1629_v45 = vrot.slane %v1615_v39, %v6226_v10  ;;  %v6118_v55 = vld.sshfl [vmem:[%s7720_s0 + $0x30] sm:$0xf pattern:$0x76325410] }
  0x47   :  { %941 = vrot.lane.b32.xlu1 %v923_v29, %s6164_s17  ;;  %v6119_v57 = vld.sshfl [vmem:[%s7720_s0 + $0x8c] sm:$0xf pattern:$0x76325410]  ;;  %601 = vst.msk [vmem:[#allocation2 + $0x28] sm:$0xff] %vm77_vm7, %v581_v56  ;;  %v286_v60 = vcombine.low %v6117_v54, %v6118_v55 }
  0x48   :  { %1631 = vrot.lane.b32.xlu0 %v1613_v43, %s6164_s17  ;;  %v1630_v48 = vcombine.low %v1622_v40, %v1629_v45  ;;  %v6120_v59 = vld.sshfl [vmem:[%s7720_s0 + $0x94] sm:$0xf pattern:$0x76325410] }
  0x49   :  { %v6121_v49 = vld.sshfl [vmem:[%s7720_s0 + $0x3c] sm:$0xf pattern:$0x76325410]  ;;  %306 = vst.msk [vmem:[#allocation2 + $0x20] sm:$0xff] %vm77_vm7, %v286_v60  ;;  %v598_v61 = vcombine.low %v6119_v57, %v6120_v59 }
  0x4a   :  { %v6123_v62 = vld.sshfl [vmem:[%s7720_s0 + $0x4] sm:$0xf pattern:$0x76325410] }
  0x4b   :  { %943 = vrot.lane.b32.xlu1 %v940_v44, %s6164_s17  ;;  %v6124_v0 = vld.sshfl [vmem:[%s7720_s0 + $0xc] sm:$0xf pattern:$0x76325410]  ;;  %602 = vst.msk [vmem:[#allocation2 + $0x38] sm:$0xff] %vm77_vm7, %v598_v61 }
  0x4c   :  { %1633 = vrot.lane.b32.xlu0 %v1630_v48, %s6164_s17  ;;  %v6125_v2 = vld.sshfl [vmem:[%s7720_s0 + $0x50] sm:$0xf pattern:$0x76325410]  ;;  %v982_v3 = vcombine.low %v6123_v62, %v6124_v0 }
  0x4d   :  { %v6127_v6 = vld.sshfl [vmem:[%s7720_s0 + $0x18] sm:$0xf pattern:$0x76325410] }
  0x4e   :  { %v6128_v7 = vld.sshfl [vmem:[%s7720_s0 + $0x20] sm:$0xf pattern:$0x76325410]  ;;  %1002 = vst.msk [vmem:[#allocation2 + $0x48] sm:$0xff] %vm77_vm7, %v982_v3 }
  0x4f   :  { %1343 = vrot.lane.b32.xlu1 %v6333_v58, %s6164_s17  ;;  %v6122_v58 = vld.sshfl [vmem:[%s7720_s0 + $0x44] sm:$0xf pattern:$0x76325410]  ;;  %v999_v12 = vcombine.low %v6127_v6, %v6128_v7 }
  0x50   :  { %v303_v1 = vcombine.low %v6121_v49, %v6122_v58  ;;  %v6129_v9 = vld.sshfl [vmem:[%s7720_s0 + $0x64] sm:$0xf pattern:$0x76325410] }
  0x51   :  { %v6130_v11 = vld.sshfl [vmem:[%s7720_s0 + $0x6c] sm:$0xf pattern:$0x76325410]  ;;  %1003 = vst.msk [vmem:[#allocation2 + $0x58] sm:$0xff] %vm77_vm7, %v999_v12 }
  0x52   :  { %307 = vst.msk [vmem:[#allocation2 + $0x30] sm:$0xff] %vm77_vm7, %v303_v1  ;;  %v6131_v13 = vld.sshfl [vmem:[%s7720_s0 + $0x2c] sm:$0xf pattern:$0x76325410]  ;;  %v886_v15 = vcombine.low %v6129_v9, %v6130_v11 }
  0x53   :  { %1345 = vrot.lane.b32.xlu1 %v6407_v38, %s6164_s17  ;;  %v6126_v38 = vld.sshfl [vmem:[%s7720_s0 + $0x58] sm:$0xf pattern:$0x76325410] }
  0x54   :  { %v869_v8 = vcombine.low %v6125_v2, %v6126_v38  ;;  %v6132_v14 = vld.sshfl [vmem:[%s7720_s0 + $0x34] sm:$0xf pattern:$0x76325410]  ;;  %890 = vst.msk [vmem:[#allocation2 + $0x50] sm:$0xff] %vm77_vm7, %v886_v15 }
  0x55   :  { %v6133_v16 = vld.sshfl [vmem:[%s7720_s0 + $0x78] sm:$0xf pattern:$0x76325410]  ;;  %v1383_v18 = vcombine.low %v6131_v13, %v6132_v14 }
  0x56   :  { %889 = vst.msk [vmem:[#allocation2 + $0x40] sm:$0xff] %vm77_vm7, %v869_v8  ;;  %v6134_v17 = vld.sshfl [vmem:[%s7720_s0 + $0x80] sm:$0xf pattern:$0x76325410] }
  0x57   :  { %v6135_v19 = vld.sshfl [vmem:[%s7720_s0 + $0x40] sm:$0xf pattern:$0x76325410]  ;;  %1403 = vst.msk [vmem:[#allocation2 + $0x68] sm:$0xff] %vm77_vm7, %v1383_v18  ;;  %v1095_v21 = vcombine.low %v6133_v16, %v6134_v17 }
  0x58   :  { %v6136_v20 = vld.sshfl [vmem:[%s7720_s0 + $0x48] sm:$0xf pattern:$0x76325410] }
  0x59   :  { %v6137_v22 = vld.sshfl [vmem:[%s7720_s0 + $0x8c] sm:$0xf pattern:$0x76325410]  ;;  %1115 = vst.msk [vmem:[#allocation2 + $0x60] sm:$0xff] %vm77_vm7, %v1095_v21  ;;  %v1400_v25 = vcombine.low %v6135_v19, %v6136_v20 }
  0x5a   :  { %v6138_v24 = vld.sshfl [vmem:[%s7720_s0 + $0x94] sm:$0xf pattern:$0x76325410] }
  0x5b   :  { %1404 = vst.msk [vmem:[#allocation2 + $0x78] sm:$0xff] %vm77_vm7, %v1400_v25  ;;  %v1112_v26 = vcombine.low %v6137_v22, %v6138_v24 }
  0x5d   :  { %1116 = vst.msk [vmem:[#allocation2 + $0x70] sm:$0xff] %vm77_vm7, %v1112_v26 }
  0x78   :  { %v247_v27 = vpop.permute.xlu0 %246 }
  0x79   :  { %252 = vst.msk [vmem:[#allocation2 + $0x8] sm:$0xff] %vm137_vm8, %v247_v27 }
  0x7b   :  { %v249_v28 = vpop.permute.xlu1 %248 }
  0x7c   :  { %253 = vst.msk [vmem:[#allocation2 + $0x18] sm:$0xff] %vm137_vm8, %v249_v28  ;;  %v132_v29 = vpop.permute.xlu0 %131 }
  0x7d   :  { %138 = vst.msk [vmem:[#allocation2] sm:$0xff] %vm137_vm8, %v132_v29 }
  0x7f   :  { %v134_v30 = vpop.permute.xlu1 %133 }
  0x80   :  { %139 = vst.msk [vmem:[#allocation2 + $0x10] sm:$0xff] %vm137_vm8, %v134_v30  ;;  %v1641_v31 = vld [vmem:[#allocation2 + $0x8] sm:$0xff] }
  0x81   :  { %1822 = vmatprep.mubr.bf16.mxu0 %v1641_v31 }
  0x83   :  { %v1643_v32 = vld [vmem:[#allocation2 + $0x18] sm:$0xff] }
  0x84   :  { %v1640_v63 = vld [vmem:[#allocation2] sm:$0xff] }
  0x85   :  { %1823 = vmatmul.mubr.bf16.vlgmr.msra.gmra.mrb[0].mxu0 %v1640_v63 }
  0x86   :  { %1830 = vmatprep.mubr.bf16.mxu0 %v1643_v32 }
  0x87   :  { %v1642_v5 = vld [vmem:[#allocation2 + $0x10] sm:$0xff] }
  0x8d   :  { %1831 = vmatmul.mubr.bf16.gmra.mrb[4].mxu0 %v1642_v5 }
  0x93   :  { %v830_v33 = vpop.permute.xlu0 %829 }
  0x94   :  { %835 = vst.msk [vmem:[#allocation2 + $0x28] sm:$0xff] %vm137_vm8, %v830_v33 }
  0x9b   :  { %v1645_v34 = vld [vmem:[#allocation2 + $0x28] sm:$0xff] }
  0x9c   :  { %1838 = vmatprep.mubr.bf16.mxu0 %v1645_v34 }
  0x9e   :  { %v542_v35 = vpop.permute.xlu1 %541 }
  0x9f   :  { %547 = vst.msk [vmem:[#allocation2 + $0x20] sm:$0xff] %vm137_vm8, %v542_v35 }
  0xa6   :  { %v1644_v36 = vld [vmem:[#allocation2 + $0x20] sm:$0xff] }
  0xa7   :  { %1839 = vmatmul.mubr.bf16.gmra.mrb[8].mxu0 %v1644_v36 }
  0xa8   :  { %v832_v37 = vpop.permute.xlu0 %831 }
  0xa9   :  { %11 = vsyncpa [#allocation6], 0  ;;  %836 = vst.msk [vmem:[#allocation2 + $0x38] sm:$0xff] %vm137_vm8, %v832_v37  ;;  %v6593_v60 = vld [vmem:[%s7725_s5] ss:$0 sm:$0xff]  ;;  %vm2195_vm9 = vcmask 257024  }
  0xaa   :  { %v6165_v62 = vmov 1966171168   ;;  %v6166_v17 = vmov 1935823168   ;;  %vm2198_vm10 = vcmask 253952   ;;  %s6167_s21 = smov 32  }
  0xab   :  { %v2056_v0 = vunpack.c.l.s4 %v6165_v62  ;;  %v2133_v18 = vunpack.c.l.s4 %v6166_v17  ;;  %s6168_s22 = smov 96   ;;  %vm2346_vm11 = vcmask 519424   ;;  %vm2437_vm12 = vcmask 781824   ;;  %s6172_s28 = smov [#allocation5]  }
  0xac   :  { %v1056_v39 = vpop.permute.xlu0 %1055  ;;  %vm2528_vm13 = vcmask 1044224   ;;  %vm2349_vm14 = vcmask 516352   ;;  %vm2440_vm15 = vcmask 778752   ;;  %vm2531_vm0 = vcmask 1041152   ;;  %s5285_s29 = sshll.u32 %s6172_s28, 4  ;;  %s5286_s29 = int_to_ptr.vmem [resolvable:$true] %s5285_s29 }
  0xad   :  { %1061 = vst.msk [vmem:[#allocation2 + $0x48] sm:$0xff] %vm137_vm8, %v1056_v39  ;;  %v2057_v6 = vunpack.c.0.s8 %v2056_v0  ;;  %v2134_v29 = vunpack.c.0.s8 %v2133_v18  ;;  %vm4226_vm1 = vcmask 516096   ;;  %vm4232_vm2 = vcmask 1040896   ;;  %p6144_p1 = scmp.lt.s32.totalorder %s5286_s29, %s5286_s29 }
  0xae   :  { %vm6170_vm3 = vmmov 0  }
  0xaf   :  { %v6598_v14 = vsub.s32 %v2057_v6, %v6211_v4 }
  0xb0   :  { %v1647_v40 = vld [vmem:[#allocation2 + $0x38] sm:$0xff]  ;;  %v1058_v41 = vpop.permute.xlu0 %1057 }
  0xb1   :  { %1846 = vmatprep.mubr.bf16.mxu0 %v1647_v40  ;;  %1062 = vst.msk [vmem:[#allocation2 + $0x58] sm:$0xff] %vm137_vm8, %v1058_v41  ;;  %7755 = vst [vmem:[#allocation9_spill] sm:$0xff] %v6598_v14 }
  0xb4   :  { %v1649_v44 = vld [vmem:[#allocation2 + $0x48] sm:$0xff] }
  0xb5   :  { %v544_v42 = vpop.permute.xlu1 %543 }
  0xb6   :  { %548 = vst.msk [vmem:[#allocation2 + $0x30] sm:$0xff] %vm137_vm8, %v544_v42  ;;  %v6634_v42 = vsub.s32 %v2134_v29, %v6211_v4 }
  0xb8   :  { %v1651_v51 = vld [vmem:[#allocation2 + $0x58] sm:$0xff] }
  0xb9   :  { %v942_v23 = vpop.permute.xlu1 %941 }
  0xba   :  { %947 = vst.msk [vmem:[#allocation2 + $0x40] sm:$0xff] %vm137_vm8, %v942_v23  ;;  %v1632_v43 = vpop.permute.xlu0 %1631 }
  0xbb   :  { %1637 = vst.msk [vmem:[#allocation2 + $0x68] sm:$0xff] %vm137_vm8, %v1632_v43 }
  0xbd   :  { %v1646_v45 = vld [vmem:[#allocation2 + $0x30] sm:$0xff]  ;;  %v944_v46 = vpop.permute.xlu1 %943 }
  0xbe   :  { %1847 = vmatmul.mubr.bf16.gmra.mrb[12].mxu0 %v1646_v45  ;;  %948 = vst.msk [vmem:[#allocation2 + $0x50] sm:$0xff] %vm137_vm8, %v944_v46  ;;  %v1634_v47 = vpop.permute.xlu0 %1633 }
  0xbf   :  { %1854 = vmatprep.mubr.bf16.mxu0 %v1649_v44  ;;  %1638 = vst.msk [vmem:[#allocation2 + $0x78] sm:$0xff] %vm137_vm8, %v1634_v47 }
  0xc1   :  { %v1344_v48 = vpop.permute.xlu1 %1343  ;;  %v1648_v50 = vld [vmem:[#allocation2 + $0x40] sm:$0xff] }
  0xc2   :  { %1349 = vst.msk [vmem:[#allocation2 + $0x60] sm:$0xff] %vm137_vm8, %v1344_v48  ;;  %v1653_v54 = vld [vmem:[#allocation2 + $0x68] sm:$0xff] }
  0xc5   :  { %v1346_v52 = vpop.permute.xlu1 %1345  ;;  %v1650_v53 = vld [vmem:[#allocation2 + $0x50] sm:$0xff] }
  0xc6   :  { %1855 = vmatmul.mubr.bf16.gmra.mrb[16].mxu0 %v1648_v50  ;;  %1350 = vst.msk [vmem:[#allocation2 + $0x70] sm:$0xff] %vm137_vm8, %v1346_v52  ;;  %v1655_v56 = vld [vmem:[#allocation2 + $0x78] sm:$0xff] }
  0xc7   :  { %1862 = vmatprep.mubr.bf16.mxu0 %v1651_v51 }
  0xc9   :  { %v1652_v55 = vld [vmem:[#allocation2 + $0x60] sm:$0xff] }
  0xcd   :  { %v1654_v57 = vld [vmem:[#allocation2 + $0x70] sm:$0xff] }
  0xce   :  { %1863 = vmatmul.mubr.bf16.gmra.mrb[20].mxu0 %v1650_v53 }
  0xcf   :  { %1870 = vmatprep.mubr.bf16.mxu0 %v1653_v54 }
  0xd6   :  { %1871 = vmatmul.mubr.bf16.gmra.mrb[24].mxu0 %v1652_v55 }
  0xd7   :  { %1878 = vmatprep.mubr.bf16.mxu0 %v1655_v56 }
  0xde   :  { %1879 = vmatmul.mubr.bf16.gmra.mrb[28].mxu0 %v1654_v57 }
 0x158   :  { %v5674_v59 = vpop.f32.mrb[0].mxu0 }
 0x159   :  { %v5675_v49 = vpop.f32.mrb[1].mxu0 }
 0x15a   :  { %v5676_v58 = vadd.f32 %v5675_v49, %v5674_v59  ;;  %v5677_v61 = vpop.f32.mrb[2].mxu0 }
 0x15b   :  { %v5678_v1 = vpop.f32.mrb[3].mxu0 }
 0x15c   :  { %v1825_v2 = vadd.f32 %v5676_v58, %v6593_v60  ;;  %v5679_v38 = vadd.f32 %v5678_v1, %v5677_v61 }
 0x15e   :  { %v1828_v3 = vadd.f32 %v5679_v38, %v6593_v60  ;;  %v1887_v7 = vmax.f32 %v1825_v2, 0.0 }
 0x160   :  { %v1888_v8 = vmax.f32 %v1828_v3, 0.0  ;;  %v5680_v9 = vpop.f32.mrb[4].mxu0 }
 0x161   :  { %v5681_v11 = vpop.f32.mrb[5].mxu0 }
 0x162   :  { %v1903_v12 = vpack.c.bf16 %v1888_v8, %v1887_v7  ;;  %v5454_v13 = vpack.c.bf16 %v1888_v8, %v1888_v8  ;;  %v5682_v15 = vadd.f32 %v5681_v11, %v5680_v9  ;;  %v5683_v16 = vpop.f32.mrb[6].mxu0 }
 0x163   :  { %v5684_v19 = vpop.f32.mrb[7].mxu0 }
 0x164   :  { %v1920_v20 = vrot.slane %v1903_v12, %v6226_v10  ;;  %v1927_v21 = vrot.slane %v5454_v13, %v6226_v10  ;;  %v5685_v22 = vadd.f32 %v5684_v19, %v5683_v16  ;;  %v1833_v24 = vadd.f32 %v5682_v15, %v6593_v60 }
 0x166   :  { %v1928_v25 = vcombine.high %v1920_v20, %v1920_v20  ;;  %v1929_v26 = vcombine.high %v1927_v21, %v1927_v21  ;;  %v6604_v27 = vrot.slane %v1920_v20, %v6598_v14  ;;  %v6607_v28 = vrot.slane %v1927_v21, %v6598_v14 }
 0x167   :  { %v1836_v30 = vadd.f32 %v5685_v22, %v6593_v60  ;;  %v1889_v34 = vmax.f32 %v1833_v24, 0.0 }
 0x168   :  { %v6612_v31 = vcombine.high %v6604_v27, %v6604_v27  ;;  %v6615_v32 = vrot.slane %v1928_v25, %v6598_v14  ;;  %v6619_v63 = vcombine.high %v6607_v28, %v6607_v28  ;;  %v2104_v5 = vunpack.i.h.s16 %v6604_v27 }
 0x169   :  { %v6623_v33 = vrot.slane %v1929_v26, %v6598_v14  ;;  %v1890_v35 = vmax.f32 %v1836_v30, 0.0  ;;  %v2110_v36 = vunpack.i.h.s16 %v6607_v28 }
 0x16a   :  { %v6628_v37 = vcombine.high %v6615_v32, %v6615_v32  ;;  %v2107_v39 = vunpack.i.h.s16 %v6615_v32  ;;  %v2351_v40 = vunpack.i.h.s16 %v6612_v31  ;;  %v5474_v41 = vpack.i.b16 %v6612_v31, %v2104_v5 }
 0x16b   :  { %v6638_v23 = vcombine.high %v6623_v33, %v6623_v33  ;;  %v1904_v44 = vpack.c.bf16 %v1890_v35, %v1889_v34  ;;  %v5455_v43 = vpack.c.bf16 %v1890_v35, %v1890_v35  ;;  %v6641_v46 = vpack.i.b16 %v6619_v63, %v2110_v36 }
 0x16c   :  { %v2358_v45 = vpack.i.b16 %v2107_v39, %v2351_v40  ;;  %v2366_v47 = vcombine.low %v5474_v41, %v6628_v37  ;;  %v6645_v48 = vpack.i.b16 %v6628_v37, %v2107_v39  ;;  %v2352_v52 = vunpack.i.h.s16 %v6628_v37 }
 0x16d   :  { %v1937_v50 = vrot.slane %v1904_v44, %v6226_v10  ;;  %v1944_v51 = vrot.slane %v5455_v43, %v6226_v10  ;;  %v3020_v53 = vunpack.i.h.s16 %v6623_v33  ;;  %v2353_v55 = vunpack.i.h.s16 %v6619_v63 }
 0x16e   :  { %v2367_v54 = vcombine.low %v2358_v45, %v6641_v46  ;;  %v3212_v56 = vcombine.low %v6645_v48, %v6619_v63  ;;  %v2374_v61 = vrot.slane %v2366_v47, %v6634_v42  ;;  %v3205_v0 = vpack.i.b16 %v2110_v36, %v2352_v52 }
 0x16f   :  { %v1945_v57 = vcombine.high %v1937_v50, %v1937_v50  ;;  %v1946_v59 = vcombine.high %v1944_v51, %v1944_v51  ;;  %v2085_v49 = vrot.slane %v1937_v50, %v6598_v14  ;;  %v6657_v58 = vrot.slane %v1944_v51, %v6598_v14 }
 0x170   :  { %v2381_v62 = vrot.slane %v2367_v54, %v6634_v42  ;;  %v5506_v1 = vpack.i.b16 %v6638_v23, %v3020_v53  ;;  %v3203_v11 = vunpack.i.h.s16 %v6638_v23  ;;  %v6682_v19 = vrot.slane %v3212_v56, %v6634_v42 }
 0x171   :  { %v6663_v2 = vrot.slane %v1945_v57, %v6598_v14  ;;  %v2113_v38 = vunpack.i.h.s16 %v2085_v49  ;;  %v5464_v3 = vpack.i.b16 %v2085_v49, %v6619_v63  ;;  %v6667_v6 = vrot.slane %v1946_v59, %v6598_v14 }
 0x172   :  { %v2382_v7 = vcombine.low %v2374_v61, %v2381_v62  ;;  %v6671_v8 = vcombine.high %v6657_v58, %v6657_v58  ;;  %v2119_v9 = vunpack.i.h.s16 %v6657_v58  ;;  %v3213_v16 = vcombine.low %v3205_v0, %v5506_v1 }
 0x173   :  { %v2094_v12 = vcombine.high %v6663_v2, %v6663_v2  ;;  %v2116_v13 = vunpack.i.h.s16 %v6663_v2  ;;  %v2361_v15 = vpack.i.b16 %v2113_v38, %v2353_v55  ;;  %v3023_v25 = vunpack.i.h.s16 %v6667_v6 }
 0x174   :  { %v2389_v17 = vrot.slane %v2382_v7, %v6634_v42  ;;  %v2420_v18 = vrot.slane %v6671_v8, %v6634_v42  ;;  %v2356_v20 = vunpack.i.h.s16 %v6671_v8  ;;  %v6688_v24 = vrot.slane %v3213_v16, %v6634_v42 }
 0x175   :  { %v2355_v21 = vunpack.i.h.s16 %v2094_v12  ;;  %v6685_v22 = vpack.i.b16 %v2094_v12, %v2116_v13  ;;  %v2086_v29 = vcombine.high %v2085_v49, %v2085_v49  ;;  %v5467_v30 = vpack.i.b16 %v6671_v8, %v2119_v9 }
 0x176   :  { %2428 = vrot.lane.b32.xlu0 %v2389_v17, %s6164_s17  ;;  %v3208_v63 = vpack.i.b16 %v2116_v13, %v3203_v11  ;;  %v5462_v5 = vpack.i.b16 %v6615_v32, %v6612_v31  ;;  %v3210_v40 = vpack.i.b16 %v3023_v25, %v2356_v20  ;;  %v2427_v43 = vrot.slane %v2420_v18, %v6634_v42 }
 0x177   :  { %v2364_v35 = vpack.i.b16 %v2119_v9, %v2355_v21  ;;  %v2390_v36 = vcombine.low %v2361_v15, %v6685_v22  ;;  %v2130_v62 = vcombine.low %v6604_v27, %v6645_v48  ;;  %v5465_v0 = vpack.i.b16 %v2086_v29, %v2113_v38 }
 0x178   :  { %v3236_v45 = vcombine.low %v3208_v63, %v5467_v30  ;;  %v2131_v47 = vcombine.low %v5462_v5, %v6607_v28  ;;  %v3237_v31 = vcombine.low %v2094_v12, %v3210_v40  ;;  %v5466_v9 = vpack.i.b16 %v6657_v58, %v2094_v12 }
 0x179   :  { %v2391_v51 = vcombine.low %v2086_v29, %v2364_v35  ;;  %v2398_v55 = vrot.slane %v2390_v36, %v6634_v42  ;;  %v2154_v11 = vcombine.low %v5464_v3, %v6663_v2  ;;  %v2138_v15 = vrot.slane %v2130_v62, %v6634_v42 }
 0x17a   :  { %v5686_v26 = vpop.f32.mrb[8].mxu0  ;;  %2432 = vrot.lane.b32.xlu0 %v2427_v43, %s6164_s17  ;;  %v6705_v54 = vrot.slane %v3236_v45, %v6634_v42  ;;  %v6710_v57 = vrot.slane %v3237_v31, %v6634_v42  ;;  %v2145_v59 = vrot.slane %v2131_v47, %v6634_v42  ;;  %v2184_v16 = vrot.slane %v5467_v30, %v6634_v42 }
 0x17b   :  { %v5687_v34 = vpop.f32.mrb[9].mxu0  ;;  %v2405_v56 = vrot.slane %v2391_v51, %v6634_v42  ;;  %v5498_v17 = vpack.i.b16 %v6607_v28, %v6628_v37  ;;  %v2155_v27 = vcombine.low %v5465_v0, %v5466_v9  ;;  %v2162_v48 = vrot.slane %v2154_v11, %v6634_v42 }
 0x17c   :  { %v5688_v41 = vadd.f32 %v5687_v34, %v5686_v26  ;;  %v5689_v44 = vpop.f32.mrb[10].mxu0  ;;  %7756 = vst [vmem:[#allocation10_spill] sm:$0xff] %v6705_v54  ;;  %7757 = vst [vmem:[#allocation11_spill] sm:$0xff] %v6710_v57  ;;  %v2146_v21 = vcombine.low %v2138_v15, %v2145_v59  ;;  %v2191_v12 = vrot.slane %v2184_v16, %v6634_v42 }
 0x17d   :  { %v5690_v50 = vpop.f32.mrb[11].mxu0  ;;  %v2406_v1 = vcombine.low %v2398_v55, %v2405_v56  ;;  %v2169_v3 = vrot.slane %v2155_v27, %v6634_v42  ;;  %v3032_v26 = vcombine.low %v6615_v32, %v6641_v46  ;;  %v3033_v28 = vcombine.low %v5498_v17, %v6623_v33 }
 0x17e   :  { %v1841_v52 = vadd.f32 %v5688_v41, %v6593_v60  ;;  %v5691_v53 = vadd.f32 %v5690_v50, %v5689_v44  ;;  %v5500_v37 = vpack.i.b16 %v6667_v6, %v6671_v8  ;;  %v2153_v63 = vrot.slane %v2146_v21, %v6634_v42  ;;  %2199 = vst.msk [vmem:[#allocation3 + $0x20] sm:$0x1] %vm2198_vm10, %v2191_v12 }
 0x17f   :  { %v2413_v18 = vrot.slane %v2406_v1, %v6634_v42  ;;  %v5499_v5 = vpack.i.b16 %v6663_v2, %v6638_v23  ;;  %v2170_v34 = vcombine.low %v2162_v48, %v2169_v3  ;;  %v3040_v35 = vrot.slane %v3032_v26, %v6634_v42 }
 0x180   :  { %v1891_v49 = vmax.f32 %v1841_v52, 0.0  ;;  %v1844_v61 = vadd.f32 %v5691_v53, %v6593_v60  ;;  %v3047_v32 = vrot.slane %v3033_v28, %v6634_v42  ;;  %v6743_v33 = vcombine.low %v6685_v22, %v5500_v37  ;;  %2196 = vst.msk [vmem:[#allocation3] sm:$0xf] %vm2195_vm9, %v2153_v63 }
 0x181   :  { %2430 = vrot.lane.b32.xlu1 %v2413_v18, %s6164_s17  ;;  %v2177_v41 = vrot.slane %v2170_v34, %v6634_v42  ;;  %v3056_v23 = vcombine.low %v5499_v5, %v6657_v58  ;;  %v6760_v59 = vcombine.high %v6667_v6, %v6667_v6 }
 0x182   :  { %v1892_v13 = vmax.f32 %v1844_v61, 0.0  ;;  %v3048_v44 = vcombine.low %v3040_v35, %v3047_v32  ;;  %v3071_v34 = vrot.slane %v6743_v33, %v6634_v42 }
 0x183   :  { %2197 = vst.msk [vmem:[#allocation3 + $0x10] sm:$0xf] %vm2195_vm9, %v2177_v41 }
 0x184   :  { %v1905_v38 = vpack.c.bf16 %v1892_v13, %v1891_v49  ;;  %v5456_v20 = vpack.c.bf16 %v1892_v13, %v1892_v13  ;;  %v3055_v5 = vrot.slane %v3048_v44, %v6634_v42  ;;  %v3064_v44 = vrot.slane %v3056_v23, %v6634_v42 }
 0x186   :  { %v1956_v29 = vrot.slane %v1905_v38, %v6226_v10  ;;  %v1963_v30 = vrot.slane %v5456_v20, %v6226_v10  ;;  %3097 = vst.msk [vmem:[#allocation3 + $0x8] sm:$0xf] %vm2195_vm9, %v3055_v5 }
 0x188   :  { %v1964_v46 = vcombine.high %v1956_v29, %v1956_v29  ;;  %v1965_v8 = vcombine.high %v1963_v30, %v1963_v30  ;;  %v2206_v36 = vrot.slane %v1956_v29, %v6598_v14  ;;  %v2222_v40 = vrot.slane %v1963_v30, %v6598_v14 }
 0x18a   :  { %v2207_v2 = vcombine.high %v2206_v36, %v2206_v36  ;;  %v2214_v43 = vrot.slane %v1964_v46, %v6598_v14  ;;  %v6751_v45 = vcombine.high %v2222_v40, %v2222_v40  ;;  %v2249_v22 = vunpack.i.h.s16 %v2206_v36 }
 0x18b   :  { %v3106_v47 = vrot.slane %v1965_v8, %v6598_v14  ;;  %v2255_v50 = vunpack.i.h.s16 %v2222_v40 }
 0x18c   :  { %v2215_v51 = vcombine.high %v2214_v43, %v2214_v43  ;;  %v2252_v31 = vunpack.i.h.s16 %v2214_v43  ;;  %v5468_v52 = vpack.i.b16 %v2214_v43, %v2207_v2  ;;  %v2442_v53 = vunpack.i.h.s16 %v2207_v2 }
 0x18d   :  { %v6755_v55 = vcombine.high %v3106_v47, %v3106_v47  ;;  %v5477_v56 = vpack.i.b16 %v2207_v2, %v2249_v22  ;;  %v5478_v58 = vpack.i.b16 %v6751_v45, %v2255_v50  ;;  %v3117_v13 = vunpack.i.h.s16 %v3106_v47 }
 0x18e   :  { %v5469_v49 = vpack.i.b16 %v2215_v51, %v2252_v31  ;;  %v2276_v61 = vcombine.low %v5468_v52, %v2222_v40  ;;  %v2449_v62 = vpack.i.b16 %v2252_v31, %v2442_v53  ;;  %v5502_v0 = vpack.i.b16 %v2222_v40, %v2215_v51 }
 0x18f   :  { %v2457_v1 = vcombine.low %v5477_v56, %v2215_v51  ;;  %v3129_v9 = vcombine.low %v2214_v43, %v5478_v58  ;;  %v2443_v11 = vunpack.i.h.s16 %v2215_v51  ;;  %v5507_v21 = vpack.i.b16 %v6755_v55, %v3117_v13 }
 0x190   :  { %v2275_v15 = vcombine.low %v2206_v36, %v5469_v49  ;;  %v2290_v16 = vrot.slane %v2276_v61, %v6634_v42  ;;  %v2458_v17 = vcombine.low %v2449_v62, %v5478_v58  ;;  %v3130_v18 = vcombine.low %v5502_v0, %v3106_v47 }
 0x191   :  { %v5692_v27 = vpop.f32.mrb[12].mxu0  ;;  %v2465_v48 = vrot.slane %v2457_v1, %v6634_v42  ;;  %v3137_v38 = vrot.slane %v3129_v9, %v6634_v42  ;;  %v3288_v20 = vpack.i.b16 %v2255_v50, %v2443_v11  ;;  %v3295_v37 = vcombine.low %v5469_v49, %v6751_v45 }
 0x192   :  { %v5693_v12 = vpop.f32.mrb[13].mxu0  ;;  %v2283_v3 = vrot.slane %v2275_v15, %v6634_v42  ;;  %v2472_v26 = vrot.slane %v2458_v17, %v6634_v42  ;;  %v3144_v28 = vrot.slane %v3130_v18, %v6634_v42  ;;  %v5501_v43 = vpack.i.b16 %v6760_v59, %v3023_v25 }
 0x193   :  { %v5694_v29 = vadd.f32 %v5693_v12, %v5692_v27  ;;  %v5695_v30 = vpop.f32.mrb[14].mxu0  ;;  %v3296_v63 = vcombine.low %v3288_v20, %v5507_v21  ;;  %v6776_v36 = vrot.slane %v3295_v37, %v6634_v42  ;;  %v3072_v50 = vcombine.low %v3064_v44, %v3071_v34 }
 0x194   :  { %v5696_v35 = vpop.f32.mrb[15].mxu0  ;;  %v2291_v32 = vcombine.low %v2283_v3, %v2290_v16  ;;  %v2473_v46 = vcombine.low %v2465_v48, %v2472_v26  ;;  %v6773_v8 = vcombine.low %v3137_v38, %v3144_v28  ;;  %v3086_v51 = vrot.slane %v5501_v43, %v6634_v42 }
 0x195   :  { %7758 = vst [vmem:[#allocation12_spill] sm:$0xff] %v6776_v36  ;;  %v1849_v40 = vadd.f32 %v5694_v29, %v6593_v60  ;;  %v5697_v41 = vadd.f32 %v5696_v35, %v5695_v30  ;;  %v6780_v2 = vrot.slane %v3296_v63, %v6634_v42  ;;  %v3079_v53 = vrot.slane %v3072_v50, %v6634_v42 }
 0x196   :  { %v2298_v33 = vrot.slane %v2291_v32, %v6634_v42  ;;  %v2480_v6 = vrot.slane %v2473_v46, %v6634_v42  ;;  %v3093_v25 = vrot.slane %v3086_v51, %v6634_v42  ;;  %v2444_v27 = vunpack.i.h.s16 %v6751_v45 }
 0x197   :  { %7759 = vst [vmem:[#allocation13_spill] sm:$0xff] %v6780_v2  ;;  %v1852_v22 = vadd.f32 %v5697_v41, %v6593_v60  ;;  %v1893_v31 = vmax.f32 %v1849_v40, 0.0  ;;  %3098 = vst.msk [vmem:[#allocation3 + $0x18] sm:$0xf] %vm2195_vm9, %v3079_v53 }
 0x198   :  { %2337 = vrot.lane.b32.xlu0 %v2298_v33, %s6167_s21  ;;  %3099 = vst.msk [vmem:[#allocation3 + $0x28] sm:$0x1] %vm2198_vm10, %v3093_v25 }
 0x199   :  { %v1894_v52 = vmax.f32 %v1852_v22, 0.0  ;;  %v5698_v23 = vpop.f32.mrb[16].mxu0 }
 0x19a   :  { %v5699_v56 = vpop.f32.mrb[17].mxu0 }
 0x19b   :  { %v1906_v58 = vpack.c.bf16 %v1894_v52, %v1893_v31  ;;  %v5457_v49 = vpack.c.bf16 %v1894_v52, %v1894_v52  ;;  %v5700_v61 = vadd.f32 %v5699_v56, %v5698_v23  ;;  %v5701_v62 = vpop.f32.mrb[18].mxu0 }
 0x19c   :  { %v5702_v0 = vpop.f32.mrb[19].mxu0  ;;  %2519 = vrot.lane.b32.xlu0 %v2480_v6, %s6168_s22 }
 0x19d   :  { %v1973_v1 = vrot.slane %v1906_v58, %v6226_v10  ;;  %v1980_v9 = vrot.slane %v5457_v49, %v6226_v10  ;;  %v1857_v11 = vadd.f32 %v5700_v61, %v6593_v60  ;;  %v5703_v13 = vadd.f32 %v5702_v0, %v5701_v62 }
 0x19f   :  { %v1981_v15 = vcombine.high %v1973_v1, %v1973_v1  ;;  %v2230_v16 = vrot.slane %v1973_v1, %v6598_v14  ;;  %v6804_v17 = vrot.slane %v1980_v9, %v6598_v14  ;;  %v1860_v18 = vadd.f32 %v5703_v13, %v6593_v60 }
 0x1a0   :  { %v1895_v12 = vmax.f32 %v1857_v11, 0.0  ;;  %v1982_v63 = vcombine.high %v1980_v9, %v1980_v9 }
 0x1a1   :  { %v6809_v38 = vcombine.high %v2230_v16, %v2230_v16  ;;  %v6812_v20 = vrot.slane %v1981_v15, %v6598_v14  ;;  %v2258_v21 = vunpack.i.h.s16 %v2230_v16  ;;  %v5704_v3 = vpop.f32.mrb[20].mxu0  ;;  %v1896_v26 = vmax.f32 %v1860_v18, 0.0 }
 0x1a2   :  { %v5705_v28 = vpop.f32.mrb[21].mxu0  ;;  %v5470_v37 = vpack.i.b16 %v2230_v16, %v6751_v45  ;;  %v6817_v29 = vcombine.high %v6804_v17, %v6804_v17  ;;  %v2264_v30 = vunpack.i.h.s16 %v6804_v17  ;;  %v6853_v15 = vrot.slane %v1982_v63, %v6598_v14 }
 0x1a3   :  { %v6822_v5 = vcombine.high %v6812_v20, %v6812_v20  ;;  %v5706_v34 = vadd.f32 %v5705_v28, %v5704_v3  ;;  %v5707_v35 = vpop.f32.mrb[22].mxu0  ;;  %v5471_v32 = vpack.i.b16 %v6809_v38, %v2258_v21  ;;  %v1907_v46 = vpack.c.bf16 %v1896_v26, %v1895_v12 }
 0x1a4   :  { %v5458_v40 = vpack.c.bf16 %v1896_v26, %v1896_v26  ;;  %v5708_v41 = vpop.f32.mrb[23].mxu0  ;;  %v2299_v45 = vcombine.low %v5470_v37, %v6812_v20  ;;  %v6827_v44 = vpack.i.b16 %v6817_v29, %v2264_v30  ;;  %v7727_v50 = vunpack.i.h.s16 %v6812_v20 }
 0x1a5   :  { %v1865_v33 = vadd.f32 %v5706_v34, %v6593_v60  ;;  %v5709_v43 = vadd.f32 %v5708_v41, %v5707_v35  ;;  %v5472_v22 = vpack.i.b16 %v6804_v17, %v6822_v5  ;;  %v1992_v51 = vrot.slane %v1907_v46, %v6226_v10 }
 0x1a6   :  { %v1999_v31 = vrot.slane %v5458_v40, %v6226_v10  ;;  %v2329_v52 = vrot.slane %v6827_v44, %v6634_v42  ;;  %v2446_v23 = vunpack.i.h.s16 %v6822_v5  ;;  %v2452_v25 = vpack.i.b16 %v2258_v21, %v2444_v27 }
 0x1a7   :  { %v1897_v53 = vmax.f32 %v1865_v33, 0.0  ;;  %v1868_v56 = vadd.f32 %v5709_v43, %v6593_v60  ;;  %v2300_v6 = vcombine.low %v5471_v32, %v5472_v22  ;;  %v2000_v58 = vcombine.high %v1992_v51, %v1992_v51 }
 0x1a8   :  { %v2001_v49 = vcombine.high %v1999_v31, %v1999_v31  ;;  %v6840_v61 = vrot.slane %v1992_v51, %v6598_v14  ;;  %v6843_v62 = vrot.slane %v1999_v31, %v6598_v14  ;;  %v2336_v11 = vrot.slane %v2329_v52, %v6634_v42 }
 0x1a9   :  { %v1898_v0 = vmax.f32 %v1868_v56, 0.0  ;;  %v5710_v1 = vpop.f32.mrb[24].mxu0  ;;  %v2314_v9 = vrot.slane %v2300_v6, %v6634_v42  ;;  %v6850_v13 = vpack.i.b16 %v6822_v5, %v7727_v50  ;;  %v6860_v18 = vrot.slane %v2000_v58, %v6598_v14 }
 0x1aa   :  { %7760 = vst [vmem:[#allocation14_spill] sm:$0xff] %v6840_v61  ;;  %v6857_v16 = vcombine.high %v6840_v61, %v6840_v61  ;;  %v5711_v27 = vpop.f32.mrb[25].mxu0  ;;  %v2307_v21 = vrot.slane %v2299_v45, %v6634_v42  ;;  %v6864_v12 = vrot.slane %v2001_v49, %v6598_v14  ;;  %2341 = vrot.lane.b32.xlu0 %v2336_v11, %s6167_s21  ;;  %v2582_v40 = vunpack.i.h.s16 %v6840_v61  ;;  %v5957_v11 = vld [vmem:[%s7722_s2 + $0x40] sm:$0xff]  }
 0x1ab   :  { %v1908_v3 = vpack.c.bf16 %v1898_v0, %v1897_v53  ;;  %v5459_v26 = vpack.c.bf16 %v1898_v0, %v1898_v0  ;;  %v5712_v28 = vadd.f32 %v5711_v27, %v5710_v1  ;;  %v5713_v37 = vpop.f32.mrb[26].mxu0  ;;  %v6869_v63 = vcombine.high %v6843_v62, %v6843_v62  ;;  %v5958_v27 = vld [vmem:[%s7722_s2] sm:$0xff]   ;;  %5722 = vmatprep.subr.bf16.mxu1 %v5957_v11 }
 0x1ac   :  { %7761 = vst [vmem:[#allocation15_spill] sm:$0xff] %v6857_v16  ;;  %v5714_v34 = vpop.f32.mrb[27].mxu0  ;;  %v2315_v35 = vcombine.low %v2307_v21, %v2314_v9  ;;  %v2455_v32 = vpack.i.b16 %v2264_v30, %v2446_v23  ;;  %v2481_v46 = vcombine.low %v2452_v25, %v6850_v13  ;;  %v6880_v31 = vcombine.high %v6860_v18, %v6860_v18 }
 0x1ad   :  { %v2009_v41 = vrot.slane %v1908_v3, %v6226_v10  ;;  %v2016_v45 = vrot.slane %v5459_v26, %v6226_v10  ;;  %v1873_v33 = vadd.f32 %v5712_v28, %v6593_v60  ;;  %v5715_v43 = vadd.f32 %v5714_v34, %v5713_v37  ;;  %5723 = vmatpush3.bf16.msra.mxu1 %v5958_v27 }
 0x1ae   :  { %v2322_v22 = vrot.slane %v2315_v35, %v6634_v42  ;;  %v2482_v51 = vcombine.low %v6809_v38, %v2455_v32  ;;  %v6884_v30 = vcombine.high %v6864_v12, %v6864_v12  ;;  %v2489_v38 = vrot.slane %v2481_v46, %v6634_v42 }
 0x1af   :  { %v2017_v52 = vcombine.high %v2009_v41, %v2009_v41  ;;  %v6887_v23 = vrot.slane %v2009_v41, %v6598_v14  ;;  %v6890_v53 = vrot.slane %v2016_v45, %v6598_v14  ;;  %v2018_v56 = vcombine.high %v2016_v45, %v2016_v45 }
 0x1b0   :  { %v1876_v6 = vadd.f32 %v5715_v43, %v6593_v60  ;;  %2339 = vrot.lane.b32.xlu1 %v2322_v22, %s6167_s21  ;;  %v2496_v25 = vrot.slane %v2482_v51, %v6634_v42  ;;  %v1899_v0 = vmax.f32 %v1873_v33, 0.0  ;;  %v7732_v9 = vunpack.i.h.s16 %v6860_v18 }
 0x1b1   :  { %7762 = vst [vmem:[#allocation16_spill] sm:$0xff] %v6887_v23  ;;  %v6897_v58 = vrot.slane %v2017_v52, %v6598_v14  ;;  %v5716_v1 = vpop.f32.mrb[28].mxu0  ;;  %v6910_v28 = vcombine.high %v6890_v53, %v6890_v53  ;;  %v7731_v37 = vunpack.i.h.s16 %v6843_v62  ;;  %v7728_v34 = vunpack.i.h.s16 %v6887_v23 }
 0x1b2   :  { %v1900_v21 = vmax.f32 %v1876_v6, 0.0  ;;  %v5717_v3 = vpop.f32.mrb[29].mxu0  ;;  %v2497_v26 = vcombine.low %v2489_v38, %v2496_v25  ;;  %v2825_v46 = vunpack.i.h.s16 %v6857_v16  ;;  %v5492_v41 = vpack.i.b16 %v6857_v16, %v2582_v40  ;;  %v5968_v16 = vld [vmem:[%s7722_s2 + $0x28] sm:$0xff]  }
 0x1b3   :  { %v5718_v35 = vadd.f32 %v5717_v3, %v5716_v1  ;;  %v5719_v32 = vpop.f32.mrb[30].mxu0  ;;  %v2894_v51 = vrot.slane %v6910_v28, %v6634_v42  ;;  %v6925_v40 = vpack.i.b16 %v6869_v63, %v7731_v37  ;;  %v6934_v27 = vcombine.high %v6897_v58, %v6897_v58 }
 0x1b4   :  { %v1909_v45 = vpack.c.bf16 %v1900_v21, %v1899_v0  ;;  %v5460_v33 = vpack.c.bf16 %v1900_v21, %v1900_v21  ;;  %v2504_v43 = vrot.slane %v2497_v26, %v6634_v42  ;;  %v5720_v22 = vpop.f32.mrb[31].mxu0  ;;  %v2832_v38 = vpack.i.b16 %v7732_v9, %v2825_v46 }
 0x1b5   :  { %v1881_v52 = vadd.f32 %v5718_v35, %v6593_v60  ;;  %v5721_v6 = vadd.f32 %v5720_v22, %v5719_v32  ;;  %7763 = vst [vmem:[#allocation17_spill] sm:$0xff] %v6925_v40  ;;  %v2901_v1 = vrot.slane %v2894_v51, %v6634_v42  ;;  %v2840_v11 = vcombine.low %v5492_v41, %v6880_v31 }
 0x1b6   :  { %v2028_v25 = vrot.slane %v1909_v45, %v6226_v10  ;;  %v2035_v0 = vrot.slane %v5460_v33, %v6226_v10  ;;  %2521 = vrot.lane.b32.xlu1 %v2504_v43, %s6168_s22  ;;  %v6937_v21 = vrot.slane %v2018_v56, %v6598_v14  ;;  %v2841_v26 = vcombine.low %v2832_v38, %v6925_v40  ;;  %v5960_v38 = vld [vmem:[%s7722_s2 + $0x8] sm:$0xff]  }
 0x1b7   :  { %v1884_v3 = vadd.f32 %v5721_v6, %v6593_v60  ;;  %v1901_v45 = vmax.f32 %v1881_v52, 0.0  ;;  %v2848_v33 = vrot.slane %v2840_v11, %v6634_v42  ;;  %v6951_v56 = vcombine.high %v6887_v23, %v6887_v23  ;;  %v5959_v6 = vld [vmem:[%s7722_s2 + $0x48] sm:$0xff]  }
 0x1b8   :  { %v2036_v35 = vcombine.high %v2028_v25, %v2028_v25  ;;  %v6942_v32 = vrot.slane %v2028_v25, %v6598_v14  ;;  %v6945_v46 = vrot.slane %v2035_v0, %v6598_v14  ;;  %v2855_v43 = vrot.slane %v2841_v26, %v6634_v42  ;;  %v5961_v25 = vld [vmem:[%s7722_s2 + $0x50] sm:$0xff]   ;;  %5724 = vmatprep.subr.bf16.mxu1 %v5959_v6 }
 0x1b9   :  { %v1902_v41 = vmax.f32 %v1884_v3, 0.0  ;;  %7764 = vst [vmem:[#allocation18_spill] sm:$0xff] %v6951_v56  ;;  %v2037_v60 = vcombine.high %v2035_v0, %v2035_v0  ;;  %v7729_v52 = vunpack.i.h.s16 %v6897_v58  ;;  %v2827_v49 = vunpack.i.h.s16 %v6869_v63  ;;  %5725 = vmatpush3.bf16.msra.mxu1 %v5960_v38 }
 0x1ba   :  { %v6955_v22 = vcombine.high %v6942_v32, %v6942_v32  ;;  %v6958_v51 = vrot.slane %v2036_v35, %v6598_v14  ;;  %2906 = vrot.lane.b32.xlu1 %v2901_v1, %s6164_s17  ;;  %v6973_v0 = vcombine.high %v6945_v46, %v6945_v46  ;;  %v2856_v3 = vcombine.low %v2848_v33, %v2855_v43 }
 0x1bb   :  { %v1910_v11 = vpack.c.bf16 %v1902_v41, %v1901_v45  ;;  %v5461_v1 = vpack.c.bf16 %v1902_v41, %v1902_v41  ;;  %v7730_v35 = vunpack.i.h.s16 %v6890_v53  ;;  %v2829_v47 = vunpack.i.h.s16 %v6934_v27  ;;  %v5962_v41 = vld [vmem:[%s7722_s2 + $0x10] sm:$0xff]   ;;  %5726 = vmatprep.subr.bf16.mxu1 %v5961_v25 }
 0x1bc   :  { %v6977_v26 = vcombine.high %v6958_v51, %v6958_v51  ;;  %v2725_v7 = vunpack.i.h.s16 %v6942_v32  ;;  %v2863_v45 = vrot.slane %v2856_v3, %v6634_v42  ;;  %v2835_v33 = vpack.i.b16 %v7728_v34, %v2827_v49  ;;  %v5963_v3 = vld [vmem:[%s7722_s2 + $0x58] sm:$0xff]  }
 0x1bd   :  { %v2045_v39 = vrot.slane %v1910_v11, %v6226_v10  ;;  %v2052_v50 = vrot.slane %v5461_v1, %v6226_v10  ;;  %v6994_v43 = vpack.i.b16 %v6934_v27, %v7729_v52  ;;  %v2838_v6 = vpack.i.b16 %v7730_v35, %v2829_v47  ;;  %5727 = vmatpush3.bf16.msra.mxu1 %v5962_v41 }
 0x1be   :  { %v2728_v10 = vunpack.i.h.s16 %v6958_v51  ;;  %v7000_v38 = vrot.slane %v2037_v60, %v6598_v14  ;;  %2902 = vrot.lane.b32.xlu0 %v2863_v45, %s6164_s17  ;;  %v5486_v60 = vpack.i.b16 %v6958_v51, %v6955_v22  ;;  %5728 = vmatprep.subr.bf16.mxu1 %v5963_v3  ;;  %v2914_v4 = vunpack.i.h.s16 %v6955_v22 }
 0x1bf   :  { %7765 = vst [vmem:[#allocation19_spill] sm:$0xff] %v6994_v43  ;;  %v2053_v11 = vcombine.high %v2045_v39, %v2045_v39  ;;  %v7003_v1 = vrot.slane %v2045_v39, %v6598_v14  ;;  %v7006_v49 = vrot.slane %v2052_v50, %v6598_v14  ;;  %v2864_v47 = vcombine.low %v2835_v33, %v6994_v43  ;;  %v5964_v33 = vld [vmem:[%s7722_s2 + $0x18] sm:$0xff]  }
 0x1c0   :  { %v2865_v25 = vcombine.low %v6951_v56, %v2838_v6  ;;  %v7017_v34 = vpack.i.b16 %v6977_v26, %v2728_v10  ;;  %v2054_v39 = vcombine.high %v2052_v50, %v2052_v50  ;;  %v2752_v37 = vcombine.low %v5486_v60, %v6945_v46 }
 0x1c1   :  { %v7021_v48 = vcombine.high %v7003_v1, %v7003_v1  ;;  %v7024_v45 = vrot.slane %v2053_v11, %v6598_v14  ;;  %v2734_v52 = vunpack.i.h.s16 %v7003_v1  ;;  %v2872_v6 = vrot.slane %v2864_v47, %v6634_v42  ;;  %5729 = vmatpush3.bf16.msra.mxu1 %v5964_v33 }
 0x1c2   :  { %v2879_v35 = vrot.slane %v2865_v25, %v6634_v42  ;;  %v2751_v50 = vcombine.low %v6942_v32, %v7017_v34  ;;  %v7041_v41 = vcombine.high %v7006_v49, %v7006_v49  ;;  %v2740_v9 = vunpack.i.h.s16 %v7006_v49  ;;  %v5965_v25 = vld [vmem:[%s7722_s2 + $0x60] sm:$0xff]  }
 0x1c3   :  { %v7037_v11 = vcombine.high %v7024_v45, %v7024_v45  ;;  %v7741_v47 = vunpack.i.h.s16 %v6945_v46  ;;  %v2766_v3 = vrot.slane %v2752_v37, %v6634_v42  ;;  %v5495_v40 = vpack.i.b16 %v6955_v22, %v2725_v7  ;;  %5730 = vmatprep.subr.bf16.mxu1 %v5965_v25 }
 0x1c4   :  { %v2880_v32 = vcombine.low %v2872_v6, %v2879_v35  ;;  %v2759_v60 = vrot.slane %v2751_v50, %v6634_v42  ;;  %v7052_v43 = vpack.i.b16 %v7041_v41, %v2740_v9  ;;  %v5488_v23 = vpack.i.b16 %v7003_v1, %v6973_v0  ;;  %v5966_v35 = vld [vmem:[%s7722_s2 + $0x20] sm:$0xff]  }
 0x1c5   :  { %v5496_v56 = vpack.i.b16 %v6973_v0, %v7741_v47  ;;  %v2921_v50 = vpack.i.b16 %v2728_v10, %v2914_v4  ;;  %v5489_v61 = vpack.i.b16 %v7021_v48, %v2734_v52  ;;  %v2929_v22 = vcombine.low %v5495_v40, %v6977_v26  ;;  %v5967_v47 = vld [vmem:[%s7722_s2 + $0x68] sm:$0xff]   ;;  %5731 = vmatpush3.bf16.msra.mxu1 %v5966_v35 }
 0x1c6   :  { %v2887_v37 = vrot.slane %v2880_v32, %v6634_v42  ;;  %v2767_v6 = vcombine.low %v2759_v60, %v2766_v3  ;;  %v2805_v7 = vrot.slane %v7052_v43, %v6634_v42  ;;  %v5490_v1 = vpack.i.b16 %v7006_v49, %v7037_v11  ;;  %5732 = vmatprep.subr.bf16.mxu1 %v5967_v47 }
 0x1c7   :  { %v2775_v33 = vcombine.low %v5488_v23, %v7024_v45  ;;  %v7076_v4 = vcombine.high %v7000_v38, %v7000_v38  ;;  %v2930_v25 = vcombine.low %v2921_v50, %v5496_v56  ;;  %v7746_v40 = vunpack.i.h.s16 %v7024_v45 }
 0x1c8   :  { %2904 = vrot.lane.b32.xlu1 %v2887_v37, %s6164_s17  ;;  %v2774_v10 = vrot.slane %v2767_v6, %v6634_v42  ;;  %v7082_v32 = vrot.slane %v2054_v39, %v6598_v14  ;;  %v2812_v23 = vrot.slane %v2805_v7, %v6634_v42  ;;  %v2776_v60 = vcombine.low %v5489_v61, %v5490_v1 }
 0x1c9   :  { %v2511_v3 = vrot.slane %v6817_v29, %v6634_v42  ;;  %v2937_v37 = vrot.slane %v2929_v22, %v6634_v42  ;;  %v2944_v6 = vrot.slane %v2930_v25, %v6634_v42  ;;  %v2916_v39 = vunpack.i.h.s16 %v6973_v0  ;;  %v5969_v22 = vld [vmem:[%s7722_s2 + $0x70] sm:$0xff]   ;;  %5733 = vmatpush3.bf16.msra.mxu1 %v5968_v16 }
 0x1ca   :  { %2813 = vrot.lane.b32.xlu0 %v2774_v10, %s6167_s21  ;;  %v2918_v50 = vunpack.i.h.s16 %v7037_v11  ;;  %v2783_v61 = vrot.slane %v2775_v33, %v6634_v42  ;;  %v2790_v7 = vrot.slane %v2776_v60, %v6634_v42  ;;  %v5497_v35 = vpack.i.b16 %v7037_v11, %v7746_v40  ;;  %5734 = vmatprep.subr.bf16.mxu1 %v5969_v22 }
 0x1cb   :  { %v5512_v1 = vpack.i.b16 %v6945_v46, %v6977_v26  ;;  %v2945_v10 = vcombine.low %v2937_v37, %v2944_v6  ;;  %v2924_v25 = vpack.i.b16 %v2734_v52, %v2916_v39  ;;  %v3495_v33 = vcombine.low %v6958_v51, %v5496_v56 }
 0x1cc   :  { %2817 = vrot.lane.b32.xlu1 %v2812_v23, %s6167_s21  ;;  %v2927_v47 = vpack.i.b16 %v2740_v9, %v2918_v50  ;;  %v2791_v14 = vcombine.low %v2783_v61, %v2790_v7  ;;  %v2518_v60 = vrot.slane %v2511_v3, %v6634_v42  ;;  %v5503_v40 = vpack.i.b16 %v6812_v20, %v6755_v55  ;;  %v5970_v9 = vld [vmem:[%s7722_s2 + $0x30] sm:$0xff]   ;;  %v5972_v7 = vld [vmem:[%s7722_s2 + $0x38] sm:$0xff]  }
 0x1cd   :  { %v3496_v2 = vcombine.low %v5512_v1, %v7000_v38  ;;  %v2952_v36 = vrot.slane %v2945_v10, %v6634_v42  ;;  %v2953_v57 = vcombine.low %v2924_v25, %v5497_v35  ;;  %v3503_v23 = vrot.slane %v3495_v33, %v6634_v42  ;;  %5735 = vmatpush3.bf16.msra.mxu1 %v5970_v9 }
 0x1ce   :  { %v2954_v54 = vcombine.low %v7021_v48, %v2927_v47  ;;  %v2798_v56 = vrot.slane %v2791_v14, %v6634_v42  ;;  %v5504_v52 = vpack.i.b16 %v6853_v15, %v6817_v29  ;;  %v3153_v16 = vcombine.low %v5503_v40, %v6804_v17  ;;  %v5971_v48 = vld [vmem:[%s7722_s2 + $0x78] sm:$0xff]  }
 0x1cf   :  { %v3510_v51 = vrot.slane %v3496_v2, %v6634_v42  ;;  %2991 = vrot.lane.b32.xlu0 %v2952_v36, %s6168_s22  ;;  %v2961_v3 = vrot.slane %v2953_v57, %v6634_v42  ;;  %v5513_v14 = vpack.i.b16 %v7024_v45, %v7076_v4  ;;  %v5514_v2 = vpack.i.b16 %v7082_v32, %v7041_v41 }
 0x1d0   :  { %v2968_v37 = vrot.slane %v2954_v54, %v6634_v42  ;;  %2815 = vrot.lane.b32.xlu1 %v2798_v56, %s6167_s21  ;;  %v2983_v17 = vrot.slane %v7041_v41, %v6634_v42  ;;  %v3154_v6 = vcombine.low %v6850_v13, %v5504_v52  ;;  %v7766_v36 = vunpack.i.h.s16 %v6860_v18  ;;  %5736 = vmatprep.subr.bf16.mxu1 %v5971_v48 }
 0x1d1   :  { %v3511_v40 = vcombine.low %v3503_v23, %v3510_v51  ;;  %v3519_v39 = vcombine.low %v5513_v14, %v7006_v49  ;;  %v3520_v50 = vcombine.low %v5497_v35, %v5514_v2  ;;  %v2826_v61 = vunpack.i.h.s16 %v6880_v31  ;;  %v5976_v49 = vld [vmem:[%s7722_s2 + $0xc0] sm:$0xff]   ;;  %5737 = vmatpush3.bf16.msra.mxu1 %v5972_v7 }
 0x1d2   :  { %v7139_v57 = vpack.i.b16 %v6880_v31, %v7766_v36  ;;  %v2969_v54 = vcombine.low %v2961_v3, %v2968_v37  ;;  %v3161_v1 = vrot.slane %v3153_v16, %v6634_v42  ;;  %v3168_v13 = vrot.slane %v3154_v6, %v6634_v42  ;;  %5750 = vmatprep.subr.bf16.mxu1 %v5976_v49 }
 0x1d3   :  { %v3386_v22 = vunpack.i.h.s16 %v6864_v12  ;;  %2523 = vrot.lane.b32.xlu0 %v2518_v60, %s6168_s22  ;;  %v3527_v25 = vrot.slane %v3519_v39, %v6634_v42  ;;  %v3534_v47 = vrot.slane %v3520_v50, %v6634_v42  ;;  %v7767_v33 = vunpack.i.h.s16 %v6843_v62 }
 0x1d4   :  { %v3578_v10 = vcombine.low %v7139_v57, %v6869_v63  ;;  %v2976_v35 = vrot.slane %v2969_v54, %v6634_v42  ;;  %v3152_v9 = vrot.slane %v6773_v8, %v6634_v42  ;;  %v2990_v56 = vrot.slane %v2983_v17, %v6634_v42 }
 0x1d5   :  { %v3571_v23 = vpack.i.b16 %v7767_v33, %v2826_v61  ;;  %v3169_v51 = vcombine.low %v3161_v1, %v3168_v13  ;;  %v5516_v52 = vpack.i.b16 %v6884_v30, %v3386_v22  ;;  %v3535_v60 = vcombine.low %v3527_v25, %v3534_v47 }
 0x1d6   :  { %2993 = vrot.lane.b32.xlu1 %v2976_v35, %s6168_s22  ;;  %v2830_v16 = vunpack.i.h.s16 %v6910_v28  ;;  %v3389_v48 = vunpack.i.h.s16 %v6937_v21  ;;  %v3569_v3 = vunpack.i.h.s16 %v6884_v30  ;;  %v3586_v14 = vrot.slane %v3578_v10, %v6634_v42 }
 0x1d7   :  { %v3579_v37 = vcombine.low %v3571_v23, %v5516_v52  ;;  %v2915_v8 = vunpack.i.h.s16 %v6977_v26  ;;  %v3483_v2 = vunpack.i.h.s16 %v7000_v38  ;;  %3191 = vrot.lane.b32.xlu0 %v3152_v9, %s6167_s21  ;;  %v7768_v17 = vunpack.i.h.s16 %v6890_v53 }
 0x1d8   :  { %v7769_v36 = vunpack.i.h.s16 %v6897_v58  ;;  %v3576_v39 = vpack.i.b16 %v3389_v48, %v2830_v16  ;;  %v3661_v50 = vcombine.low %v7017_v34, %v6973_v0  ;;  %v7770_v38 = vunpack.i.h.s16 %v6945_v46 }
 0x1d9   :  { %v7175_v6 = vpack.i.b16 %v6910_v28, %v7768_v17  ;;  %v3593_v26 = vrot.slane %v3579_v37, %v6634_v42  ;;  %v5517_v7 = vpack.i.b16 %v7076_v4, %v3483_v2  ;;  %v2447_v1 = vunpack.i.h.s16 %v6817_v29 }
 0x1da   :  { %v3574_v54 = vpack.i.b16 %v7769_v36, %v3569_v3  ;;  %v3654_v61 = vpack.i.b16 %v7770_v38, %v2915_v8  ;;  %2995 = vrot.lane.b32.xlu1 %v2990_v56, %s6168_s22  ;;  %v3518_v13 = vrot.slane %v3511_v40, %v6634_v42  ;;  %v3603_v10 = vcombine.low %v6934_v27, %v3576_v39  ;;  %v7776_v39 = vld [vmem:[#allocation11_spill] sm:$0xff] }
 0x1db   :  { %v3120_v49 = vunpack.i.h.s16 %v6853_v15  ;;  %v3176_v34 = vrot.slane %v3169_v51, %v6634_v42  ;;  %v3594_v0 = vcombine.low %v3586_v14, %v3593_v26  ;;  %v7771_v46 = vunpack.i.h.s16 %v6755_v55 }
 0x1dc   :  { %v3602_v22 = vcombine.low %v3574_v54, %v7175_v6  ;;  %v3662_v35 = vcombine.low %v3654_v61, %v5517_v7  ;;  %v7772_v25 = vunpack.i.h.s16 %v6812_v20  ;;  %3557 = vrot.lane.b32.xlu0 %v3518_v13, %s6167_s21  ;;  %v3617_v40 = vrot.slane %v3603_v10, %v6634_v42  ;;  %v7779_v7 = vld [vmem:[#allocation13_spill] sm:$0xff] }
 0x1dd   :  { %v3293_v33 = vpack.i.b16 %v3120_v49, %v2447_v1  ;;  %v2919_v23 = vunpack.i.h.s16 %v7041_v41  ;;  %v7773_v9 = vcombine.low %v6682_v19, %v6688_v24  ;;  %v3669_v51 = vrot.slane %v3661_v50, %v6634_v42 }
 0x1de   :  { %v3291_v47 = vpack.i.b16 %v7772_v25, %v7771_v46  ;;  %v3610_v29 = vrot.slane %v3602_v22, %v6634_v42  ;;  %v3676_v55 = vrot.slane %v3662_v35, %v6634_v42  ;;  %3193 = vrot.lane.b32.xlu1 %v3176_v34, %s6167_s21  ;;  %v3486_v3 = vunpack.i.h.s16 %v7082_v32  ;;  %v7781_v22 = vld [vmem:[#allocation15_spill] sm:$0xff]  ;;  %v7782_v34 = vld [vmem:[#allocation14_spill] sm:$0xff]  ;;  %v7783_v25 = vld [vmem:[#allocation16_spill] sm:$0xff] }
 0x1df   :  { %v3235_v56 = vrot.slane %v7773_v9, %v6634_v42  ;;  %v3320_v16 = vcombine.low %v6822_v5, %v3293_v33  ;;  %v3652_v41 = vunpack.i.h.s16 %v7076_v4  ;;  %v3542_v37 = vrot.slane %v3535_v60, %v6634_v42 }
 0x1e0   :  { %v3319_v20 = vcombine.low %v3291_v47, %v6827_v44  ;;  %v3618_v52 = vcombine.low %v3610_v29, %v3617_v40  ;;  %v3677_v14 = vcombine.low %v3669_v51, %v3676_v55  ;;  %v7219_v44 = vcombine.high %v6853_v15, %v6853_v15  ;;  %v7775_v15 = vld [vmem:[#allocation10_spill] sm:$0xff] }
 0x1e1   :  { %3274 = vrot.lane.b32.xlu0 %v3235_v56, %s6164_s17  ;;  %v3334_v24 = vrot.slane %v3320_v16, %v6634_v42  ;;  %v7774_v8 = vunpack.i.h.s16 %v7024_v45  ;;  %v3659_v2 = vpack.i.b16 %v3486_v3, %v2919_v23  ;;  %v3601_v4 = vrot.slane %v3594_v0, %v6634_v42 }
 0x1e2   :  { %v3327_v19 = vrot.slane %v3319_v20, %v6634_v42  ;;  %3559 = vrot.lane.b32.xlu1 %v3542_v37, %s6167_s21  ;;  %v3266_v54 = vrot.slane %v6760_v59, %v6634_v42  ;;  %v7777_v45 = vcombine.low %v7775_v15, %v7776_v39  ;;  %v5505_v26 = vpack.i.b16 %v7219_v44, %v3120_v49 }
 0x1e3   :  { %v3657_v5 = vpack.i.b16 %v7774_v8, %v3652_v41  ;;  %v3686_v36 = vcombine.low %v7037_v11, %v3659_v2  ;;  %v7243_v13 = vcombine.high %v7082_v32, %v7082_v32  ;;  %v5480_v10 = vpack.i.b16 %v6860_v18, %v7781_v22  ;;  %v7785_v32 = vld [vmem:[#allocation18_spill] sm:$0xff] }
 0x1e4   :  { %v3335_v60 = vcombine.low %v3327_v19, %v3334_v24  ;;  %v3259_v50 = vrot.slane %v7777_v45, %v6634_v42  ;;  %v2608_v0 = vcombine.low %v7782_v34, %v7139_v57  ;;  %v7252_v35 = vcombine.high %v6937_v21, %v6937_v21 }
 0x1e5   :  { %v3685_v17 = vcombine.low %v3657_v5, %v7052_v43  ;;  %3640 = vrot.lane.b32.xlu0 %v3601_v4, %s6164_s17  ;;  %v3700_v61 = vrot.slane %v3686_v36, %v6634_v42  ;;  %v7778_v43 = vld [vmem:[#allocation12_spill] sm:$0xff]  ;;  %v2662_v46 = vrot.slane %v7175_v6, %v6634_v42  ;;  %v7784_v47 = vunpack.i.h.s16 %v7783_v25 }
 0x1e6   :  { %v7780_v11 = vcombine.low %v7778_v43, %v7779_v7  ;;  %3276 = vrot.lane.b32.xlu1 %v3259_v50, %s6164_s17  ;;  %v2609_v40 = vcombine.low %v5480_v10, %v6843_v62  ;;  %v2616_v33 = vrot.slane %v2608_v0, %v6634_v42  ;;  %v5484_v57 = vpack.i.b16 %v6890_v53, %v6934_v27 }
 0x1e7   :  { %v3693_v38 = vrot.slane %v3685_v17, %v6634_v42  ;;  %v5483_v29 = vpack.i.b16 %v7785_v32, %v7784_v47  ;;  %v7786_v23 = vpack.i.b16 %v7783_v25, %v6869_v63  ;;  %v3625_v6 = vrot.slane %v3618_v52, %v6634_v42  ;;  %v7787_v63 = vld [vmem:[#allocation17_spill] sm:$0xff] }
 0x1e8   :  { %v3318_v1 = vrot.slane %v7780_v11, %v6634_v42  ;;  %v3684_v56 = vrot.slane %v3677_v14, %v6634_v42  ;;  %v3183_v51 = vrot.slane %v5505_v26, %v6634_v42  ;;  %v2669_v55 = vrot.slane %v2662_v46, %v6634_v42 }
 0x1e9   :  { %v3701_v49 = vcombine.low %v3693_v38, %v3700_v61  ;;  %v2632_v9 = vcombine.low %v7786_v23, %v6897_v58  ;;  %v5515_v20 = vpack.i.b16 %v7243_v13, %v3486_v3  ;;  %v2623_v16 = vrot.slane %v2609_v40, %v6634_v42 }
 0x1ea   :  { %3357 = vrot.lane.b32.xlu0 %v3318_v1, %s6168_s22  ;;  %v2633_v27 = vcombine.low %v5483_v29, %v5484_v57  ;;  %v5508_v41 = vpack.i.b16 %v6843_v62, %v6880_v31  ;;  %3642 = vrot.lane.b32.xlu1 %v3625_v6, %s6164_s17  ;;  %2675 = vst.msk [vmem:[#allocation3 + $0x24] sm:$0x1] %vm2198_vm10, %v2669_v55  ;;  %v2429_v1 = vpop.permute.xlu0 %2428 }
 0x1eb   :  { %v3398_v52 = vcombine.low %v6860_v18, %v7787_v63  ;;  %v5509_v37 = vpack.i.b16 %v6897_v58, %v6884_v30  ;;  %v5510_v14 = vpack.i.b16 %v6937_v21, %v6910_v28  ;;  %v5511_v3 = vpack.i.b16 %v7252_v35, %v3389_v48  ;;  %v7788_v58 = vld [vmem:[#allocation19_spill] sm:$0xff] }
 0x1ec   :  { %v2624_v19 = vcombine.low %v2616_v33, %v2623_v16  ;;  %v2640_v62 = vrot.slane %v2632_v9, %v6634_v42  ;;  %v2647_v31 = vrot.slane %v2633_v27, %v6634_v42  ;;  %v3399_v24 = vcombine.low %v5508_v41, %v6864_v12  ;;  %v5979_v16 = vld [vmem:[%s7722_s2 + $0xc8] sm:$0xff]  }
 0x1ed   :  { %v3342_v18 = vrot.slane %v3335_v60, %v6634_v42  ;;  %v3422_v30 = vcombine.low %v5509_v37, %v6890_v53  ;;  %v3423_v8 = vcombine.low %v7788_v58, %v5510_v14  ;;  %v3452_v28 = vrot.slane %v5511_v3, %v6634_v42  ;;  %v5981_v14 = vld [vmem:[%s7722_s2 + $0xd0] sm:$0xff]   ;;  %v5984_v58 = vld [vmem:[%s7722_s2 + $0x98] sm:$0xff]  }
 0x1ee   :  { %3723 = vrot.lane.b32.xlu0 %v3684_v56, %s6168_s22  ;;  %v2631_v21 = vrot.slane %v2624_v19, %v6634_v42  ;;  %v2648_v48 = vcombine.low %v2640_v62, %v2647_v31  ;;  %v3406_v5 = vrot.slane %v3398_v52, %v6634_v42  ;;  %v3413_v2 = vrot.slane %v3399_v24, %v6634_v42  ;;  %v2433_v22 = vpop.permute.xlu0 %2432  ;;  %v5977_v56 = vld [vmem:[%s7722_s2 + $0x80] sm:$0xff]   ;;  %v5980_v52 = vld [vmem:[%s7722_s2 + $0x88] sm:$0xff]   ;;  %v5982_v62 = vld [vmem:[%s7722_s2 + $0x90] sm:$0xff]  }
 0x1ef   :  { %3359 = vrot.lane.b32.xlu1 %v3342_v18, %s6168_s22  ;;  %v3190_v12 = vrot.slane %v3183_v51, %v6634_v42  ;;  %v3430_v4 = vrot.slane %v3422_v30, %v6634_v42  ;;  %v3437_v60 = vrot.slane %v3423_v8, %v6634_v42  ;;  %v3459_v53 = vrot.slane %v3452_v28, %v6634_v42  ;;  %v5983_v24 = vld [vmem:[%s7722_s2 + $0xd8] sm:$0xff]   ;;  %v5985_v8 = vld [vmem:[%s7722_s2 + $0xe0] sm:$0xff]  }
 0x1f0   :  { %2673 = vst.msk [vmem:[#allocation3 + $0x4] sm:$0xf] %vm2195_vm9, %v2631_v21  ;;  %v2655_v17 = vrot.slane %v2648_v48, %v6634_v42  ;;  %v3414_v36 = vcombine.low %v3406_v5, %v3413_v2  ;;  %v3708_v15 = vrot.slane %v3701_v49, %v6634_v42  ;;  %v3549_v39 = vrot.slane %v5515_v20, %v6634_v42  ;;  %v5986_v48 = vld [vmem:[%s7722_s2 + $0xa0] sm:$0xff]   ;;  %v5987_v5 = vld [vmem:[%s7722_s2 + $0xe8] sm:$0xff]  }
 0x1f1   :  { %v3438_v45 = vcombine.low %v3430_v4, %v3437_v60  ;;  %3465 = vst.msk [vmem:[#allocation3 + $0x2c] sm:$0x1] %vm2198_vm10, %v3459_v53  ;;  %v3273_v26 = vrot.slane %v3266_v54, %v6634_v42  ;;  %v3349_v38 = vrot.slane %v7219_v44, %v6634_v42  ;;  %v3632_v7 = vrot.slane %v7252_v35, %v6634_v42  ;;  %v5988_v4 = vld [vmem:[%s7722_s2 + $0xa8] sm:$0xff]   ;;  %v5989_v60 = vld [vmem:[%s7722_s2 + $0xf0] sm:$0xff]  }
 0x1f2   :  { %3195 = vrot.lane.b32.xlu0 %v3190_v12, %s6167_s21  ;;  %2674 = vst.msk [vmem:[#allocation3 + $0x14] sm:$0xf] %vm2195_vm9, %v2655_v17  ;;  %v3421_v50 = vrot.slane %v3414_v36, %v6634_v42  ;;  %v3556_v43 = vrot.slane %v3549_v39, %v6634_v42  ;;  %v3715_v54 = vrot.slane %v7243_v13, %v6634_v42  ;;  %v5990_v36 = vld [vmem:[%s7722_s2 + $0xb0] sm:$0xff]  }
 0x1f3   :  { %3725 = vrot.lane.b32.xlu1 %v3708_v15, %s6168_s22  ;;  %v3445_v61 = vrot.slane %v3438_v45, %v6634_v42  ;;  %v3356_v59 = vrot.slane %v3349_v38, %v6634_v42  ;;  %v3639_v44 = vrot.slane %v3632_v7, %v6634_v42  ;;  %v2431_v0 = vpop.permute.xlu1 %2430  ;;  %v5991_v15 = vld [vmem:[%s7722_s2 + $0xf8] sm:$0xff]  }
 0x1f4   :  { %3463 = vst.msk [vmem:[#allocation3 + $0xc] sm:$0xf] %vm2195_vm9, %v3421_v50  ;;  %v3722_v11 = vrot.slane %v3715_v54, %v6634_v42  ;;  %v5999_v54 = vld [vmem:[%s7722_s2 + $0x100] sm:$0xff]  }
 0x1f5   :  { %3464 = vst.msk [vmem:[#allocation3 + $0x1c] sm:$0xf] %vm2195_vm9, %v3445_v61 }
 0x1f6   :  { %3278 = vrot.lane.b32.xlu0 %v3273_v26, %s6164_s17  ;;  %v5995_v26 = vld [vmem:[%s7722_s2 + $0xb8] sm:$0xff]  }
 0x1f7   :  { %3561 = vrot.lane.b32.xlu1 %v3556_v43, %s6167_s21 }
 0x1fa   :  { %3361 = vrot.lane.b32.xlu0 %v3356_v59, %s6168_s22 }
 0x1fb   :  { %3644 = vrot.lane.b32.xlu1 %v3639_v44, %s6164_s17  ;;  %v5998_v44 = vld [vmem:[%s7722_s2 + $0x140] sm:$0xff]  }
 0x1fc   :  { %5778 = vmatprep.subr.bf16.mxu0 %v5998_v44  ;;  %v6022_v44 = vld [vmem:[%s7722_s2 + $0x1e8] sm:$0xff]  }
 0x1fd   :  { %5779 = vmatpush3.bf16.msra.mxu0 %v5999_v54  ;;  %v6023_v54 = vld [vmem:[%s7722_s2 + $0x178] sm:$0xff]  }
 0x1ff   :  { %3727 = vrot.lane.b32.xlu1 %v3722_v11, %s6168_s22  ;;  %v6000_v11 = vld [vmem:[%s7722_s2 + $0x148] sm:$0xff]  }
 0x200   :  { %5780 = vmatprep.subr.bf16.mxu0 %v6000_v11  ;;  %v6025_v11 = vld [vmem:[%s7722_s2 + $0x138] sm:$0xff]  }
 0x20a   :  { %v2338_v10 = vpop.permute.xlu0 %2337 }
 0x20b   :  { %2347 = vst.msk [vmem:[#allocation3] sm:$0xf] %vm2346_vm11, %v2338_v10  ;;  %v6009_v10 = vld [vmem:[%s7722_s2 + $0x180] sm:$0xff]  }
 0x20c   :  { %2438 = vst.msk [vmem:[#allocation3] sm:$0xf] %vm2437_vm12, %v2429_v1  ;;  %v6001_v1 = vld [vmem:[%s7722_s2 + $0x108] sm:$0xff]  }
 0x20d   :  { %5781 = vmatpush3.bf16.msra.mxu0 %v6001_v1 }
 0x20e   :  { %v2520_v34 = vpop.permute.xlu0 %2519 }
 0x20f   :  { %2529 = vst.msk [vmem:[#allocation3] sm:$0xf] %vm2528_vm13, %v2520_v34  ;;  %v6002_v34 = vld [vmem:[%s7722_s2 + $0x150] sm:$0xff]  }
 0x210   :  { %5782 = vmatprep.subr.bf16.mxu0 %v6002_v34 }
 0x21c   :  { %v2342_v13 = vpop.permute.xlu0 %2341 }
 0x21d   :  { %2350 = vst.msk [vmem:[#allocation3 + $0x20] sm:$0x1] %vm2349_vm14, %v2342_v13  ;;  %v6010_v13 = vld [vmem:[%s7722_s2 + $0x1c8] sm:$0xff]  }
 0x21e   :  { %2441 = vst.msk [vmem:[#allocation3 + $0x20] sm:$0x1] %vm2440_vm15, %v2433_v22  ;;  %v6008_v22 = vld [vmem:[%s7722_s2 + $0x1c0] sm:$0xff]  }
 0x222   :  { %v2340_v42 = vpop.permute.xlu1 %2339 }
 0x223   :  { %2348 = vst.msk [vmem:[#allocation3 + $0x10] sm:$0xf] %vm2346_vm11, %v2340_v42  ;;  %v6003_v42 = vld [vmem:[%s7722_s2 + $0x110] sm:$0xff]  }
 0x224   :  { %2439 = vst.msk [vmem:[#allocation3 + $0x10] sm:$0xf] %vm2437_vm12, %v2431_v0  ;;  %v6012_v0 = vld [vmem:[%s7722_s2 + $0x188] sm:$0xff]   ;;  %5783 = vmatpush3.bf16.msra.mxu0 %v6003_v42 }
 0x228   :  { %v2522_v49 = vpop.permute.xlu1 %2521 }
 0x229   :  { %2530 = vst.msk [vmem:[#allocation3 + $0x10] sm:$0xf] %vm2528_vm13, %v2522_v49  ;;  %v6014_v49 = vld [vmem:[%s7722_s2 + $0x1d0] sm:$0xff]  }
 0x22c   :  { %v2907_v35 = vpop.permute.xlu1 %2906 }
 0x230   :  { %v2903_v46 = vpop.permute.xlu0 %2902  ;;  %v5973_v55 = vld [vmem:[#allocation3] ss:$16 sps:$4 sm:$0xff]  }
 0x23a   :  { %v2905_v25 = vpop.permute.xlu1 %2904 }
 0x23c   :  { %v2814_v47 = vpop.permute.xlu0 %2813 }
 0x23d   :  { %2822 = vst.msk [vmem:[#allocation3 + $0x4] sm:$0xf] %vm2346_vm11, %v2814_v47  ;;  %v6007_v47 = vld [vmem:[%s7722_s2 + $0x120] sm:$0xff]  }
 0x23e   :  { %2911 = vst.msk [vmem:[#allocation3 + $0x4] sm:$0xf] %vm2437_vm12, %v2903_v46  ;;  %v2818_v32 = vpop.permute.xlu1 %2817  ;;  %v6005_v46 = vld [vmem:[%s7722_s2 + $0x118] sm:$0xff]  }
 0x23f   :  { %2824 = vst.msk [vmem:[#allocation3 + $0x24] sm:$0x1] %vm2349_vm14, %v2818_v32  ;;  %v6011_v32 = vld [vmem:[%s7722_s2 + $0x168] sm:$0xff]  }
 0x240   :  { %2913 = vst.msk [vmem:[#allocation3 + $0x24] sm:$0x1] %vm2440_vm15, %v2907_v35  ;;  %v6004_v35 = vld [vmem:[%s7722_s2 + $0x158] sm:$0xff]  }
 0x241   :  { %v2992_v29 = vpop.permute.xlu0 %2991  ;;  %5784 = vmatprep.subr.bf16.mxu0 %v6004_v35  ;;  %v6024_v35 = vld [vmem:[%s7722_s2 + $0x1a8] sm:$0xff]  }
 0x242   :  { %3000 = vst.msk [vmem:[#allocation3 + $0x4] sm:$0xf] %vm2528_vm13, %v2992_v29  ;;  %v2816_v40 = vpop.permute.xlu1 %2815  ;;  %5785 = vmatpush3.bf16.msra.mxu0 %v6005_v46  ;;  %v6013_v29 = vld [vmem:[%s7722_s2 + $0x128] sm:$0xff]  }
 0x243   :  { %2823 = vst.msk [vmem:[#allocation3 + $0x14] sm:$0xf] %vm2346_vm11, %v2816_v40 }
 0x244   :  { %2912 = vst.msk [vmem:[#allocation3 + $0x14] sm:$0xf] %vm2437_vm12, %v2905_v25  ;;  %v6006_v25 = vld [vmem:[%s7722_s2 + $0x160] sm:$0xff]  }
 0x245   :  { %v2524_v33 = vpop.permute.xlu0 %2523  ;;  %5786 = vmatprep.subr.bf16.mxu0 %v6006_v25 }
 0x246   :  { %2532 = vst.msk [vmem:[#allocation3 + $0x20] sm:$0x1] %vm2531_vm0, %v2524_v33  ;;  %5787 = vmatpush3.bf16.msra.mxu0 %v6007_v47 }
 0x247   :  { %5788 = vmatprep.subr.bf16.mxu0 %v6011_v32 }
 0x248   :  { %v2994_v57 = vpop.permute.xlu1 %2993 }
 0x249   :  { %3001 = vst.msk [vmem:[#allocation3 + $0x14] sm:$0xf] %vm2528_vm13, %v2994_v57  ;;  %v3192_v23 = vpop.permute.xlu0 %3191 }
 0x24a   :  { %3200 = vst.msk [vmem:[#allocation3 + $0x8] sm:$0xf] %vm2346_vm11, %v3192_v23  ;;  %5789 = vmatpush3.bf16.msra.mxu0 %v6013_v29  ;;  %v6026_v29 = vld [vmem:[%s7722_s2 + $0x1f0] sm:$0xff]  }
 0x24c   :  { %v2996_v9 = vpop.permute.xlu1 %2995 }
 0x24d   :  { %3002 = vst.msk [vmem:[#allocation3 + $0x24] sm:$0x1] %vm2531_vm0, %v2996_v9 }
 0x24e   :  { %v3558_v6 = vpop.permute.xlu0 %3557 }
 0x24f   :  { %3566 = vst.msk [vmem:[#allocation3 + $0xc] sm:$0xf] %vm2346_vm11, %v3558_v6 }
 0x250   :  { %v3194_v51 = vpop.permute.xlu1 %3193  ;;  %v5975_v20 = vld [vmem:[#allocation3 + $0x4] ss:$16 sps:$4 sm:$0xff]  }
 0x251   :  { %3201 = vst.msk [vmem:[#allocation3 + $0x18] sm:$0xf] %vm2346_vm11, %v3194_v51  ;;  %4070 = vmatprep.mubr.bf16.mxu1 %v5975_v20 }
 0x252   :  { %4071 = vmatmul.mubr.bf16.vlgmr.msra.gmra.mrb[0].mxu1 %v5973_v55 }
 0x253   :  { %v3275_v27 = vpop.permute.xlu0 %3274  ;;  %5751 = vmatpush3.bf16.msra.mxu1 %v5977_v56 }
 0x254   :  { %3283 = vst.msk [vmem:[#allocation3 + $0x8] sm:$0xf] %vm2437_vm12, %v3275_v27  ;;  %v3560_v41 = vpop.permute.xlu1 %3559  ;;  %v3740_v63 = vld [vmem:[#allocation3 + $0x20] sm:$0x11]  ;;  %5752 = vmatprep.subr.bf16.mxu1 %v5979_v16  ;;  %v5518_v27 = vld [vmem:[%s7725_s5 + $0x1] ss:$0 sm:$0xff] }
 0x255   :  { %3567 = vst.msk [vmem:[#allocation3 + $0x1c] sm:$0xf] %vm2346_vm11, %v3560_v41  ;;  %v5524_v37 = vcombine.high %v3740_v63, %v3740_v63  ;;  %v5523_v31 = vcombine.low %v3740_v63, %v3740_v63 }
 0x257   :  { %v3641_v3 = vpop.permute.xlu0 %3640  ;;  %4078 = vmatprep.mubr.bf16.mxu1 %v5524_v37  ;;  %5753 = vmatpush3.bf16.msra.mxu1 %v5980_v52 }
 0x258   :  { %3649 = vst.msk [vmem:[#allocation3 + $0xc] sm:$0xf] %vm2437_vm12, %v3641_v3  ;;  %v3277_v19 = vpop.permute.xlu1 %3276  ;;  %5754 = vmatprep.subr.bf16.mxu1 %v5981_v14 }
 0x259   :  { %3284 = vst.msk [vmem:[#allocation3 + $0x18] sm:$0xf] %vm2437_vm12, %v3277_v19 }
 0x25a   :  { %4079 = vmatmul.mubr.bf16.gmra.mrb[4].mxu1 %v5523_v31 }
 0x25b   :  { %5755 = vmatpush3.bf16.msra.mxu1 %v5982_v62 }
 0x25c   :  { %v3358_v18 = vpop.permute.xlu0 %3357  ;;  %v3643_v30 = vpop.permute.xlu1 %3642  ;;  %5756 = vmatprep.subr.bf16.mxu1 %v5983_v24 }
 0x25d   :  { %3366 = vst.msk [vmem:[#allocation3 + $0x8] sm:$0xf] %vm2528_vm13, %v3358_v18  ;;  %v6015_v18 = vld [vmem:[%s7722_s2 + $0x190] sm:$0xff]  }
 0x25e   :  { %3650 = vst.msk [vmem:[#allocation3 + $0x1c] sm:$0xf] %vm2437_vm12, %v3643_v30 }
 0x25f   :  { %5757 = vmatpush3.bf16.msra.mxu1 %v5984_v58 }
 0x260   :  { %v3724_v28 = vpop.permute.xlu0 %3723  ;;  %5758 = vmatprep.subr.bf16.mxu1 %v5985_v8 }
 0x261   :  { %3732 = vst.msk [vmem:[#allocation3 + $0xc] sm:$0xf] %vm2528_vm13, %v3724_v28  ;;  %v3360_v21 = vpop.permute.xlu1 %3359  ;;  %v6016_v28 = vld [vmem:[%s7722_s2 + $0x1d8] sm:$0xff]  }
 0x262   :  { %3367 = vst.msk [vmem:[#allocation3 + $0x18] sm:$0xf] %vm2528_vm13, %v3360_v21 }
 0x263   :  { %5759 = vmatpush3.bf16.msra.mxu1 %v5986_v48 }
 0x264   :  { %v3196_v2 = vpop.permute.xlu0 %3195  ;;  %5760 = vmatprep.subr.bf16.mxu1 %v5987_v5 }
 0x265   :  { %3202 = vst.msk [vmem:[#allocation3 + $0x28] sm:$0x1] %vm2349_vm14, %v3196_v2  ;;  %v3726_v12 = vpop.permute.xlu1 %3725 }
 0x266   :  { %3733 = vst.msk [vmem:[#allocation3 + $0x1c] sm:$0xf] %vm2528_vm13, %v3726_v12 }
 0x267   :  { %5761 = vmatpush3.bf16.msra.mxu1 %v5988_v4 }
 0x268   :  { %v3279_v53 = vpop.permute.xlu0 %3278  ;;  %5762 = vmatprep.subr.bf16.mxu1 %v5989_v60  ;;  %v6017_v60 = vld [vmem:[%s7722_s2 + $0x170] sm:$0xff]  }
 0x269   :  { %3285 = vst.msk [vmem:[#allocation3 + $0x28] sm:$0x1] %vm2440_vm15, %v3279_v53  ;;  %v3562_v17 = vpop.permute.xlu1 %3561  ;;  %v5992_v61 = vld [vmem:[#allocation3 + $0x8] ss:$16 sps:$4 sm:$0xff]   ;;  %5790 = vmatprep.subr.bf16.mxu0 %v6017_v60  ;;  %v6033_v60 = vld [vmem:[%s7722_s2 + $0x210] sm:$0xff]  }
 0x26a   :  { %3568 = vst.msk [vmem:[#allocation3 + $0x2c] sm:$0x1] %vm2349_vm14, %v3562_v17  ;;  %v6018_v53 = vld [vmem:[%s7722_s2 + $0x198] sm:$0xff]   ;;  %v6019_v17 = vld [vmem:[%s7722_s2 + $0x130] sm:$0xff]  }
 0x26b   :  { %5763 = vmatpush3.bf16.msra.mxu1 %v5990_v36  ;;  %v7789_v36 = vld [vmem:[#allocation9_spill] sm:$0xff]  ;;  %5791 = vmatpush3.bf16.msra.mxu0 %v6019_v17 }
 0x26c   :  { %v3362_v39 = vpop.permute.xlu0 %3361  ;;  %5764 = vmatprep.subr.bf16.mxu1 %v5991_v15  ;;  %5792 = vmatprep.subr.bf16.mxu0 %v6023_v54  ;;  %v6034_v17 = vld [vmem:[%s7722_s2 + $0x218] sm:$0xff]   ;;  %v6047_v54 = vld [vmem:[%s7723_s3 + $0x40] ss:$16 sps:$4 sm:$0xff]  }
 0x26d   :  { %3368 = vst.msk [vmem:[#allocation3 + $0x28] sm:$0x1] %vm2531_vm0, %v3362_v39  ;;  %v3645_v45 = vpop.permute.xlu1 %3644  ;;  %v5994_v50 = vld [vmem:[#allocation3 + $0xc] ss:$16 sps:$4 sm:$0xff]  }
 0x26e   :  { %3651 = vst.msk [vmem:[#allocation3 + $0x2c] sm:$0x1] %vm2440_vm15, %v3645_v45  ;;  %4118 = vmatprep.mubr.bf16.mxu1 %v5994_v50 }
 0x26f   :  { %5765 = vmatpush3.bf16.msra.mxu1 %v5995_v26  ;;  %v6020_v26 = vld [vmem:[%s7722_s2 + $0x1e0] sm:$0xff]   ;;  %5793 = vmatpush3.bf16.msra.mxu0 %v6025_v11  ;;  %v6050_v11 = vld [vmem:[%s7723_s3 + $0x48] ss:$16 sps:$4 sm:$0xff]  }
 0x270   :  { %5800 = vmatprep.subr.bf16.mxu1 %v6008_v22 }
 0x271   :  { %v3728_v38 = vpop.permute.xlu1 %3727 }
 0x272   :  { %3734 = vst.msk [vmem:[#allocation3 + $0x2c] sm:$0x1] %vm2531_vm0, %v3728_v38  ;;  %4119 = vmatmul.mubr.bf16.vlgmr.msra.gmra.mrb[8].mxu1 %v5992_v61  ;;  %v6021_v38 = vld [vmem:[%s7722_s2 + $0x1a0] sm:$0xff]  }
 0x273   :  { %5801 = vmatpush3.bf16.msra.mxu1 %v6009_v10 }
 0x274   :  { %5802 = vmatprep.subr.bf16.mxu1 %v6010_v13 }
 0x277   :  { %5803 = vmatpush3.bf16.msra.mxu1 %v6012_v0 }
 0x278   :  { %5804 = vmatprep.subr.bf16.mxu1 %v6014_v49 }
 0x279   :  { %v3741_v43 = vld [vmem:[#allocation3 + $0x28] sm:$0x11] }
 0x27a   :  { %v5526_v7 = vcombine.high %v3741_v43, %v3741_v43  ;;  %v5525_v59 = vcombine.low %v3741_v43, %v3741_v43 }
 0x27b   :  { %5805 = vmatpush3.bf16.msra.mxu1 %v6015_v18 }
 0x27c   :  { %4126 = vmatprep.mubr.bf16.mxu1 %v5526_v7  ;;  %5806 = vmatprep.subr.bf16.mxu1 %v6016_v28 }
 0x27d   :  { %4127 = vmatmul.mubr.bf16.gmra.mrb[12].mxu1 %v5525_v59 }
 0x27f   :  { %5807 = vmatpush3.bf16.msra.mxu1 %v6018_v53 }
 0x280   :  { %5808 = vmatprep.subr.bf16.mxu1 %v6020_v26  ;;  %v6038_v26 = vld [vmem:[%s7723_s3 + $0x8] ss:$16 sps:$4 sm:$0xff]  }
 0x283   :  { %5809 = vmatpush3.bf16.msra.mxu1 %v6021_v38  ;;  %v6040_v38 = vld [vmem:[%s7723_s3 + $0xc] ss:$16 sps:$4 sm:$0xff]  }
 0x284   :  { %5810 = vmatprep.subr.bf16.mxu1 %v6022_v44  ;;  %v6052_v44 = vld [vmem:[%s7723_s3 + $0x4c] ss:$16 sps:$4 sm:$0xff]  }
 0x287   :  { %5811 = vmatpush3.bf16.msra.mxu1 %v6024_v35  ;;  %v5569_v35 = vld [vmem:[%s7725_s5 + $0x2] ss:$0 sm:$0xff] }
 0x288   :  { %5812 = vmatprep.subr.bf16.mxu1 %v6026_v29 }
 0x325   :  { %v5738_v40 = vpop.f32.mrb[0].mxu1 }
 0x326   :  { %v5739_v33 = vpop.f32.mrb[1].mxu1 }
 0x327   :  { %v5740_v57 = vadd.f32 %v5739_v33, %v5738_v40  ;;  %v5741_v23 = vpop.f32.mrb[2].mxu1 }
 0x328   :  { %v5742_v9 = vpop.f32.mrb[3].mxu1 }
 0x329   :  { %v5743_v6 = vadd.f32 %v5742_v9, %v5741_v23  ;;  %v4073_v52 = vadd.f32 %v5740_v57, %v5518_v27 }
 0x32b   :  { %v4076_v19 = vadd.f32 %v5743_v6, %v5518_v27 }
 0x32d   :  { %v5744_v56 = vpop.f32.mrb[4].mxu1 }
 0x32e   :  { %v5745_v51 = vpop.f32.mrb[5].mxu1 }
 0x32f   :  { %v5746_v55 = vadd.f32 %v5745_v51, %v5744_v56  ;;  %v5747_v20 = vpop.f32.mrb[6].mxu1 }
 0x330   :  { %v5748_v16 = vpop.f32.mrb[7].mxu1 }
 0x331   :  { %v4081_v2 = vadd.f32 %v5746_v55, %v5518_v27  ;;  %v6027_v27 = vld [vmem:[%s7722_s2 + $0x1b0] sm:$0xff]  }
 0x332   :  { %5813 = vmatpush3.bf16.msra.mxu1 %v6027_v27 }
 0x345   :  { %v5766_v41 = vpop.f32.mrb[8].mxu1 }
 0x346   :  { %v5767_v63 = vpop.f32.mrb[9].mxu1 }
 0x347   :  { %v5768_v37 = vadd.f32 %v5767_v63, %v5766_v41  ;;  %v5769_v14 = vpop.f32.mrb[10].mxu1 }
 0x348   :  { %v5770_v3 = vpop.f32.mrb[11].mxu1 }
 0x349   :  { %v4121_v62 = vadd.f32 %v5768_v37, %v4073_v52  ;;  %v5771_v31 = vadd.f32 %v5770_v3, %v5769_v14  ;;  %v6028_v52 = vld [vmem:[%s7722_s2 + $0x1f8] sm:$0xff]  }
 0x34a   :  { %5814 = vmatprep.subr.bf16.mxu1 %v6028_v52 }
 0x34b   :  { %v4124_v24 = vadd.f32 %v5771_v31, %v4076_v19  ;;  %v4134_v30 = vmax.f32 %v4121_v62, 0.0  ;;  %v6030_v19 = vld [vmem:[%s7722_s2 + $0x1b8] sm:$0xff]   ;;  %v6169_v62 = vmov 0.0  }
 0x34c   :  { %5871 = vmatprep.subr.bf16.mxu0 %v6169_v62  ;;  %5815 = vmatpush3.bf16.msra.mxu1 %v6030_v19  ;;  %v6066_v19 = vld [vmem:[%s7724_s4 + $0x88] sm:$0xff]  }
 0x34d   :  { %v4135_v58 = vmax.f32 %v4124_v24, 0.0 }
 0x34f   :  { %v4137_v21 = vpack.c.bf16 %v4135_v58, %v4134_v30  ;;  %v5559_v48 = vpack.c.bf16 %v4135_v58, %v4135_v58 }
 0x350   :  { %v5772_v8 = vpop.f32.mrb[12].mxu1 }
 0x351   :  { %v5773_v5 = vpop.f32.mrb[13].mxu1  ;;  %v4148_v15 = vrot.slane %v4137_v21, %v7789_v36  ;;  %v4155_v39 = vrot.slane %v5559_v48, %v7789_v36 }
 0x352   :  { %v5774_v12 = vadd.f32 %v5773_v5, %v5772_v8  ;;  %v5775_v4 = vpop.f32.mrb[14].mxu1  ;;  %v6031_v5 = vld [vmem:[%s7722_s2 + $0x200] sm:$0xff]  }
 0x353   :  { %v5776_v45 = vpop.f32.mrb[15].mxu1  ;;  %v4156_v61 = vcombine.high %v4148_v15, %v4148_v15  ;;  %v4157_v43 = vcombine.high %v4155_v39, %v4155_v39  ;;  %v4164_v7 = vrot.slane %v4148_v15, %v7789_v36  ;;  %v4171_v59 = vrot.slane %v4155_v39, %v7789_v36  ;;  %v6032_v4 = vld [vmem:[%s7722_s2 + $0x208] sm:$0xff]  }
 0x354   :  { %v4129_v50 = vadd.f32 %v5774_v12, %v4081_v2  ;;  %v6035_v45 = vld [vmem:[%s7723_s3] ss:$16 sps:$4 sm:$0xff]  }
 0x355   :  { %v4185_v22 = vrot.slane %v4157_v43, %v7789_v36  ;;  %v4205_v10 = vunpack.i.h.s16 %v4164_v7  ;;  %v4178_v34 = vrot.slane %v4156_v61, %v7789_v36  ;;  %v4187_v13 = vcombine.high %v4171_v59, %v4171_v59  ;;  %v6046_v61 = vld [vmem:[%s7723_s3 + $0x2c] ss:$16 sps:$4 sm:$0xff]   ;;  %v6041_v43 = vld [vmem:[%s7723_s3 + $0x20] ss:$16 sps:$4 sm:$0xff]  }
 0x356   :  { %v4136_v1 = vmax.f32 %v4129_v50, 0.0  ;;  %v4186_v42 = vcombine.high %v4164_v7, %v4164_v7  ;;  %v4213_v49 = vunpack.i.h.s16 %v4171_v59  ;;  %v6037_v50 = vld [vmem:[%s7723_s3 + $0x4] ss:$16 sps:$4 sm:$0xff]  }
 0x357   :  { %v5561_v46 = vpack.i.b16 %v4185_v22, %v4205_v10  ;;  %v4207_v25 = vunpack.i.h.s16 %v4178_v34  ;;  %v4189_v47 = vcombine.high %v4185_v22, %v4185_v22  ;;  %v4188_v32 = vcombine.high %v4178_v34, %v4178_v34  ;;  %4845 = vmatprep.subr.bf16.mxu1 %v6037_v50  ;;  %v6056_v10 = vld [vmem:[%s7723_s3 + $0x68] ss:$16 sps:$4 sm:$0xff]  }
 0x358   :  { %v4138_v0 = vpack.c.bf16 %v4136_v1, %v4136_v1  ;;  %v4209_v33 = vunpack.i.h.s16 %v4186_v42  ;;  %v5560_v57 = vpack.i.b16 %v4213_v49, %v4164_v7  ;;  %v4215_v23 = vunpack.i.h.s16 %v4185_v22  ;;  %v6044_v7 = vld [vmem:[%s7723_s3 + $0x28] ss:$16 sps:$4 sm:$0xff]   ;;  %v6053_v1 = vld [vmem:[%s7723_s3 + $0x60] ss:$16 sps:$4 sm:$0xff]   ;;  %v6055_v22 = vld [vmem:[%s7723_s3 + $0x64] ss:$16 sps:$4 sm:$0xff]  }
 0x359   :  { %4229 = vrot.lane.b32.xlu0 %v5561_v46, %s6164_s17  ;;  %v5563_v9 = vpack.i.b16 %v4187_v13, %v4207_v25  ;;  %v4217_v6 = vunpack.i.h.s16 %v4187_v13  ;;  %v4219_v56 = vunpack.i.h.s16 %v4189_v47  ;;  %v4211_v20 = vunpack.i.h.s16 %v4188_v32  ;;  %v6087_v50 = vld [vmem:[%s7724_s4 + $0x78] sm:$0xff]  }
 0x35a   :  { %v4196_v40 = vrot.slane %v4138_v0, %v7789_v36  ;;  %v5565_v51 = vpack.i.b16 %v4189_v47, %v4209_v33  ;;  %4227 = vst.msk [vmem:[#allocation4] sm:$0x1] %vm4226_vm1, %v5560_v57  ;;  %v5562_v16 = vpack.i.b16 %v4215_v23, %v4178_v34  ;;  %v6058_v34 = vld [vmem:[%s7723_s3 + $0x6c] ss:$16 sps:$4 sm:$0xff]   ;;  %v6171_v13 = vmov 0   ;;  %v6059_v0 = vld [vmem:[%s7724_s4 + $0x40] sm:$0xff]  }
 0x35b   :  { %4238 = vrot.lane.b32.xlu1 %v5563_v9, %s6164_s17  ;;  %v5564_v41 = vpack.i.b16 %v4217_v6, %v4186_v42  ;;  %v5566_v63 = vpack.i.b16 %v4219_v56, %v4188_v32  ;;  %v6060_v42 = vld [vmem:[%s7724_s4 + $0xc0] sm:$0xff]  }
 0x35c   :  { %v4203_v55 = vrot.slane %v4196_v40, %v7789_v36  ;;  %4236 = vst.msk [vmem:[#allocation4 + $0x1] sm:$0x1] %vm4226_vm1, %v5562_v16 }
 0x35d   :  { %4246 = vrot.lane.b32.xlu0 %v5565_v51, %s6164_s17  ;;  %4244 = vst.msk [vmem:[#allocation4 + $0x2] sm:$0x1] %vm4226_vm1, %v5564_v41  ;;  %4252 = vst.msk [vmem:[#allocation4 + $0x3] sm:$0x1] %vm4226_vm1, %v5566_v63  ;;  %v6061_v41 = vld [vmem:[%s7724_s4] sm:$0xff]  }
 0x35e   :  { %v4221_v37 = vunpack.i.h.s16 %v4203_v55  ;;  %v5567_v14 = vpack.i.b16 %v4203_v55, %v4211_v20  ;;  %v6062_v63 = vld [vmem:[%s7724_s4 + $0x80] sm:$0xff]  }
 0x360   :  { %v5568_v3 = vpack.i.b16 %v4221_v37, %v4171_v59  ;;  %4254 = vrot.lane.b32.xlu1 %v5567_v14, %s6164_s17  ;;  %v6049_v59 = vld [vmem:[%s7723_s3 + $0x44] ss:$16 sps:$4 sm:$0xff]   ;;  %v6063_v37 = vld [vmem:[%s7724_s4 + $0x48] sm:$0xff]   ;;  %s6139_s17 = scalar_lea.vmem %s5286_s29, 32 }
 0x361   :  { %v6064_v14 = vld [vmem:[%s7724_s4 + $0xc8] sm:$0xff]   ;;  %p6140_p0 = scmp.ne.s32.totalorder %s5286_s29, %s6139_s17  ;;  %p6145_p2 = scmp.lt.s32.totalorder %s6139_s17, %s6139_s17 }
 0x362   :  { %4260 = vst.msk [vmem:[#allocation4 + $0x4] sm:$0x1] %vm4226_vm1, %v5568_v3  ;;  %v6065_v3 = vld [vmem:[%s7724_s4 + $0x8] sm:$0xff]  }
 0x363   :  { %p6146_p3 = por %p6145_p2, %p6144_p1 }
 0x365   :  { %p6147_p4 = pnand %p6146_p3, %p6140_p0 }
 0x3cb   :  { %v4230_v31 = vpop.permute.xlu0 %4229 }
 0x3cc   :  { %4233 = vst.msk [vmem:[#allocation4] sm:$0x1] %vm4232_vm2, %v4230_v31  ;;  %v6068_v31 = vld [vmem:[%s7724_s4 + $0xd0] sm:$0xff]  }
 0x3cd   :  { %v4239_v24 = vpop.permute.xlu1 %4238 }
 0x3ce   :  { %4241 = vst.msk [vmem:[#allocation4 + $0x1] sm:$0x1] %vm4232_vm2, %v4239_v24  ;;  %v6069_v24 = vld [vmem:[%s7724_s4 + $0x10] sm:$0xff]  }
 0x3cf   :  { %v4247_v18 = vpop.permute.xlu0 %4246 }
 0x3d0   :  { %4249 = vst.msk [vmem:[#allocation4 + $0x2] sm:$0x1] %vm4232_vm2, %v4247_v18  ;;  %v6070_v18 = vld [vmem:[%s7724_s4 + $0x90] sm:$0xff]  }
 0x3d2   :  { %v4255_v30 = vpop.permute.xlu1 %4254 }
 0x3d3   :  { %4257 = vst.msk [vmem:[#allocation4 + $0x3] sm:$0x1] %vm4232_vm2, %v4255_v30  ;;  %v6071_v30 = vld [vmem:[%s7724_s4 + $0x58] sm:$0xff]  }
 0x3da   :  { %v4261_v58 = vld [vmem:[#allocation4] sm:$0x1f] }
 0x3db   :  { %v4348_v8 = vrot.slane %v4261_v58, %v7789_v36  ;;  %v4341_v53 = vcombine.high %v4261_v58, %v4261_v58  ;;  %v6072_v58 = vld [vmem:[%s7724_s4 + $0xd8] sm:$0xff]  }
 0x3dd   :  { %v4356_v28 = vcombine.high %v4348_v8, %v4348_v8  ;;  %v4363_v21 = vrot.slane %v4348_v8, %v7789_v36  ;;  %v4355_v15 = vrot.slane %v4341_v53, %v7789_v36  ;;  %v6073_v8 = vld [vmem:[%s7724_s4 + $0x18] sm:$0xff]   ;;  %v6082_v53 = vld [vmem:[%s7724_s4 + $0xa8] sm:$0xff]  }
 0x3df   :  { %v4377_v48 = vrot.slane %v4356_v28, %v7789_v36  ;;  %v4378_v12 = vcombine.high %v4363_v21, %v4363_v21  ;;  %v4370_v39 = vrot.slane %v4355_v15, %v7789_v36  ;;  %v6043_v36 = vld [vmem:[%s7723_s3 + $0x24] ss:$16 sps:$4 sm:$0xff]   ;;  %v6074_v28 = vld [vmem:[%s7724_s4 + $0x98] sm:$0xff]  }
 0x3e0   :  { %v6084_v15 = vld [vmem:[%s7724_s4 + $0xf0] sm:$0xff]  }
 0x3e1   :  { %4635 = vmatprep.mubr.bf16.mxu0 %v4377_v48  ;;  %v4379_v2 = vcombine.high %v4377_v48, %v4377_v48  ;;  %v6076_v48 = vld [vmem:[%s7724_s4 + $0xe0] sm:$0xff]  }
 0x3e2   :  { %4636 = vmatmul.mubr.bf16.vlgmr.msra.gmra.mrb[32].mxu0 %v4363_v21  ;;  %v6075_v21 = vld [vmem:[%s7724_s4 + $0x60] sm:$0xff]  }
 0x3e3   :  { %5872 = vmatpush3.bf16.msra.mxu0 %v6031_v5  ;;  %4675 = vmatprep.mubr.bf16.mxu1 %v4379_v2  ;;  %v6077_v5 = vld [vmem:[%s7724_s4 + $0x20] sm:$0xff]  }
 0x3e4   :  { %4676 = vmatmul.mubr.bf16.vlgmr.msra.gmra.mrb[16].mxu1 %v4378_v12  ;;  %5873 = vmatprep.subr.bf16.mxu0 %v6169_v62  ;;  %v6078_v2 = vld [vmem:[%s7724_s4 + $0xa0] sm:$0xff]   ;;  %v6079_v12 = vld [vmem:[%s7724_s4 + $0x68] sm:$0xff]  }
 0x3e5   :  { %5879 = vmatprep.mubr.msk.bf16.mxu0 %vm6170_vm3, %v6169_v62  ;;  %4846 = vmatpush1.bf16.msra.mxu1 %v6035_v45  ;;  %v6086_v45 = vld [vmem:[%s7724_s4 + $0xb0] sm:$0xff]  }
 0x3e6   :  { %4847 = vmatprep.subr.bf16.mxu1 %v6043_v36  ;;  %4877 = vmatprep.mubr.bf16.mxu1 %v6171_v13  ;;  %v6090_v36 = vld [vmem:[%s7724_s4 + $0xb8] sm:$0xff]  }
 0x3e7   :  { %5874 = vmatpush3.bf16.msra.mxu0 %v6032_v4  ;;  %v6080_v4 = vld [vmem:[%s7724_s4 + $0xe8] sm:$0xff]  }
 0x3e8   :  { %5875 = vmatprep.subr.bf16.mxu0 %v6169_v62 }
 0x3e9   :  { %4848 = vmatpush1.bf16.msra.mxu1 %v6041_v43 }
 0x3ea   :  { %4849 = vmatprep.subr.bf16.mxu1 %v6049_v59  ;;  %v4223_v59 = vld [vmem:[%s7725_s5 + $0x3] sm:$0xf] }
 0x3eb   :  { %5876 = vmatpush3.bf16.msra.mxu0 %v6033_v60  ;;  %v6081_v60 = vld [vmem:[%s7724_s4 + $0x28] sm:$0xff]  }
 0x3ec   :  { %5877 = vmatprep.subr.bf16.mxu0 %v6169_v62  ;;  %v6067_v62 = vld [vmem:[%s7724_s4 + $0x50] sm:$0xff]  }
 0x3ed   :  { %4850 = vmatpush1.bf16.msra.mxu1 %v6047_v54 }
 0x3ee   :  { %4851 = vmatprep.subr.bf16.mxu1 %v6055_v22 }
 0x3ef   :  { %5878 = vmatpush3.bf16.msra.mxu0 %v6034_v17  ;;  %v6083_v17 = vld [vmem:[%s7724_s4 + $0x70] sm:$0xff]  }
 0x3f0   :  { %4886 = vmatprep.subr.bf16.mxu0 %v6040_v38  ;;  %v6089_v38 = vld [vmem:[%s7724_s4 + $0x38] sm:$0xff]  }
 0x3f1   :  { %4852 = vmatpush1.bf16.msra.mxu1 %v6053_v1 }
 0x3f2   :  { %5880 = vmatmul.mubr.msk.bf16.vlgmr.msra.gmra.mrb[36].mxu0 %vm77_vm7, %v4370_v39  ;;  %5827 = vmatprep.subr.bf16.mxu1 %v6059_v0  ;;  %v6085_v39 = vld [vmem:[%s7724_s4 + $0x30] sm:$0xff]  }
 0x3f3   :  { %4887 = vmatpush1.bf16.msra.mxu0 %v6038_v26  ;;  %4918 = vmatprep.mubr.bf16.mxu0 %v6171_v13  ;;  %v6088_v26 = vld [vmem:[%s7724_s4 + $0xf8] sm:$0xff]  }
 0x3f4   :  { %4888 = vmatprep.subr.bf16.mxu0 %v6046_v61  ;;  %v7790_v61 = vld [vmem:[#allocation8_spill] sm:$0xff] }
 0x3f5   :  { %v4744_v43 = vsub.s32 0, %v7790_v61  ;;  %v4756_v54 = vsub.s32 3, %v7790_v61 }
 0x3f7   :  { %4889 = vmatpush1.bf16.msra.mxu0 %v6044_v7  ;;  %v4752_v7 = vsub.s32 2, %v7790_v61 }
 0x3f8   :  { %4890 = vmatprep.subr.bf16.mxu0 %v6052_v44  ;;  %v4748_v44 = vsub.s32 1, %v7790_v61 }
 0x3f9   :  { %v4753_v1 = vrot.slane %v4223_v59, %v4752_v7 }
 0x3fa   :  { %v4749_v22 = vrot.slane %v4223_v59, %v4748_v44 }
 0x3fb   :  { %4891 = vmatpush1.bf16.msra.mxu0 %v6050_v11  ;;  %v4745_v11 = vrot.slane %v4223_v59, %v4744_v43 }
 0x3fc   :  { %4892 = vmatprep.subr.bf16.mxu0 %v6058_v34 }
 0x3ff   :  { %4893 = vmatpush1.bf16.msra.mxu0 %v6056_v10  ;;  %v4757_v10 = vrot.slane %v4223_v59, %v4756_v54 }
 0x400   :  { %5849 = vmatprep.subr.bf16.mxu0 %v6060_v42 }
 0x4b5   :  { %v5794_v49 = vpop.f32.mrb[32].mxu0 }
 0x4b6   :  { %v5795_v46 = vpop.f32.mrb[33].mxu0 }
 0x4b7   :  { %v5796_v25 = vadd.f32 %v5795_v46, %v5794_v49  ;;  %v5797_v47 = vpop.f32.mrb[34].mxu0  ;;  %v5816_v32 = vpop.f32.mrb[16].mxu1 }
 0x4b8   :  { %v5798_v29 = vpop.f32.mrb[35].mxu0  ;;  %v5817_v40 = vpop.f32.mrb[17].mxu1 }
 0x4b9   :  { %v4638_v33 = vadd.f32 %v5796_v25, %v5569_v35  ;;  %v5818_v57 = vadd.f32 %v5817_v40, %v5816_v32  ;;  %v5819_v23 = vpop.f32.mrb[18].mxu1 }
 0x4ba   :  { %v5820_v9 = vpop.f32.mrb[19].mxu1 }
 0x4bb   :  { %v4678_v6 = vadd.f32 %v5818_v57, %v4638_v33 }
 0x4c5   :  { %v4717_v56 = vpop.f32.mrb[36].mxu0 }
 0x4c6   :  { %v4718_v51 = vadd.f32 %v4717_v56, %v4678_v6  ;;  %v5881_v55 = vpop.f32.mrb[37].mxu0 }
 0x4c7   :  { %v4720_v20 = vpop.f32.mrb[38].mxu0 }
 0x4c8   :  { %v4723_v16 = vmax.f32 %v4718_v51, 0.0  ;;  %v5882_v27 = vpop.f32.mrb[39].mxu0 }
 0x4c9   :  { %v5625_v27 = vld [vmem:[%s7725_s5 + $0x7] ss:$0 sm:$0xff] }
 0x4ca   :  { %v4724_v52 = vpack.c.bf16 %v4723_v16, %v4723_v16 }
 0x4cc   :  { %5623 = vmatmul.mubr.msk.bf16.vlgmr.msra.gmra.mrb[20].mxu1 %vm77_vm7, %v4724_v52  ;;  %5624 = vmatmul.mubr.msk.bf16.vlgmr.msra.gmra.mrb[40].mxu0 %vm77_vm7, %v4724_v52 }
 0x4cd   :  { %5828 = vmatpush3.bf16.msra.mxu1 %v6061_v41  ;;  %5850 = vmatpush3.bf16.msra.mxu0 %v6062_v63 }
 0x4ce   :  { %5829 = vmatprep.subr.bf16.mxu1 %v6063_v37  ;;  %5851 = vmatprep.subr.bf16.mxu0 %v6064_v14 }
 0x4d1   :  { %5830 = vmatpush3.bf16.msra.mxu1 %v6065_v3  ;;  %5852 = vmatpush3.bf16.msra.mxu0 %v6066_v19 }
 0x4d2   :  { %5831 = vmatprep.subr.bf16.mxu1 %v6067_v62  ;;  %5853 = vmatprep.subr.bf16.mxu0 %v6068_v31 }
 0x4d5   :  { %5832 = vmatpush3.bf16.msra.mxu1 %v6069_v24  ;;  %5854 = vmatpush3.bf16.msra.mxu0 %v6070_v18 }
 0x4d6   :  { %5833 = vmatprep.subr.bf16.mxu1 %v6071_v30  ;;  %5855 = vmatprep.subr.bf16.mxu0 %v6072_v58 }
 0x4d9   :  { %5834 = vmatpush3.bf16.msra.mxu1 %v6073_v8  ;;  %5856 = vmatpush3.bf16.msra.mxu0 %v6074_v28 }
 0x4da   :  { %5835 = vmatprep.subr.bf16.mxu1 %v6075_v21  ;;  %5857 = vmatprep.subr.bf16.mxu0 %v6076_v48 }
 0x4dd   :  { %5836 = vmatpush3.bf16.msra.mxu1 %v6077_v5  ;;  %5858 = vmatpush3.bf16.msra.mxu0 %v6078_v2 }
 0x4de   :  { %5837 = vmatprep.subr.bf16.mxu1 %v6079_v12  ;;  %5859 = vmatprep.subr.bf16.mxu0 %v6080_v4 }
 0x4e1   :  { %5838 = vmatpush3.bf16.msra.mxu1 %v6081_v60  ;;  %5860 = vmatpush3.bf16.msra.mxu0 %v6082_v53 }
 0x4e2   :  { %5839 = vmatprep.subr.bf16.mxu1 %v6083_v17  ;;  %5861 = vmatprep.subr.bf16.mxu0 %v6084_v15 }
 0x4e5   :  { %5840 = vmatpush3.bf16.msra.mxu1 %v6085_v39  ;;  %5862 = vmatpush3.bf16.msra.mxu0 %v6086_v45 }
 0x4e6   :  { %5841 = vmatprep.subr.bf16.mxu1 %v6087_v50  ;;  %5863 = vmatprep.subr.bf16.mxu0 %v6088_v26 }
 0x4e9   :  { %5842 = vmatpush3.bf16.msra.mxu1 %v6089_v38  ;;  %5864 = vmatpush3.bf16.msra.mxu0 %v6090_v36 }
 0x59f   :  { %v4879_v34 = vpop.f32.mrb[20].mxu1  ;;  %v4920_v13 = vpop.f32.mrb[40].mxu0 }
 0x5a0   :  { %v4880_v0 = vadd.f32 %v4879_v34, %v4745_v11  ;;  %v4921_v42 = vadd.f32 %v4920_v13, %v4753_v1  ;;  %v4881_v49 = vpop.f32.mrb[21].mxu1  ;;  %v4922_v35 = vpop.f32.mrb[41].mxu0 }
 0x5a1   :  { %v4882_v46 = vadd.f32 %v4881_v49, %v4749_v22  ;;  %v4923_v25 = vadd.f32 %v4922_v35, %v4757_v10  ;;  %v4883_v47 = vpop.f32.mrb[22].mxu1  ;;  %v4924_v32 = vpop.f32.mrb[42].mxu0 }
 0x5a2   :  { %v4927_v29 = vmax.f32 %v4880_v0, 0.0  ;;  %v4929_v40 = vmax.f32 %v4921_v42, 0.0  ;;  %v4884_v33 = vpop.f32.mrb[23].mxu1  ;;  %v4925_v57 = vpop.f32.mrb[43].mxu0 }
 0x5a3   :  { %v4928_v23 = vmax.f32 %v4882_v46, 0.0  ;;  %v4930_v9 = vmax.f32 %v4923_v25, 0.0 }
 0x5a4   :  { %v4931_v51 = vpack.c.bf16 %v4927_v29, %v4927_v29  ;;  %v4933_v55 = vpack.c.bf16 %v4929_v40, %v4929_v40 }
 0x5a5   :  { %v4932_v6 = vpack.c.bf16 %v4928_v23, %v4928_v23  ;;  %v4934_v56 = vpack.c.bf16 %v4930_v9, %v4930_v9 }
 0x5a7   :  { %5230 = vmatprep.mubr.bf16.mxu1 %v4932_v6  ;;  %5270 = vmatprep.mubr.bf16.mxu0 %v4934_v56 }
 0x5a8   :  { %5231 = vmatmul.mubr.bf16.vlgmr.msra.gmra.mrb[24].mxu1 %v4931_v51  ;;  %5271 = vmatmul.mubr.bf16.vlgmr.msra.gmra.mrb[44].mxu0 %v4933_v55 }
 0x67b   :  { %v5843_v20 = vpop.f32.mrb[24].mxu1  ;;  %v5865_v16 = vpop.f32.mrb[44].mxu0 }
 0x67c   :  { %v5844_v41 = vpop.f32.mrb[25].mxu1  ;;  %v5866_v63 = vpop.f32.mrb[45].mxu0 }
 0x67d   :  { %v5845_v52 = vadd.f32 %v5844_v41, %v5843_v20  ;;  %v5867_v37 = vadd.f32 %v5866_v63, %v5865_v16  ;;  %v5846_v14 = vpop.f32.mrb[26].mxu1  ;;  %v5868_v3 = vpop.f32.mrb[46].mxu0 }
 0x67e   :  { %v5847_v19 = vpop.f32.mrb[27].mxu1  ;;  %v5869_v62 = vpop.f32.mrb[47].mxu0 }
 0x67f   :  { %v5233_v31 = vadd.f32 %v5845_v52, %v5625_v27 }
 0x681   :  { %v5273_v24 = vadd.f32 %v5867_v37, %v5233_v31 }
 0x683   :  { %5278 = vst [vmem:[#allocation5] sm:$0x3] %v5273_v24 }
 0x684   :  { %6150 = shalt.err (!%p6147_p4)
}
 0x685   :  { %s6151_s7 = scalar_lea.hbm %s7726_s6, 32 }
 0x686   :  { %p6152_p5 = scmp.ne.s32.totalorder %s7726_s6, %s6151_s7  ;;  %p6155_p6 = scmp.lt.u32.totalorder %s6151_s7, %s7726_s6 }
 0x688   :  { %p6157_p7 = pnand %p6155_p6, %p6152_p5 }
 0x68a   :  { %6160 = shalt.err (!%p6157_p7)
}
 0x68b   :  { %5288 = dma.vmem_to_hbm [thread:$0]  %s5286_s29, 32, %s7726_s6, [#allocation6]  }
 0x68c   :  { %6161 = dma.done.wait [#allocation6], 32  }
 0x68d   :  { %6162 = vsyncadd [#allocation6], 4294967264 }
 0x68e   :  { %5292 = vsyncpa [#allocation6], 1 }

</bundles_post_ra>
